<compile_context>
chip_gen: v7x
topology: tpu7x:2x2x1
jax: 0.10.0
libtpu: 0.0.40
codegen_flags: <defaults>
</compile_context>

<pallas_src>
import math

import numpy as np
import jax
import jax.numpy as jnp
from jax.experimental import pallas as pl
from jax.experimental.pallas import tpu as pltpu

_BN_EPS = 1e-5
_NORM_EPS = 1e-12
_OFF = 8          # aligned sublane offset at which the conv payload is staged


def _round_up(x, m):
    return (x + m - 1) // m * m


# ----------------------------------------------------------------------------
# In-kernel building blocks (operate on (W, C) values + a VMEM scratch ref)
# ----------------------------------------------------------------------------
def _snake(x, a_ref, ia_ref):
    # SnakeActivation: x + (1/a) * sin(a*x)^2 with per-channel a (1/a precomputed).
    s = jnp.sin(a_ref[...] * x)
    return x + ia_ref[...] * (s * s)


def _dw_conv_full(scr, y, w_ref, b_ref, *, ksize, replicate):
    """Depthwise conv along W, pad=1 both sides, stride 1 (full resolution).

    y: (W, C) value; w_ref: (K, C) ref with w_ref[k, c] == torch weight[c,0,0,k];
    b_ref: (1, C).  The padded input is staged in `scr`: the payload is stored
    at the 8-aligned sublane offset _OFF, the two pad rows are single-row
    stores at _OFF-1 and _OFF+W.  Each tap k is then a static contiguous slice
    of length W + 2 - K + 1 multiplied by w[k] and accumulated on the VPU; the
    bias is folded into the tap-0 initialization.
    """
    w_in, c = y.shape
    w_full = w_in + 2 - ksize + 1
    if replicate:                       # padding_mode='replicate'
        left = y[0:1, :]
        right = y[w_in - 1:w_in, :]
    else:                               # default zero padding
        left = jnp.zeros((1, c), jnp.float32)
        right = left
    scr[_OFF - 1:_OFF, :c] = left
    scr[_OFF + w_in:_OFF + w_in + 1, :c] = right
    scr[_OFF:_OFF + w_in, :c] = y
    # tap 0 initializes the accumulator, bias folded in (no zeros broadcast).
    acc = scr[_OFF - 1:_OFF - 1 + w_full, :c] * w_ref[0:1, :] + b_ref[...]
    for k in range(1, ksize):
        lo = _OFF - 1 + k
        acc = acc + scr[lo:lo + w_full, :c] * w_ref[k:k + 1, :]
    return acc


def _downsample2(acc):
    """out[i] = acc[2i]: stride-2 pick of the full-resolution conv output via a
    single (W_out, W_full) 0/1 selection matmul (tiny; MXU otherwise idle)."""
    w_full, c = acc.shape
    w_out = (w_full + 1) // 2
    ri = jax.lax.broadcasted_iota(jnp.int32, (w_out, w_full), 0)
    ci = jax.lax.broadcasted_iota(jnp.int32, (w_out, w_full), 1)
    sel = (ci == 2 * ri).astype(jnp.float32)
    return jnp.dot(sel, acc, preferred_element_type=jnp.float32)


def _enc_block(h, wr, scr):
    """VQVAEEncBlock: dw (1,4) stride (1,2) replicate-pad -> 1x1 conv (BN folded)
    -> Snake.  Dropout == identity in eval mode."""
    dww, dwb, pww, pwb, a, ia = wr
    acc = _dw_conv_full(scr, h, dww, dwb, ksize=4, replicate=True)
    hd = _downsample2(acc)                                         # (W_out, Cin)
    z = jnp.dot(hd, pww[...], preferred_element_type=jnp.float32) + pwb[...]
    return _snake(z, a, ia)


def _res_block(h, wr, scr, has_proj):
    """ResBlock: proj(x) + [Snake -> dw (1,3) -> 1x1 (BN folded) -> Snake ->
    dw (1,3) -> 1x1].  The projection matmul is skipped when Cin == Cout."""
    if has_proj:
        a1, ia1, d1w, d1b, p1w, p1b, a2, ia2, d2w, d2b, p2w, p2b, prw, prb = wr
    else:
        a1, ia1, d1w, d1b, p1w, p1b, a2, ia2, d2w, d2b, p2w, p2b = wr
    z = _snake(h, a1, ia1)
    z = _dw_conv_full(scr, z, d1w, d1b, ksize=3, replicate=False)
    z = jnp.dot(z, p1w[...], preferred_element_type=jnp.float32) + p1b[...]
    z = _snake(z, a2, ia2)
    z = _dw_conv_full(scr, z, d2w, d2b, ksize=3, replicate=False)
    z = jnp.dot(z, p2w[...], preferred_element_type=jnp.float32) + p2b[...]
    if has_proj:
        return jnp.dot(h, prw[...], preferred_element_type=jnp.float32) + prb[...] + z
    return h + z


# ----------------------------------------------------------------------------
# Host-side parameter folding + the single fused pallas_call
# ----------------------------------------------------------------------------
def _fold_bn(pw, pb, g, b, m, v):
    """Fold eval-mode BatchNorm2d into the preceding 1x1 conv."""
    scale = g * jax.lax.rsqrt(v + _BN_EPS)                  # (1, Cout)
    return pw * scale, pb * scale + (b - m * scale)


def _prepare_layers(raw_layers):
    plan, flat = [], []
    for kind, p in raw_layers:
        if kind == "enc":
            pww, pwb = _fold_bn(p["pww"], p["pwb"], p["g"], p["b"], p["m"], p["v"])
            arrs = [p["dww"], p["dwb"], pww, pwb, p["a"], 1.0 / p["a"]]
            plan.append(dict(kind="enc", n=len(arrs), has_proj=False))
        else:
            p1w, p1b = _fold_bn(p["p1w"], p["p1b"], p["g"], p["b"], p["m"], p["v"])
            arrs = [p["a1"], 1.0 / p["a1"], p["d1w"], p["d1b"], p1w, p1b,
                    p["a2"], 1.0 / p["a2"], p["d2w"], p["d2b"], p["p2w"], p["p2b"]]
            has_proj = "prw" in p
            if has_proj:
                arrs += [p["prw"], p["prb"]]
            plan.append(dict(kind="res", n=len(arrs), has_proj=has_proj))
        flat.extend(arrs)
    return plan, flat


def _trace_dims(raw_layers, w0, c0):
    """Trace (W, C) through the layer stack; size the shared conv scratch."""
    w, c = w0, c0
    max_w_in, max_c_in = 1, 1
    for kind, p in raw_layers:
        max_w_in = max(max_w_in, w)
        if kind == "enc":
            cin, cout = p["pww"].shape
            max_c_in = max(max_c_in, cin)
            w = (w + 2 - 4) // 2 + 1
            c = cout
        else:
            cin, mid = p["p1w"].shape
            cout = p["p2w"].shape[1]
            max_c_in = max(max_c_in, cin, mid)
            c = cout
    scr_h = _round_up(_OFF + max_w_in + 1, 8)
    scr_c = _round_up(max_c_in, 128)
    return w, c, scr_h, scr_c


def fused_encoder(h, raw_layers):
    """h: (B, W0, C0) f32 -> (B, W_out, C_out) f32, L2-normalized over channels.
    The whole encoder (all blocks + F.normalize) is one pallas_call."""
    b, w0, c0 = h.shape
    plan, flat = _prepare_layers(raw_layers)
    w_out, c_out, scr_h, scr_c = _trace_dims(raw_layers, w0, c0)
    n_w = len(flat)

    def kernel(*refs):
        x_ref = refs[0]
        wrefs = refs[1:1 + n_w]
        o_ref = refs[1 + n_w]
        scr = refs[2 + n_w]
        hcur = x_ref[0]                                        # (W0, C0)
        idx = 0
        for lay in plan:
            wr = wrefs[idx:idx + lay["n"]]
            idx += lay["n"]
            if lay["kind"] == "enc":
                hcur = _enc_block(hcur, wr, scr)
            else:
                hcur = _res_block(hcur, wr, scr, lay["has_proj"])
        # F.normalize(out, dim=1): channels are the last dim in this layout.
        ss = jnp.sum(hcur * hcur, axis=-1, keepdims=True)
        hcur = hcur * jax.lax.rsqrt(jnp.maximum(ss, _NORM_EPS * _NORM_EPS))
        o_ref[0] = hcur

    in_specs = [pl.BlockSpec((1, w0, c0), lambda i: (i, 0, 0))]
    # Constant index_maps: weights are DMA'd once and stay resident in VMEM.
    in_specs += [pl.BlockSpec(arr.shape, lambda i: (0, 0)) for arr in flat]

    return pl.pallas_call(
        kernel,
        out_shape=jax.ShapeDtypeStruct((b, w_out, c_out), jnp.float32),
        grid=(b,),
        in_specs=in_specs,
        out_specs=pl.BlockSpec((1, w_out, c_out), lambda i: (i, 0, 0)),
        scratch_shapes=[pltpu.VMEM((scr_h, scr_c), jnp.float32)],
        compiler_params=pltpu.CompilerParams(dimension_semantics=("parallel",)),
    )(h, *flat)


# ----------------------------------------------------------------------------
# STFT preprocessing (time_to_timefreq), DC bin only for kind='lf'.
# torch.stft defaults: hop=n_fft//4, periodic hann, center=True, reflect pad.
# ----------------------------------------------------------------------------
def time_to_timefreq_dc(x, n_fft):
    """Returns (B, 2*C, T) with channel order [c0_re, c0_im, c1_re, c1_im, ...].
    DC bin: real = sum(window * frame), imag = 0."""
    b, c, l = x.shape
    hop = n_fft // 4
    pad = n_fft // 2
    sig = x.reshape(b * c, l)
    sig = jnp.pad(sig, ((0, 0), (pad, pad)), mode="reflect")
    n_frames = (l + 2 * pad - n_fft) // hop + 1
    idx = np.arange(n_frames)[:, None] * hop + np.arange(n_fft)[None, :]
    n = np.arange(n_fft)
    window = (0.5 - 0.5 * np.cos(2.0 * np.pi * n / n_fft)).astype(np.float32)
    frames = sig[:, idx] * jnp.asarray(window)               # (BC, T, n_fft)
    real = jnp.sum(frames, axis=-1).reshape(b, c, n_frames)  # DC bin
    imag = jnp.zeros_like(real)
    spec = jnp.stack([real, imag], axis=2)                   # (B, C, 2, T)
    return spec.reshape(b, c * 2, n_frames)                  # channel = c*2 + z


# ----------------------------------------------------------------------------
# Deterministic synthetic parameter initialization (mirrors VQVAEEncoder.__init__)
# ----------------------------------------------------------------------------
def _normal(key, shape, scale=0.2):
    return scale * jax.random.normal(key, shape, dtype=jnp.float32)


def _enc_block_params(key, cin, cout):
    ks = jax.random.split(key, 9)
    return dict(
        dww=_normal(ks[0], (4, cin)),
        dwb=_normal(ks[1], (1, cin), 0.05),
        pww=_normal(ks[2], (cin, cout)),
        pwb=_normal(ks[3], (1, cout), 0.05),
        g=1.0 + 0.1 * jax.random.normal(ks[4], (1, cout), dtype=jnp.float32),
        b=_normal(ks[5], (1, cout), 0.05),
        m=_normal(ks[6], (1, cout), 0.05),
        v=1.0 + 0.1 * jax.random.uniform(ks[7], (1, cout), dtype=jnp.float32),
        a=0.2 + 0.05 * jax.random.uniform(ks[8], (1, cout), dtype=jnp.float32),
    )


def _res_block_params(key, cin, cout):
    mid = cout
    ks = jax.random.split(key, 16)
    p = dict(
        a1=0.2 + 0.05 * jax.random.uniform(ks[0], (1, cin), dtype=jnp.float32),
        d1w=_normal(ks[1], (3, cin)),
        d1b=_normal(ks[2], (1, cin), 0.05),
        p1w=_normal(ks[3], (cin, mid)),
        p1b=_normal(ks[4], (1, mid), 0.05),
        g=1.0 + 0.1 * jax.random.normal(ks[5], (1, mid), dtype=jnp.float32),
        b=_normal(ks[6], (1, mid), 0.05),
        m=_normal(ks[7], (1, mid), 0.05),
        v=1.0 + 0.1 * jax.random.uniform(ks[8], (1, mid), dtype=jnp.float32),
        a2=0.2 + 0.05 * jax.random.uniform(ks[9], (1, mid), dtype=jnp.float32),
        d2w=_normal(ks[10], (3, mid)),
        d2b=_normal(ks[11], (1, mid), 0.05),
        p2w=_normal(ks[12], (mid, cout)),
        p2b=_normal(ks[13], (1, cout), 0.05),
    )
    if cin != cout:                       # proj is nn.Identity when cin == cout
        p["prw"] = _normal(ks[14], (cin, cout))
        p["prb"] = _normal(ks[15], (1, cout), 0.05)
    return p


def build_encoder_params(key, *, num_channels, init_dim, hid_dim,
                         downsample_rate, n_resnet_blocks):
    d = init_dim
    specs = [("enc", num_channels, d)]
    d *= 2
    for _ in range(int(round(math.log2(downsample_rate))) - 1):
        specs.append(("enc", d // 2, d))
        for _ in range(n_resnet_blocks):
            specs.append(("res", d, d))
        d *= 2
    specs.append(("res", d // 2, hid_dim))
    keys = jax.random.split(key, len(specs))
    layers = []
    for k, (kind, cin, cout) in zip(keys, specs):
        if kind == "enc":
            layers.append(("enc", _enc_block_params(k, cin, cout)))
        else:
            layers.append(("res", _res_block_params(k, cin, cout)))
    return layers


# ----------------------------------------------------------------------------
# Full forward
# ----------------------------------------------------------------------------
def vqvae_encoder_forward(x, layer_params, *, n_fft, kind="lf"):
    """x: (B, C, L) time series -> (B, hid_dim, 1, W') normalized features."""
    assert kind == "lf"
    # TODO(synk): kind='hf' (F > 1 frequency bins) and frequency_indepence=False
    # 3x3 convs are not implemented; they'd need the full DFT and a frequency axis.
    spec = time_to_timefreq_dc(x, n_fft)                    # (B, 2C, T)
    h = jnp.transpose(spec, (0, 2, 1))                      # (B, W=T, C=2C)
    out = fused_encoder(h, layer_params)                    # (B, W', hid_dim)
    return jnp.transpose(out, (0, 2, 1))[:, :, None, :]     # NCHW (B, hid, 1, W')


if __name__ == "__main__":
    key = jax.random.PRNGKey(0)
    k_x, k_p = jax.random.split(key)

    # Small config: batch=2, 2 time-series channels, length 64, n_fft=8.
    B, C_IN, L = 2, 2, 64
    N_FFT = 8
    INIT_DIM, HID_DIM = 8, 32
    DOWNSAMPLE_RATE, N_RESNET_BLOCKS = 4, 1

    x = jax.random.normal(k_x, (B, C_IN, L), dtype=jnp.float32)
    # Encoder is constructed with num_channels == 2*C_IN (real+imag STFT chans).
    params = build_encoder_params(
        k_p, num_channels=2 * C_IN, init_dim=INIT_DIM, hid_dim=HID_DIM,
        downsample_rate=DOWNSAMPLE_RATE, n_resnet_blocks=N_RESNET_BLOCKS)

    out = vqvae_encoder_forward(x, params, n_fft=N_FFT, kind="lf")
    out = jax.block_until_ready(out)
    assert out.shape == (B, HID_DIM, 1, 8)
    assert bool(jnp.all(jnp.isfinite(out)))
    print("KERNEL_OK")
</pallas_src>

<mosaic_0001>
module attributes {stable_mosaic.version = 11 : i64} {
  func.func @kernel(%arg0: i32, %arg1: memref<1x33x4xf32, #tpu.memory_space<vmem>>, %arg2: memref<4x4xf32, #tpu.memory_space<vmem>>, %arg3: memref<1x4xf32, #tpu.memory_space<vmem>>, %arg4: memref<4x8xf32, #tpu.memory_space<vmem>>, %arg5: memref<1x8xf32, #tpu.memory_space<vmem>>, %arg6: memref<1x8xf32, #tpu.memory_space<vmem>>, %arg7: memref<1x8xf32, #tpu.memory_space<vmem>>, %arg8: memref<4x8xf32, #tpu.memory_space<vmem>>, %arg9: memref<1x8xf32, #tpu.memory_space<vmem>>, %arg10: memref<8x16xf32, #tpu.memory_space<vmem>>, %arg11: memref<1x16xf32, #tpu.memory_space<vmem>>, %arg12: memref<1x16xf32, #tpu.memory_space<vmem>>, %arg13: memref<1x16xf32, #tpu.memory_space<vmem>>, %arg14: memref<1x16xf32, #tpu.memory_space<vmem>>, %arg15: memref<1x16xf32, #tpu.memory_space<vmem>>, %arg16: memref<3x16xf32, #tpu.memory_space<vmem>>, %arg17: memref<1x16xf32, #tpu.memory_space<vmem>>, %arg18: memref<16x16xf32, #tpu.memory_space<vmem>>, %arg19: memref<1x16xf32, #tpu.memory_space<vmem>>, %arg20: memref<1x16xf32, #tpu.memory_space<vmem>>, %arg21: memref<1x16xf32, #tpu.memory_space<vmem>>, %arg22: memref<3x16xf32, #tpu.memory_space<vmem>>, %arg23: memref<1x16xf32, #tpu.memory_space<vmem>>, %arg24: memref<16x16xf32, #tpu.memory_space<vmem>>, %arg25: memref<1x16xf32, #tpu.memory_space<vmem>>, %arg26: memref<1x16xf32, #tpu.memory_space<vmem>>, %arg27: memref<1x16xf32, #tpu.memory_space<vmem>>, %arg28: memref<3x16xf32, #tpu.memory_space<vmem>>, %arg29: memref<1x16xf32, #tpu.memory_space<vmem>>, %arg30: memref<16x32xf32, #tpu.memory_space<vmem>>, %arg31: memref<1x32xf32, #tpu.memory_space<vmem>>, %arg32: memref<1x32xf32, #tpu.memory_space<vmem>>, %arg33: memref<1x32xf32, #tpu.memory_space<vmem>>, %arg34: memref<3x32xf32, #tpu.memory_space<vmem>>, %arg35: memref<1x32xf32, #tpu.memory_space<vmem>>, %arg36: memref<32x32xf32, #tpu.memory_space<vmem>>, %arg37: memref<1x32xf32, #tpu.memory_space<vmem>>, %arg38: memref<16x32xf32, #tpu.memory_space<vmem>>, %arg39: memref<1x32xf32, #tpu.memory_space<vmem>>, %arg40: memref<1x8x32xf32, #tpu.memory_space<vmem>>, %arg41: memref<48x128xf32, #tpu.memory_space<vmem>>) attributes {dimension_semantics = [#tpu.dimension_semantics<parallel>], iteration_bounds = array<i64: 2>, scalar_prefetch = 0 : i64, scratch_operands = 1 : i64, tpu.core_type = #tpu.core_type<tc>, window_params = [{transform_indices = @transform_0, window_bounds = array<i64: 1, 33, 4>}, {pipeline_mode = #tpu.pipeline_mode<synchronous>, transform_indices = @transform_1, window_bounds = array<i64: 4, 4>}, {pipeline_mode = #tpu.pipeline_mode<synchronous>, transform_indices = @transform_2, window_bounds = array<i64: 1, 4>}, {pipeline_mode = #tpu.pipeline_mode<synchronous>, transform_indices = @transform_3, window_bounds = array<i64: 4, 8>}, {pipeline_mode = #tpu.pipeline_mode<synchronous>, transform_indices = @transform_4, window_bounds = array<i64: 1, 8>}, {pipeline_mode = #tpu.pipeline_mode<synchronous>, transform_indices = @transform_5, window_bounds = array<i64: 1, 8>}, {pipeline_mode = #tpu.pipeline_mode<synchronous>, transform_indices = @transform_6, window_bounds = array<i64: 1, 8>}, {pipeline_mode = #tpu.pipeline_mode<synchronous>, transform_indices = @transform_7, window_bounds = array<i64: 4, 8>}, {pipeline_mode = #tpu.pipeline_mode<synchronous>, transform_indices = @transform_8, window_bounds = array<i64: 1, 8>}, {pipeline_mode = #tpu.pipeline_mode<synchronous>, transform_indices = @transform_9, window_bounds = array<i64: 8, 16>}, {pipeline_mode = #tpu.pipeline_mode<synchronous>, transform_indices = @transform_10, window_bounds = array<i64: 1, 16>}, {pipeline_mode = #tpu.pipeline_mode<synchronous>, transform_indices = @transform_11, window_bounds = array<i64: 1, 16>}, {pipeline_mode = #tpu.pipeline_mode<synchronous>, transform_indices = @transform_12, window_bounds = array<i64: 1, 16>}, {pipeline_mode = #tpu.pipeline_mode<synchronous>, transform_indices = @transform_13, window_bounds = array<i64: 1, 16>}, {pipeline_mode = #tpu.pipeline_mode<synchronous>, transform_indices = @transform_14, window_bounds = array<i64: 1, 16>}, {pipeline_mode = #tpu.pipeline_mode<synchronous>, transform_indices = @transform_15, window_bounds = array<i64: 3, 16>}, {pipeline_mode = #tpu.pipeline_mode<synchronous>, transform_indices = @transform_16, window_bounds = array<i64: 1, 16>}, {pipeline_mode = #tpu.pipeline_mode<synchronous>, transform_indices = @transform_17, window_bounds = array<i64: 16, 16>}, {pipeline_mode = #tpu.pipeline_mode<synchronous>, transform_indices = @transform_18, window_bounds = array<i64: 1, 16>}, {pipeline_mode = #tpu.pipeline_mode<synchronous>, transform_indices = @transform_19, window_bounds = array<i64: 1, 16>}, {pipeline_mode = #tpu.pipeline_mode<synchronous>, transform_indices = @transform_20, window_bounds = array<i64: 1, 16>}, {pipeline_mode = #tpu.pipeline_mode<synchronous>, transform_indices = @transform_21, window_bounds = array<i64: 3, 16>}, {pipeline_mode = #tpu.pipeline_mode<synchronous>, transform_indices = @transform_22, window_bounds = array<i64: 1, 16>}, {pipeline_mode = #tpu.pipeline_mode<synchronous>, transform_indices = @transform_23, window_bounds = array<i64: 16, 16>}, {pipeline_mode = #tpu.pipeline_mode<synchronous>, transform_indices = @transform_24, window_bounds = array<i64: 1, 16>}, {pipeline_mode = #tpu.pipeline_mode<synchronous>, transform_indices = @transform_25, window_bounds = array<i64: 1, 16>}, {pipeline_mode = #tpu.pipeline_mode<synchronous>, transform_indices = @transform_26, window_bounds = array<i64: 1, 16>}, {pipeline_mode = #tpu.pipeline_mode<synchronous>, transform_indices = @transform_27, window_bounds = array<i64: 3, 16>}, {pipeline_mode = #tpu.pipeline_mode<synchronous>, transform_indices = @transform_28, window_bounds = array<i64: 1, 16>}, {pipeline_mode = #tpu.pipeline_mode<synchronous>, transform_indices = @transform_29, window_bounds = array<i64: 16, 32>}, {pipeline_mode = #tpu.pipeline_mode<synchronous>, transform_indices = @transform_30, window_bounds = array<i64: 1, 32>}, {pipeline_mode = #tpu.pipeline_mode<synchronous>, transform_indices = @transform_31, window_bounds = array<i64: 1, 32>}, {pipeline_mode = #tpu.pipeline_mode<synchronous>, transform_indices = @transform_32, window_bounds = array<i64: 1, 32>}, {pipeline_mode = #tpu.pipeline_mode<synchronous>, transform_indices = @transform_33, window_bounds = array<i64: 3, 32>}, {pipeline_mode = #tpu.pipeline_mode<synchronous>, transform_indices = @transform_34, window_bounds = array<i64: 1, 32>}, {pipeline_mode = #tpu.pipeline_mode<synchronous>, transform_indices = @transform_35, window_bounds = array<i64: 32, 32>}, {pipeline_mode = #tpu.pipeline_mode<synchronous>, transform_indices = @transform_36, window_bounds = array<i64: 1, 32>}, {pipeline_mode = #tpu.pipeline_mode<synchronous>, transform_indices = @transform_37, window_bounds = array<i64: 16, 32>}, {pipeline_mode = #tpu.pipeline_mode<synchronous>, transform_indices = @transform_38, window_bounds = array<i64: 1, 32>}, {transform_indices = @transform_39, window_bounds = array<i64: 1, 8, 32>}]} {
    %c0 = arith.constant 0 : index
    %c0_0 = arith.constant 0 : index
    %c0_1 = arith.constant 0 : index
    %0 = vector.load %arg1[%c0, %c0_0, %c0_1] : memref<1x33x4xf32, #tpu.memory_space<vmem>>, vector<1x33x4xf32>
    %1 = vector.shape_cast %0 : vector<1x33x4xf32> to vector<33x4xf32>
    %2 = vector.extract_strided_slice %1 {offsets = [0, 0], sizes = [1, 4], strides = [1, 1]} : vector<33x4xf32> to vector<1x4xf32>
    %3 = vector.extract_strided_slice %1 {offsets = [32, 0], sizes = [1, 4], strides = [1, 1]} : vector<33x4xf32> to vector<1x4xf32>
    %c7 = arith.constant 7 : index
    %c0_2 = arith.constant 0 : index
    %4 = vector.load %arg41[%c7, %c0_2] : memref<48x128xf32, #tpu.memory_space<vmem>>, vector<1x4xf32>
    tpu.vector_store %arg41[%c7, %c0_2], %2 {strides = array<i32>} : memref<48x128xf32, #tpu.memory_space<vmem>>, vector<1x4xf32>,
    %c41 = arith.constant 41 : index
    %c0_3 = arith.constant 0 : index
    %5 = vector.load %arg41[%c41, %c0_3] : memref<48x128xf32, #tpu.memory_space<vmem>>, vector<1x4xf32>
    tpu.vector_store %arg41[%c41, %c0_3], %3 {strides = array<i32>} : memref<48x128xf32, #tpu.memory_space<vmem>>, vector<1x4xf32>,
    %c8 = arith.constant 8 : index
    %c0_4 = arith.constant 0 : index
    %6 = vector.load %arg41[%c8, %c0_4] : memref<48x128xf32, #tpu.memory_space<vmem>>, vector<33x4xf32>
    tpu.vector_store %arg41[%c8, %c0_4], %1 {strides = array<i32>} : memref<48x128xf32, #tpu.memory_space<vmem>>, vector<33x4xf32>,
    %c7_5 = arith.constant 7 : index
    %c0_6 = arith.constant 0 : index
    %7 = vector.load %arg41[%c7_5, %c0_6] : memref<48x128xf32, #tpu.memory_space<vmem>>, vector<32x4xf32>
    %c0_7 = arith.constant 0 : index
    %c0_8 = arith.constant 0 : index
    %8 = vector.load %arg2[%c0_7, %c0_8] : memref<4x4xf32, #tpu.memory_space<vmem>>, vector<1x4xf32>
    %9 = vector.broadcast %8 : vector<1x4xf32> to vector<32x4xf32>
    %10 = arith.mulf %7, %9 : vector<32x4xf32>
    %c0_9 = arith.constant 0 : index
    %c0_10 = arith.constant 0 : index
    %11 = vector.load %arg3[%c0_9, %c0_10] : memref<1x4xf32, #tpu.memory_space<vmem>>, vector<1x4xf32>
    %12 = vector.broadcast %11 : vector<1x4xf32> to vector<32x4xf32>
    %13 = arith.addf %10, %12 : vector<32x4xf32>
    %c8_11 = arith.constant 8 : index
    %c0_12 = arith.constant 0 : index
    %14 = vector.load %arg41[%c8_11, %c0_12] : memref<48x128xf32, #tpu.memory_space<vmem>>, vector<32x4xf32>
    %c1 = arith.constant 1 : index
    %c0_13 = arith.constant 0 : index
    %15 = vector.load %arg2[%c1, %c0_13] : memref<4x4xf32, #tpu.memory_space<vmem>>, vector<1x4xf32>
    %16 = vector.broadcast %15 : vector<1x4xf32> to vector<32x4xf32>
    %17 = arith.mulf %14, %16 : vector<32x4xf32>
    %18 = arith.addf %13, %17 : vector<32x4xf32>
    %c9 = arith.constant 9 : index
    %c0_14 = arith.constant 0 : index
    %19 = vector.load %arg41[%c9, %c0_14] : memref<48x128xf32, #tpu.memory_space<vmem>>, vector<32x4xf32>
    %c2 = arith.constant 2 : index
    %c0_15 = arith.constant 0 : index
    %20 = vector.load %arg2[%c2, %c0_15] : memref<4x4xf32, #tpu.memory_space<vmem>>, vector<1x4xf32>
    %21 = vector.broadcast %20 : vector<1x4xf32> to vector<32x4xf32>
    %22 = arith.mulf %19, %21 : vector<32x4xf32>
    %23 = arith.addf %18, %22 : vector<32x4xf32>
    %c10 = arith.constant 10 : index
    %c0_16 = arith.constant 0 : index
    %24 = vector.load %arg41[%c10, %c0_16] : memref<48x128xf32, #tpu.memory_space<vmem>>, vector<32x4xf32>
    %c3 = arith.constant 3 : index
    %c0_17 = arith.constant 0 : index
    %25 = vector.load %arg2[%c3, %c0_17] : memref<4x4xf32, #tpu.memory_space<vmem>>, vector<1x4xf32>
    %26 = vector.broadcast %25 : vector<1x4xf32> to vector<32x4xf32>
    %27 = arith.mulf %24, %26 : vector<32x4xf32>
    %28 = arith.addf %23, %27 : vector<32x4xf32>
    %29 = tpu.iota {dimensions = array<i32: 0>} : vector<16x32xi32>
    %30 = tpu.iota {dimensions = array<i32: 1>} : vector<16x32xi32>
    %c2_i32 = arith.constant 2 : i32
    %31 = vector.broadcast %c2_i32 : i32 to vector<16x32xi32>
    %32 = arith.muli %31, %29 : vector<16x32xi32>
    %33 = arith.cmpi eq, %30, %32 : vector<16x32xi32>
    %34 = arith.extui %33 : vector<16x32xi1> to vector<16x32xi32>
    %35 = arith.sitofp %34 : vector<16x32xi32> to vector<16x32xf32>
    %cst = arith.constant dense<0.000000e+00> : vector<16x4xf32>
    %36 = tpu.matmul %35, %28, %cst {dimension_numbers = #tpu.dot_dimension_numbers<[1], [0], [0], [1], [0, 0, 1, 1], [], []>} : vector<16x32xf32>, vector<32x4xf32>, vector<16x4xf32> -> vector<16x4xf32>
    %c0_18 = arith.constant 0 : index
    %c0_19 = arith.constant 0 : index
    %37 = vector.load %arg4[%c0_18, %c0_19] : memref<4x8xf32, #tpu.memory_space<vmem>>, vector<4x8xf32>
    %cst_20 = arith.constant dense<0.000000e+00> : vector<16x8xf32>
    %38 = tpu.matmul %36, %37, %cst_20 {dimension_numbers = #tpu.dot_dimension_numbers<[1], [0], [0], [1], [0, 0, 1, 1], [], []>} : vector<16x4xf32>, vector<4x8xf32>, vector<16x8xf32> -> vector<16x8xf32>
    %c0_21 = arith.constant 0 : index
    %c0_22 = arith.constant 0 : index
    %39 = vector.load %arg5[%c0_21, %c0_22] : memref<1x8xf32, #tpu.memory_space<vmem>>, vector<1x8xf32>
    %40 = vector.broadcast %39 : vector<1x8xf32> to vector<16x8xf32>
    %41 = arith.addf %38, %40 : vector<16x8xf32>
    %c0_23 = arith.constant 0 : index
    %c0_24 = arith.constant 0 : index
    %42 = vector.load %arg6[%c0_23, %c0_24] : memref<1x8xf32, #tpu.memory_space<vmem>>, vector<1x8xf32>
    %43 = vector.broadcast %42 : vector<1x8xf32> to vector<16x8xf32>
    %44 = arith.mulf %43, %41 : vector<16x8xf32>
    %45 = math.sin %44 : vector<16x8xf32>
    %c0_25 = arith.constant 0 : index
    %c0_26 = arith.constant 0 : index
    %46 = vector.load %arg7[%c0_25, %c0_26] : memref<1x8xf32, #tpu.memory_space<vmem>>, vector<1x8xf32>
    %47 = arith.mulf %45, %45 : vector<16x8xf32>
    %48 = vector.broadcast %46 : vector<1x8xf32> to vector<16x8xf32>
    %49 = arith.mulf %48, %47 : vector<16x8xf32>
    %50 = arith.addf %41, %49 : vector<16x8xf32>
    %51 = vector.extract_strided_slice %50 {offsets = [0, 0], sizes = [1, 8], strides = [1, 1]} : vector<16x8xf32> to vector<1x8xf32>
    %52 = vector.extract_strided_slice %50 {offsets = [15, 0], sizes = [1, 8], strides = [1, 1]} : vector<16x8xf32> to vector<1x8xf32>
    %c7_27 = arith.constant 7 : index
    %c0_28 = arith.constant 0 : index
    %53 = vector.load %arg41[%c7_27, %c0_28] : memref<48x128xf32, #tpu.memory_space<vmem>>, vector<1x8xf32>
    tpu.vector_store %arg41[%c7_27, %c0_28], %51 {strides = array<i32>} : memref<48x128xf32, #tpu.memory_space<vmem>>, vector<1x8xf32>,
    %c24 = arith.constant 24 : index
    %c0_29 = arith.constant 0 : index
    %54 = vector.load %arg41[%c24, %c0_29] : memref<48x128xf32, #tpu.memory_space<vmem>>, vector<1x8xf32>
    tpu.vector_store %arg41[%c24, %c0_29], %52 {strides = array<i32>} : memref<48x128xf32, #tpu.memory_space<vmem>>, vector<1x8xf32>,
    %c8_30 = arith.constant 8 : index
    %c0_31 = arith.constant 0 : index
    %55 = vector.load %arg41[%c8_30, %c0_31] : memref<48x128xf32, #tpu.memory_space<vmem>>, vector<16x8xf32>
    tpu.vector_store %arg41[%c8_30, %c0_31], %50 {strides = array<i32>} : memref<48x128xf32, #tpu.memory_space<vmem>>, vector<16x8xf32>,
    %c7_32 = arith.constant 7 : index
    %c0_33 = arith.constant 0 : index
    %56 = vector.load %arg41[%c7_32, %c0_33] : memref<48x128xf32, #tpu.memory_space<vmem>>, vector<15x8xf32>
    %c0_34 = arith.constant 0 : index
    %c0_35 = arith.constant 0 : index
    %57 = vector.load %arg8[%c0_34, %c0_35] : memref<4x8xf32, #tpu.memory_space<vmem>>, vector<1x8xf32>
    %58 = vector.broadcast %57 : vector<1x8xf32> to vector<15x8xf32>
    %59 = arith.mulf %56, %58 : vector<15x8xf32>
    %c0_36 = arith.constant 0 : index
    %c0_37 = arith.constant 0 : index
    %60 = vector.load %arg9[%c0_36, %c0_37] : memref<1x8xf32, #tpu.memory_space<vmem>>, vector<1x8xf32>
    %61 = vector.broadcast %60 : vector<1x8xf32> to vector<15x8xf32>
    %62 = arith.addf %59, %61 : vector<15x8xf32>
    %c8_38 = arith.constant 8 : index
    %c0_39 = arith.constant 0 : index
    %63 = vector.load %arg41[%c8_38, %c0_39] : memref<48x128xf32, #tpu.memory_space<vmem>>, vector<15x8xf32>
    %c1_40 = arith.constant 1 : index
    %c0_41 = arith.constant 0 : index
    %64 = vector.load %arg8[%c1_40, %c0_41] : memref<4x8xf32, #tpu.memory_space<vmem>>, vector<1x8xf32>
    %65 = vector.broadcast %64 : vector<1x8xf32> to vector<15x8xf32>
    %66 = arith.mulf %63, %65 : vector<15x8xf32>
    %67 = arith.addf %62, %66 : vector<15x8xf32>
    %c9_42 = arith.constant 9 : index
    %c0_43 = arith.constant 0 : index
    %68 = vector.load %arg41[%c9_42, %c0_43] : memref<48x128xf32, #tpu.memory_space<vmem>>, vector<15x8xf32>
    %c2_44 = arith.constant 2 : index
    %c0_45 = arith.constant 0 : index
    %69 = vector.load %arg8[%c2_44, %c0_45] : memref<4x8xf32, #tpu.memory_space<vmem>>, vector<1x8xf32>
    %70 = vector.broadcast %69 : vector<1x8xf32> to vector<15x8xf32>
    %71 = arith.mulf %68, %70 : vector<15x8xf32>
    %72 = arith.addf %67, %71 : vector<15x8xf32>
    %c10_46 = arith.constant 10 : index
    %c0_47 = arith.constant 0 : index
    %73 = vector.load %arg41[%c10_46, %c0_47] : memref<48x128xf32, #tpu.memory_space<vmem>>, vector<15x8xf32>
    %c3_48 = arith.constant 3 : index
    %c0_49 = arith.constant 0 : index
    %74 = vector.load %arg8[%c3_48, %c0_49] : memref<4x8xf32, #tpu.memory_space<vmem>>, vector<1x8xf32>
    %75 = vector.broadcast %74 : vector<1x8xf32> to vector<15x8xf32>
    %76 = arith.mulf %73, %75 : vector<15x8xf32>
    %77 = arith.addf %72, %76 : vector<15x8xf32>
    %78 = tpu.iota {dimensions = array<i32: 0>} : vector<8x15xi32>
    %79 = tpu.iota {dimensions = array<i32: 1>} : vector<8x15xi32>
    %c2_i32_50 = arith.constant 2 : i32
    %80 = vector.broadcast %c2_i32_50 : i32 to vector<8x15xi32>
    %81 = arith.muli %80, %78 : vector<8x15xi32>
    %82 = arith.cmpi eq, %79, %81 : vector<8x15xi32>
    %83 = arith.extui %82 : vector<8x15xi1> to vector<8x15xi32>
    %84 = arith.sitofp %83 : vector<8x15xi32> to vector<8x15xf32>
    %cst_51 = arith.constant dense<0.000000e+00> : vector<8x8xf32>
    %85 = tpu.matmul %84, %77, %cst_51 {dimension_numbers = #tpu.dot_dimension_numbers<[1], [0], [0], [1], [0, 0, 1, 1], [], []>} : vector<8x15xf32>, vector<15x8xf32>, vector<8x8xf32> -> vector<8x8xf32>
    %c0_52 = arith.constant 0 : index
    %c0_53 = arith.constant 0 : index
    %86 = vector.load %arg10[%c0_52, %c0_53] : memref<8x16xf32, #tpu.memory_space<vmem>>, vector<8x16xf32>
    %cst_54 = arith.constant dense<0.000000e+00> : vector<8x16xf32>
    %87 = tpu.matmul %85, %86, %cst_54 {dimension_numbers = #tpu.dot_dimension_numbers<[1], [0], [0], [1], [0, 0, 1, 1], [], []>} : vector<8x8xf32>, vector<8x16xf32>, vector<8x16xf32> -> vector<8x16xf32>
    %c0_55 = arith.constant 0 : index
    %c0_56 = arith.constant 0 : index
    %88 = vector.load %arg11[%c0_55, %c0_56] : memref<1x16xf32, #tpu.memory_space<vmem>>, vector<1x16xf32>
    %89 = vector.broadcast %88 : vector<1x16xf32> to vector<8x16xf32>
    %90 = arith.addf %87, %89 : vector<8x16xf32>
    %c0_57 = arith.constant 0 : index
    %c0_58 = arith.constant 0 : index
    %91 = vector.load %arg12[%c0_57, %c0_58] : memref<1x16xf32, #tpu.memory_space<vmem>>, vector<1x16xf32>
    %92 = vector.broadcast %91 : vector<1x16xf32> to vector<8x16xf32>
    %93 = arith.mulf %92, %90 : vector<8x16xf32>
    %94 = math.sin %93 : vector<8x16xf32>
    %c0_59 = arith.constant 0 : index
    %c0_60 = arith.constant 0 : index
    %95 = vector.load %arg13[%c0_59, %c0_60] : memref<1x16xf32, #tpu.memory_space<vmem>>, vector<1x16xf32>
    %96 = arith.mulf %94, %94 : vector<8x16xf32>
    %97 = vector.broadcast %95 : vector<1x16xf32> to vector<8x16xf32>
    %98 = arith.mulf %97, %96 : vector<8x16xf32>
    %99 = arith.addf %90, %98 : vector<8x16xf32>
    %c0_61 = arith.constant 0 : index
    %c0_62 = arith.constant 0 : index
    %100 = vector.load %arg14[%c0_61, %c0_62] : memref<1x16xf32, #tpu.memory_space<vmem>>, vector<1x16xf32>
    %101 = vector.broadcast %100 : vector<1x16xf32> to vector<8x16xf32>
    %102 = arith.mulf %101, %99 : vector<8x16xf32>
    %103 = math.sin %102 : vector<8x16xf32>
    %c0_63 = arith.constant 0 : index
    %c0_64 = arith.constant 0 : index
    %104 = vector.load %arg15[%c0_63, %c0_64] : memref<1x16xf32, #tpu.memory_space<vmem>>, vector<1x16xf32>
    %105 = arith.mulf %103, %103 : vector<8x16xf32>
    %106 = vector.broadcast %104 : vector<1x16xf32> to vector<8x16xf32>
    %107 = arith.mulf %106, %105 : vector<8x16xf32>
    %108 = arith.addf %99, %107 : vector<8x16xf32>
    %cst_65 = arith.constant 0.000000e+00 : f32
    %109 = vector.broadcast %cst_65 : f32 to vector<1x16xf32>
    %c7_66 = arith.constant 7 : index
    %c0_67 = arith.constant 0 : index
    %110 = vector.load %arg41[%c7_66, %c0_67] : memref<48x128xf32, #tpu.memory_space<vmem>>, vector<1x16xf32>
    tpu.vector_store %arg41[%c7_66, %c0_67], %109 {strides = array<i32>} : memref<48x128xf32, #tpu.memory_space<vmem>>, vector<1x16xf32>,
    %c16 = arith.constant 16 : index
    %c0_68 = arith.constant 0 : index
    %111 = vector.load %arg41[%c16, %c0_68] : memref<48x128xf32, #tpu.memory_space<vmem>>, vector<1x16xf32>
    tpu.vector_store %arg41[%c16, %c0_68], %109 {strides = array<i32>} : memref<48x128xf32, #tpu.memory_space<vmem>>, vector<1x16xf32>,
    %c8_69 = arith.constant 8 : index
    %c0_70 = arith.constant 0 : index
    %112 = vector.load %arg41[%c8_69, %c0_70] : memref<48x128xf32, #tpu.memory_space<vmem>>, vector<8x16xf32>
    tpu.vector_store %arg41[%c8_69, %c0_70], %108 {strides = array<i32>} : memref<48x128xf32, #tpu.memory_space<vmem>>, vector<8x16xf32>,
    %c7_71 = arith.constant 7 : index
    %c0_72 = arith.constant 0 : index
    %113 = vector.load %arg41[%c7_71, %c0_72] : memref<48x128xf32, #tpu.memory_space<vmem>>, vector<8x16xf32>
    %c0_73 = arith.constant 0 : index
    %c0_74 = arith.constant 0 : index
    %114 = vector.load %arg16[%c0_73, %c0_74] : memref<3x16xf32, #tpu.memory_space<vmem>>, vector<1x16xf32>
    %115 = vector.broadcast %114 : vector<1x16xf32> to vector<8x16xf32>
    %116 = arith.mulf %113, %115 : vector<8x16xf32>
    %c0_75 = arith.constant 0 : index
    %c0_76 = arith.constant 0 : index
    %117 = vector.load %arg17[%c0_75, %c0_76] : memref<1x16xf32, #tpu.memory_space<vmem>>, vector<1x16xf32>
    %118 = vector.broadcast %117 : vector<1x16xf32> to vector<8x16xf32>
    %119 = arith.addf %116, %118 : vector<8x16xf32>
    %c8_77 = arith.constant 8 : index
    %c0_78 = arith.constant 0 : index
    %120 = vector.load %arg41[%c8_77, %c0_78] : memref<48x128xf32, #tpu.memory_space<vmem>>, vector<8x16xf32>
    %c1_79 = arith.constant 1 : index
    %c0_80 = arith.constant 0 : index
    %121 = vector.load %arg16[%c1_79, %c0_80] : memref<3x16xf32, #tpu.memory_space<vmem>>, vector<1x16xf32>
    %122 = vector.broadcast %121 : vector<1x16xf32> to vector<8x16xf32>
    %123 = arith.mulf %120, %122 : vector<8x16xf32>
    %124 = arith.addf %119, %123 : vector<8x16xf32>
    %c9_81 = arith.constant 9 : index
    %c0_82 = arith.constant 0 : index
    %125 = vector.load %arg41[%c9_81, %c0_82] : memref<48x128xf32, #tpu.memory_space<vmem>>, vector<8x16xf32>
    %c2_83 = arith.constant 2 : index
    %c0_84 = arith.constant 0 : index
    %126 = vector.load %arg16[%c2_83, %c0_84] : memref<3x16xf32, #tpu.memory_space<vmem>>, vector<1x16xf32>
    %127 = vector.broadcast %126 : vector<1x16xf32> to vector<8x16xf32>
    %128 = arith.mulf %125, %127 : vector<8x16xf32>
    %129 = arith.addf %124, %128 : vector<8x16xf32>
    %c0_85 = arith.constant 0 : index
    %c0_86 = arith.constant 0 : index
    %130 = vector.load %arg18[%c0_85, %c0_86] : memref<16x16xf32, #tpu.memory_space<vmem>>, vector<16x16xf32>
    %cst_87 = arith.constant dense<0.000000e+00> : vector<8x16xf32>
    %131 = tpu.matmul %129, %130, %cst_87 {dimension_numbers = #tpu.dot_dimension_numbers<[1], [0], [0], [1], [0, 0, 1, 1], [], []>} : vector<8x16xf32>, vector<16x16xf32>, vector<8x16xf32> -> vector<8x16xf32>
    %c0_88 = arith.constant 0 : index
    %c0_89 = arith.constant 0 : index
    %132 = vector.load %arg19[%c0_88, %c0_89] : memref<1x16xf32, #tpu.memory_space<vmem>>, vector<1x16xf32>
    %133 = vector.broadcast %132 : vector<1x16xf32> to vector<8x16xf32>
    %134 = arith.addf %131, %133 : vector<8x16xf32>
    %c0_90 = arith.constant 0 : index
    %c0_91 = arith.constant 0 : index
    %135 = vector.load %arg20[%c0_90, %c0_91] : memref<1x16xf32, #tpu.memory_space<vmem>>, vector<1x16xf32>
    %136 = vector.broadcast %135 : vector<1x16xf32> to vector<8x16xf32>
    %137 = arith.mulf %136, %134 : vector<8x16xf32>
    %138 = math.sin %137 : vector<8x16xf32>
    %c0_92 = arith.constant 0 : index
    %c0_93 = arith.constant 0 : index
    %139 = vector.load %arg21[%c0_92, %c0_93] : memref<1x16xf32, #tpu.memory_space<vmem>>, vector<1x16xf32>
    %140 = arith.mulf %138, %138 : vector<8x16xf32>
    %141 = vector.broadcast %139 : vector<1x16xf32> to vector<8x16xf32>
    %142 = arith.mulf %141, %140 : vector<8x16xf32>
    %143 = arith.addf %134, %142 : vector<8x16xf32>
    %cst_94 = arith.constant 0.000000e+00 : f32
    %144 = vector.broadcast %cst_94 : f32 to vector<1x16xf32>
    %c7_95 = arith.constant 7 : index
    %c0_96 = arith.constant 0 : index
    %145 = vector.load %arg41[%c7_95, %c0_96] : memref<48x128xf32, #tpu.memory_space<vmem>>, vector<1x16xf32>
    tpu.vector_store %arg41[%c7_95, %c0_96], %144 {strides = array<i32>} : memref<48x128xf32, #tpu.memory_space<vmem>>, vector<1x16xf32>,
    %c16_97 = arith.constant 16 : index
    %c0_98 = arith.constant 0 : index
    %146 = vector.load %arg41[%c16_97, %c0_98] : memref<48x128xf32, #tpu.memory_space<vmem>>, vector<1x16xf32>
    tpu.vector_store %arg41[%c16_97, %c0_98], %144 {strides = array<i32>} : memref<48x128xf32, #tpu.memory_space<vmem>>, vector<1x16xf32>,
    %c8_99 = arith.constant 8 : index
    %c0_100 = arith.constant 0 : index
    %147 = vector.load %arg41[%c8_99, %c0_100] : memref<48x128xf32, #tpu.memory_space<vmem>>, vector<8x16xf32>
    tpu.vector_store %arg41[%c8_99, %c0_100], %143 {strides = array<i32>} : memref<48x128xf32, #tpu.memory_space<vmem>>, vector<8x16xf32>,
    %c7_101 = arith.constant 7 : index
    %c0_102 = arith.constant 0 : index
    %148 = vector.load %arg41[%c7_101, %c0_102] : memref<48x128xf32, #tpu.memory_space<vmem>>, vector<8x16xf32>
    %c0_103 = arith.constant 0 : index
    %c0_104 = arith.constant 0 : index
    %149 = vector.load %arg22[%c0_103, %c0_104] : memref<3x16xf32, #tpu.memory_space<vmem>>, vector<1x16xf32>
    %150 = vector.broadcast %149 : vector<1x16xf32> to vector<8x16xf32>
    %151 = arith.mulf %148, %150 : vector<8x16xf32>
    %c0_105 = arith.constant 0 : index
    %c0_106 = arith.constant 0 : index
    %152 = vector.load %arg23[%c0_105, %c0_106] : memref<1x16xf32, #tpu.memory_space<vmem>>, vector<1x16xf32>
    %153 = vector.broadcast %152 : vector<1x16xf32> to vector<8x16xf32>
    %154 = arith.addf %151, %153 : vector<8x16xf32>
    %c8_107 = arith.constant 8 : index
    %c0_108 = arith.constant 0 : index
    %155 = vector.load %arg41[%c8_107, %c0_108] : memref<48x128xf32, #tpu.memory_space<vmem>>, vector<8x16xf32>
    %c1_109 = arith.constant 1 : index
    %c0_110 = arith.constant 0 : index
    %156 = vector.load %arg22[%c1_109, %c0_110] : memref<3x16xf32, #tpu.memory_space<vmem>>, vector<1x16xf32>
    %157 = vector.broadcast %156 : vector<1x16xf32> to vector<8x16xf32>
    %158 = arith.mulf %155, %157 : vector<8x16xf32>
    %159 = arith.addf %154, %158 : vector<8x16xf32>
    %c9_111 = arith.constant 9 : index
    %c0_112 = arith.constant 0 : index
    %160 = vector.load %arg41[%c9_111, %c0_112] : memref<48x128xf32, #tpu.memory_space<vmem>>, vector<8x16xf32>
    %c2_113 = arith.constant 2 : index
    %c0_114 = arith.constant 0 : index
    %161 = vector.load %arg22[%c2_113, %c0_114] : memref<3x16xf32, #tpu.memory_space<vmem>>, vector<1x16xf32>
    %162 = vector.broadcast %161 : vector<1x16xf32> to vector<8x16xf32>
    %163 = arith.mulf %160, %162 : vector<8x16xf32>
    %164 = arith.addf %159, %163 : vector<8x16xf32>
    %c0_115 = arith.constant 0 : index
    %c0_116 = arith.constant 0 : index
    %165 = vector.load %arg24[%c0_115, %c0_116] : memref<16x16xf32, #tpu.memory_space<vmem>>, vector<16x16xf32>
    %cst_117 = arith.constant dense<0.000000e+00> : vector<8x16xf32>
    %166 = tpu.matmul %164, %165, %cst_117 {dimension_numbers = #tpu.dot_dimension_numbers<[1], [0], [0], [1], [0, 0, 1, 1], [], []>} : vector<8x16xf32>, vector<16x16xf32>, vector<8x16xf32> -> vector<8x16xf32>
    %c0_118 = arith.constant 0 : index
    %c0_119 = arith.constant 0 : index
    %167 = vector.load %arg25[%c0_118, %c0_119] : memref<1x16xf32, #tpu.memory_space<vmem>>, vector<1x16xf32>
    %168 = vector.broadcast %167 : vector<1x16xf32> to vector<8x16xf32>
    %169 = arith.addf %166, %168 : vector<8x16xf32>
    %170 = arith.addf %99, %169 : vector<8x16xf32>
    %c0_120 = arith.constant 0 : index
    %c0_121 = arith.constant 0 : index
    %171 = vector.load %arg26[%c0_120, %c0_121] : memref<1x16xf32, #tpu.memory_space<vmem>>, vector<1x16xf32>
    %172 = vector.broadcast %171 : vector<1x16xf32> to vector<8x16xf32>
    %173 = arith.mulf %172, %170 : vector<8x16xf32>
    %174 = math.sin %173 : vector<8x16xf32>
    %c0_122 = arith.constant 0 : index
    %c0_123 = arith.constant 0 : index
    %175 = vector.load %arg27[%c0_122, %c0_123] : memref<1x16xf32, #tpu.memory_space<vmem>>, vector<1x16xf32>
    %176 = arith.mulf %174, %174 : vector<8x16xf32>
    %177 = vector.broadcast %175 : vector<1x16xf32> to vector<8x16xf32>
    %178 = arith.mulf %177, %176 : vector<8x16xf32>
    %179 = arith.addf %170, %178 : vector<8x16xf32>
    %cst_124 = arith.constant 0.000000e+00 : f32
    %180 = vector.broadcast %cst_124 : f32 to vector<1x16xf32>
    %c7_125 = arith.constant 7 : index
    %c0_126 = arith.constant 0 : index
    %181 = vector.load %arg41[%c7_125, %c0_126] : memref<48x128xf32, #tpu.memory_space<vmem>>, vector<1x16xf32>
    tpu.vector_store %arg41[%c7_125, %c0_126], %180 {strides = array<i32>} : memref<48x128xf32, #tpu.memory_space<vmem>>, vector<1x16xf32>,
    %c16_127 = arith.constant 16 : index
    %c0_128 = arith.constant 0 : index
    %182 = vector.load %arg41[%c16_127, %c0_128] : memref<48x128xf32, #tpu.memory_space<vmem>>, vector<1x16xf32>
    tpu.vector_store %arg41[%c16_127, %c0_128], %180 {strides = array<i32>} : memref<48x128xf32, #tpu.memory_space<vmem>>, vector<1x16xf32>,
    %c8_129 = arith.constant 8 : index
    %c0_130 = arith.constant 0 : index
    %183 = vector.load %arg41[%c8_129, %c0_130] : memref<48x128xf32, #tpu.memory_space<vmem>>, vector<8x16xf32>
    tpu.vector_store %arg41[%c8_129, %c0_130], %179 {strides = array<i32>} : memref<48x128xf32, #tpu.memory_space<vmem>>, vector<8x16xf32>,
    %c7_131 = arith.constant 7 : index
    %c0_132 = arith.constant 0 : index
    %184 = vector.load %arg41[%c7_131, %c0_132] : memref<48x128xf32, #tpu.memory_space<vmem>>, vector<8x16xf32>
    %c0_133 = arith.constant 0 : index
    %c0_134 = arith.constant 0 : index
    %185 = vector.load %arg28[%c0_133, %c0_134] : memref<3x16xf32, #tpu.memory_space<vmem>>, vector<1x16xf32>
    %186 = vector.broadcast %185 : vector<1x16xf32> to vector<8x16xf32>
    %187 = arith.mulf %184, %186 : vector<8x16xf32>
    %c0_135 = arith.constant 0 : index
    %c0_136 = arith.constant 0 : index
    %188 = vector.load %arg29[%c0_135, %c0_136] : memref<1x16xf32, #tpu.memory_space<vmem>>, vector<1x16xf32>
    %189 = vector.broadcast %188 : vector<1x16xf32> to vector<8x16xf32>
    %190 = arith.addf %187, %189 : vector<8x16xf32>
    %c8_137 = arith.constant 8 : index
    %c0_138 = arith.constant 0 : index
    %191 = vector.load %arg41[%c8_137, %c0_138] : memref<48x128xf32, #tpu.memory_space<vmem>>, vector<8x16xf32>
    %c1_139 = arith.constant 1 : index
    %c0_140 = arith.constant 0 : index
    %192 = vector.load %arg28[%c1_139, %c0_140] : memref<3x16xf32, #tpu.memory_space<vmem>>, vector<1x16xf32>
    %193 = vector.broadcast %192 : vector<1x16xf32> to vector<8x16xf32>
    %194 = arith.mulf %191, %193 : vector<8x16xf32>
    %195 = arith.addf %190, %194 : vector<8x16xf32>
    %c9_141 = arith.constant 9 : index
    %c0_142 = arith.constant 0 : index
    %196 = vector.load %arg41[%c9_141, %c0_142] : memref<48x128xf32, #tpu.memory_space<vmem>>, vector<8x16xf32>
    %c2_143 = arith.constant 2 : index
    %c0_144 = arith.constant 0 : index
    %197 = vector.load %arg28[%c2_143, %c0_144] : memref<3x16xf32, #tpu.memory_space<vmem>>, vector<1x16xf32>
    %198 = vector.broadcast %197 : vector<1x16xf32> to vector<8x16xf32>
    %199 = arith.mulf %196, %198 : vector<8x16xf32>
    %200 = arith.addf %195, %199 : vector<8x16xf32>
    %c0_145 = arith.constant 0 : index
    %c0_146 = arith.constant 0 : index
    %201 = vector.load %arg30[%c0_145, %c0_146] : memref<16x32xf32, #tpu.memory_space<vmem>>, vector<16x32xf32>
    %cst_147 = arith.constant dense<0.000000e+00> : vector<8x32xf32>
    %202 = tpu.matmul %200, %201, %cst_147 {dimension_numbers = #tpu.dot_dimension_numbers<[1], [0], [0], [1], [0, 0, 1, 1], [], []>} : vector<8x16xf32>, vector<16x32xf32>, vector<8x32xf32> -> vector<8x32xf32>
    %c0_148 = arith.constant 0 : index
    %c0_149 = arith.constant 0 : index
    %203 = vector.load %arg31[%c0_148, %c0_149] : memref<1x32xf32, #tpu.memory_space<vmem>>, vector<1x32xf32>
    %204 = vector.broadcast %203 : vector<1x32xf32> to vector<8x32xf32>
    %205 = arith.addf %202, %204 : vector<8x32xf32>
    %c0_150 = arith.constant 0 : index
    %c0_151 = arith.constant 0 : index
    %206 = vector.load %arg32[%c0_150, %c0_151] : memref<1x32xf32, #tpu.memory_space<vmem>>, vector<1x32xf32>
    %207 = vector.broadcast %206 : vector<1x32xf32> to vector<8x32xf32>
    %208 = arith.mulf %207, %205 : vector<8x32xf32>
    %209 = math.sin %208 : vector<8x32xf32>
    %c0_152 = arith.constant 0 : index
    %c0_153 = arith.constant 0 : index
    %210 = vector.load %arg33[%c0_152, %c0_153] : memref<1x32xf32, #tpu.memory_space<vmem>>, vector<1x32xf32>
    %211 = arith.mulf %209, %209 : vector<8x32xf32>
    %212 = vector.broadcast %210 : vector<1x32xf32> to vector<8x32xf32>
    %213 = arith.mulf %212, %211 : vector<8x32xf32>
    %214 = arith.addf %205, %213 : vector<8x32xf32>
    %cst_154 = arith.constant 0.000000e+00 : f32
    %215 = vector.broadcast %cst_154 : f32 to vector<1x32xf32>
    %c7_155 = arith.constant 7 : index
    %c0_156 = arith.constant 0 : index
    %216 = vector.load %arg41[%c7_155, %c0_156] : memref<48x128xf32, #tpu.memory_space<vmem>>, vector<1x32xf32>
    tpu.vector_store %arg41[%c7_155, %c0_156], %215 {strides = array<i32>} : memref<48x128xf32, #tpu.memory_space<vmem>>, vector<1x32xf32>,
    %c16_157 = arith.constant 16 : index
    %c0_158 = arith.constant 0 : index
    %217 = vector.load %arg41[%c16_157, %c0_158] : memref<48x128xf32, #tpu.memory_space<vmem>>, vector<1x32xf32>
    tpu.vector_store %arg41[%c16_157, %c0_158], %215 {strides = array<i32>} : memref<48x128xf32, #tpu.memory_space<vmem>>, vector<1x32xf32>,
    %c8_159 = arith.constant 8 : index
    %c0_160 = arith.constant 0 : index
    %218 = vector.load %arg41[%c8_159, %c0_160] : memref<48x128xf32, #tpu.memory_space<vmem>>, vector<8x32xf32>
    tpu.vector_store %arg41[%c8_159, %c0_160], %214 {strides = array<i32>} : memref<48x128xf32, #tpu.memory_space<vmem>>, vector<8x32xf32>,
    %c7_161 = arith.constant 7 : index
    %c0_162 = arith.constant 0 : index
    %219 = vector.load %arg41[%c7_161, %c0_162] : memref<48x128xf32, #tpu.memory_space<vmem>>, vector<8x32xf32>
    %c0_163 = arith.constant 0 : index
    %c0_164 = arith.constant 0 : index
    %220 = vector.load %arg34[%c0_163, %c0_164] : memref<3x32xf32, #tpu.memory_space<vmem>>, vector<1x32xf32>
    %221 = vector.broadcast %220 : vector<1x32xf32> to vector<8x32xf32>
    %222 = arith.mulf %219, %221 : vector<8x32xf32>
    %c0_165 = arith.constant 0 : index
    %c0_166 = arith.constant 0 : index
    %223 = vector.load %arg35[%c0_165, %c0_166] : memref<1x32xf32, #tpu.memory_space<vmem>>, vector<1x32xf32>
    %224 = vector.broadcast %223 : vector<1x32xf32> to vector<8x32xf32>
    %225 = arith.addf %222, %224 : vector<8x32xf32>
    %c8_167 = arith.constant 8 : index
    %c0_168 = arith.constant 0 : index
    %226 = vector.load %arg41[%c8_167, %c0_168] : memref<48x128xf32, #tpu.memory_space<vmem>>, vector<8x32xf32>
    %c1_169 = arith.constant 1 : index
    %c0_170 = arith.constant 0 : index
    %227 = vector.load %arg34[%c1_169, %c0_170] : memref<3x32xf32, #tpu.memory_space<vmem>>, vector<1x32xf32>
    %228 = vector.broadcast %227 : vector<1x32xf32> to vector<8x32xf32>
    %229 = arith.mulf %226, %228 : vector<8x32xf32>
    %230 = arith.addf %225, %229 : vector<8x32xf32>
    %c9_171 = arith.constant 9 : index
    %c0_172 = arith.constant 0 : index
    %231 = vector.load %arg41[%c9_171, %c0_172] : memref<48x128xf32, #tpu.memory_space<vmem>>, vector<8x32xf32>
    %c2_173 = arith.constant 2 : index
    %c0_174 = arith.constant 0 : index
    %232 = vector.load %arg34[%c2_173, %c0_174] : memref<3x32xf32, #tpu.memory_space<vmem>>, vector<1x32xf32>
    %233 = vector.broadcast %232 : vector<1x32xf32> to vector<8x32xf32>
    %234 = arith.mulf %231, %233 : vector<8x32xf32>
    %235 = arith.addf %230, %234 : vector<8x32xf32>
    %c0_175 = arith.constant 0 : index
    %c0_176 = arith.constant 0 : index
    %236 = vector.load %arg36[%c0_175, %c0_176] : memref<32x32xf32, #tpu.memory_space<vmem>>, vector<32x32xf32>
    %cst_177 = arith.constant dense<0.000000e+00> : vector<8x32xf32>
    %237 = tpu.matmul %235, %236, %cst_177 {dimension_numbers = #tpu.dot_dimension_numbers<[1], [0], [0], [1], [0, 0, 1, 1], [], []>} : vector<8x32xf32>, vector<32x32xf32>, vector<8x32xf32> -> vector<8x32xf32>
    %c0_178 = arith.constant 0 : index
    %c0_179 = arith.constant 0 : index
    %238 = vector.load %arg37[%c0_178, %c0_179] : memref<1x32xf32, #tpu.memory_space<vmem>>, vector<1x32xf32>
    %239 = vector.broadcast %238 : vector<1x32xf32> to vector<8x32xf32>
    %240 = arith.addf %237, %239 : vector<8x32xf32>
    %c0_180 = arith.constant 0 : index
    %c0_181 = arith.constant 0 : index
    %241 = vector.load %arg38[%c0_180, %c0_181] : memref<16x32xf32, #tpu.memory_space<vmem>>, vector<16x32xf32>
    %cst_182 = arith.constant dense<0.000000e+00> : vector<8x32xf32>
    %242 = tpu.matmul %170, %241, %cst_182 {dimension_numbers = #tpu.dot_dimension_numbers<[1], [0], [0], [1], [0, 0, 1, 1], [], []>} : vector<8x16xf32>, vector<16x32xf32>, vector<8x32xf32> -> vector<8x32xf32>
    %c0_183 = arith.constant 0 : index
    %c0_184 = arith.constant 0 : index
    %243 = vector.load %arg39[%c0_183, %c0_184] : memref<1x32xf32, #tpu.memory_space<vmem>>, vector<1x32xf32>
    %244 = vector.broadcast %243 : vector<1x32xf32> to vector<8x32xf32>
    %245 = arith.addf %242, %244 : vector<8x32xf32>
    %246 = arith.addf %245, %240 : vector<8x32xf32>
    %247 = arith.mulf %246, %246 : vector<8x32xf32>
    %cst_185 = arith.constant dense<0.000000e+00> : vector<8xf32>
    %248 = vector.multi_reduction <add>, %247, %cst_185 [1] : vector<8x32xf32> to vector<8xf32>
    %249 = vector.shape_cast %248 : vector<8xf32> to vector<8x1xf32>
    %cst_186 = arith.constant 1.000000e-24 : f32
    %250 = vector.broadcast %cst_186 : f32 to vector<8x1xf32>
    %251 = arith.maximumf %249, %250 : vector<8x1xf32>
    %252 = math.rsqrt %251 : vector<8x1xf32>
    %253 = vector.broadcast %252 : vector<8x1xf32> to vector<8x32xf32>
    %254 = arith.mulf %246, %253 : vector<8x32xf32>
    %c0_187 = arith.constant 0 : index
    %c0_188 = arith.constant 0 : index
    %c0_189 = arith.constant 0 : index
    %255 = vector.load %arg40[%c0_187, %c0_188, %c0_189] : memref<1x8x32xf32, #tpu.memory_space<vmem>>, vector<1x8x32xf32>
    %256 = vector.shape_cast %255 : vector<1x8x32xf32> to vector<8x32xf32>
    %257 = vector.shape_cast %254 : vector<8x32xf32> to vector<1x8x32xf32>
    tpu.vector_store %arg40[%c0_187, %c0_188, %c0_189], %257 {strides = array<i32>} : memref<1x8x32xf32, #tpu.memory_space<vmem>>, vector<1x8x32xf32>,
    return
  }
  func.func @transform_0(%arg0: i32) -> (i32, i32, i32) {
    %c0_i32 = arith.constant 0 : i32
    %c0_i32_0 = arith.constant 0 : i32
    %c0_i32_1 = arith.constant 0 : i32
    return %arg0, %c0_i32, %c0_i32_0 : i32, i32, i32
  }
  func.func @transform_1(%arg0: i32) -> (i32, i32) {
    %c0_i32 = arith.constant 0 : i32
    %c0_i32_0 = arith.constant 0 : i32
    %c0_i32_1 = arith.constant 0 : i32
    return %c0_i32, %c0_i32_0 : i32, i32
  }
  func.func @transform_2(%arg0: i32) -> (i32, i32) {
    %c0_i32 = arith.constant 0 : i32
    %c0_i32_0 = arith.constant 0 : i32
    %c0_i32_1 = arith.constant 0 : i32
    return %c0_i32, %c0_i32_0 : i32, i32
  }
  func.func @transform_3(%arg0: i32) -> (i32, i32) {
    %c0_i32 = arith.constant 0 : i32
    %c0_i32_0 = arith.constant 0 : i32
    %c0_i32_1 = arith.constant 0 : i32
    return %c0_i32, %c0_i32_0 : i32, i32
  }
  func.func @transform_4(%arg0: i32) -> (i32, i32) {
    %c0_i32 = arith.constant 0 : i32
    %c0_i32_0 = arith.constant 0 : i32
    %c0_i32_1 = arith.constant 0 : i32
    return %c0_i32, %c0_i32_0 : i32, i32
  }
  func.func @transform_5(%arg0: i32) -> (i32, i32) {
    %c0_i32 = arith.constant 0 : i32
    %c0_i32_0 = arith.constant 0 : i32
    %c0_i32_1 = arith.constant 0 : i32
    return %c0_i32, %c0_i32_0 : i32, i32
  }
  func.func @transform_6(%arg0: i32) -> (i32, i32) {
    %c0_i32 = arith.constant 0 : i32
    %c0_i32_0 = arith.constant 0 : i32
    %c0_i32_1 = arith.constant 0 : i32
    return %c0_i32, %c0_i32_0 : i32, i32
  }
  func.func @transform_7(%arg0: i32) -> (i32, i32) {
    %c0_i32 = arith.constant 0 : i32
    %c0_i32_0 = arith.constant 0 : i32
    %c0_i32_1 = arith.constant 0 : i32
    return %c0_i32, %c0_i32_0 : i32, i32
  }
  func.func @transform_8(%arg0: i32) -> (i32, i32) {
    %c0_i32 = arith.constant 0 : i32
    %c0_i32_0 = arith.constant 0 : i32
    %c0_i32_1 = arith.constant 0 : i32
    return %c0_i32, %c0_i32_0 : i32, i32
  }
  func.func @transform_9(%arg0: i32) -> (i32, i32) {
    %c0_i32 = arith.constant 0 : i32
    %c0_i32_0 = arith.constant 0 : i32
    %c0_i32_1 = arith.constant 0 : i32
    return %c0_i32, %c0_i32_0 : i32, i32
  }
  func.func @transform_10(%arg0: i32) -> (i32, i32) {
    %c0_i32 = arith.constant 0 : i32
    %c0_i32_0 = arith.constant 0 : i32
    %c0_i32_1 = arith.constant 0 : i32
    return %c0_i32, %c0_i32_0 : i32, i32
  }
  func.func @transform_11(%arg0: i32) -> (i32, i32) {
    %c0_i32 = arith.constant 0 : i32
    %c0_i32_0 = arith.constant 0 : i32
    %c0_i32_1 = arith.constant 0 : i32
    return %c0_i32, %c0_i32_0 : i32, i32
  }
  func.func @transform_12(%arg0: i32) -> (i32, i32) {
    %c0_i32 = arith.constant 0 : i32
    %c0_i32_0 = arith.constant 0 : i32
    %c0_i32_1 = arith.constant 0 : i32
    return %c0_i32, %c0_i32_0 : i32, i32
  }
  func.func @transform_13(%arg0: i32) -> (i32, i32) {
    %c0_i32 = arith.constant 0 : i32
    %c0_i32_0 = arith.constant 0 : i32
    %c0_i32_1 = arith.constant 0 : i32
    return %c0_i32, %c0_i32_0 : i32, i32
  }
  func.func @transform_14(%arg0: i32) -> (i32, i32) {
    %c0_i32 = arith.constant 0 : i32
    %c0_i32_0 = arith.constant 0 : i32
    %c0_i32_1 = arith.constant 0 : i32
    return %c0_i32, %c0_i32_0 : i32, i32
  }
  func.func @transform_15(%arg0: i32) -> (i32, i32) {
    %c0_i32 = arith.constant 0 : i32
    %c0_i32_0 = arith.constant 0 : i32
    %c0_i32_1 = arith.constant 0 : i32
    return %c0_i32, %c0_i32_0 : i32, i32
  }
  func.func @transform_16(%arg0: i32) -> (i32, i32) {
    %c0_i32 = arith.constant 0 : i32
    %c0_i32_0 = arith.constant 0 : i32
    %c0_i32_1 = arith.constant 0 : i32
    return %c0_i32, %c0_i32_0 : i32, i32
  }
  func.func @transform_17(%arg0: i32) -> (i32, i32) {
    %c0_i32 = arith.constant 0 : i32
    %c0_i32_0 = arith.constant 0 : i32
    %c0_i32_1 = arith.constant 0 : i32
    return %c0_i32, %c0_i32_0 : i32, i32
  }
  func.func @transform_18(%arg0: i32) -> (i32, i32) {
    %c0_i32 = arith.constant 0 : i32
    %c0_i32_0 = arith.constant 0 : i32
    %c0_i32_1 = arith.constant 0 : i32
    return %c0_i32, %c0_i32_0 : i32, i32
  }
  func.func @transform_19(%arg0: i32) -> (i32, i32) {
    %c0_i32 = arith.constant 0 : i32
    %c0_i32_0 = arith.constant 0 : i32
    %c0_i32_1 = arith.constant 0 : i32
    return %c0_i32, %c0_i32_0 : i32, i32
  }
  func.func @transform_20(%arg0: i32) -> (i32, i32) {
    %c0_i32 = arith.constant 0 : i32
    %c0_i32_0 = arith.constant 0 : i32
    %c0_i32_1 = arith.constant 0 : i32
    return %c0_i32, %c0_i32_0 : i32, i32
  }
  func.func @transform_21(%arg0: i32) -> (i32, i32) {
    %c0_i32 = arith.constant 0 : i32
    %c0_i32_0 = arith.constant 0 : i32
    %c0_i32_1 = arith.constant 0 : i32
    return %c0_i32, %c0_i32_0 : i32, i32
  }
  func.func @transform_22(%arg0: i32) -> (i32, i32) {
    %c0_i32 = arith.constant 0 : i32
    %c0_i32_0 = arith.constant 0 : i32
    %c0_i32_1 = arith.constant 0 : i32
    return %c0_i32, %c0_i32_0 : i32, i32
  }
  func.func @transform_23(%arg0: i32) -> (i32, i32) {
    %c0_i32 = arith.constant 0 : i32
    %c0_i32_0 = arith.constant 0 : i32
    %c0_i32_1 = arith.constant 0 : i32
    return %c0_i32, %c0_i32_0 : i32, i32
  }
  func.func @transform_24(%arg0: i32) -> (i32, i32) {
    %c0_i32 = arith.constant 0 : i32
    %c0_i32_0 = arith.constant 0 : i32
    %c0_i32_1 = arith.constant 0 : i32
    return %c0_i32, %c0_i32_0 : i32, i32
  }
  func.func @transform_25(%arg0: i32) -> (i32, i32) {
    %c0_i32 = arith.constant 0 : i32
    %c0_i32_0 = arith.constant 0 : i32
    %c0_i32_1 = arith.constant 0 : i32
    return %c0_i32, %c0_i32_0 : i32, i32
  }
  func.func @transform_26(%arg0: i32) -> (i32, i32) {
    %c0_i32 = arith.constant 0 : i32
    %c0_i32_0 = arith.constant 0 : i32
    %c0_i32_1 = arith.constant 0 : i32
    return %c0_i32, %c0_i32_0 : i32, i32
  }
  func.func @transform_27(%arg0: i32) -> (i32, i32) {
    %c0_i32 = arith.constant 0 : i32
    %c0_i32_0 = arith.constant 0 : i32
    %c0_i32_1 = arith.constant 0 : i32
    return %c0_i32, %c0_i32_0 : i32, i32
  }
  func.func @transform_28(%arg0: i32) -> (i32, i32) {
    %c0_i32 = arith.constant 0 : i32
    %c0_i32_0 = arith.constant 0 : i32
    %c0_i32_1 = arith.constant 0 : i32
    return %c0_i32, %c0_i32_0 : i32, i32
  }
  func.func @transform_29(%arg0: i32) -> (i32, i32) {
    %c0_i32 = arith.constant 0 : i32
    %c0_i32_0 = arith.constant 0 : i32
    %c0_i32_1 = arith.constant 0 : i32
    return %c0_i32, %c0_i32_0 : i32, i32
  }
  func.func @transform_30(%arg0: i32) -> (i32, i32) {
    %c0_i32 = arith.constant 0 : i32
    %c0_i32_0 = arith.constant 0 : i32
    %c0_i32_1 = arith.constant 0 : i32
    return %c0_i32, %c0_i32_0 : i32, i32
  }
  func.func @transform_31(%arg0: i32) -> (i32, i32) {
    %c0_i32 = arith.constant 0 : i32
    %c0_i32_0 = arith.constant 0 : i32
    %c0_i32_1 = arith.constant 0 : i32
    return %c0_i32, %c0_i32_0 : i32, i32
  }
  func.func @transform_32(%arg0: i32) -> (i32, i32) {
    %c0_i32 = arith.constant 0 : i32
    %c0_i32_0 = arith.constant 0 : i32
    %c0_i32_1 = arith.constant 0 : i32
    return %c0_i32, %c0_i32_0 : i32, i32
  }
  func.func @transform_33(%arg0: i32) -> (i32, i32) {
    %c0_i32 = arith.constant 0 : i32
    %c0_i32_0 = arith.constant 0 : i32
    %c0_i32_1 = arith.constant 0 : i32
    return %c0_i32, %c0_i32_0 : i32, i32
  }
  func.func @transform_34(%arg0: i32) -> (i32, i32) {
    %c0_i32 = arith.constant 0 : i32
    %c0_i32_0 = arith.constant 0 : i32
    %c0_i32_1 = arith.constant 0 : i32
    return %c0_i32, %c0_i32_0 : i32, i32
  }
  func.func @transform_35(%arg0: i32) -> (i32, i32) {
    %c0_i32 = arith.constant 0 : i32
    %c0_i32_0 = arith.constant 0 : i32
    %c0_i32_1 = arith.constant 0 : i32
    return %c0_i32, %c0_i32_0 : i32, i32
  }
  func.func @transform_36(%arg0: i32) -> (i32, i32) {
    %c0_i32 = arith.constant 0 : i32
    %c0_i32_0 = arith.constant 0 : i32
    %c0_i32_1 = arith.constant 0 : i32
    return %c0_i32, %c0_i32_0 : i32, i32
  }
  func.func @transform_37(%arg0: i32) -> (i32, i32) {
    %c0_i32 = arith.constant 0 : i32
    %c0_i32_0 = arith.constant 0 : i32
    %c0_i32_1 = arith.constant 0 : i32
    return %c0_i32, %c0_i32_0 : i32, i32
  }
  func.func @transform_38(%arg0: i32) -> (i32, i32) {
    %c0_i32 = arith.constant 0 : i32
    %c0_i32_0 = arith.constant 0 : i32
    %c0_i32_1 = arith.constant 0 : i32
    return %c0_i32, %c0_i32_0 : i32, i32
  }
  func.func @transform_39(%arg0: i32) -> (i32, i32, i32) {
    %c0_i32 = arith.constant 0 : i32
    %c0_i32_0 = arith.constant 0 : i32
    %c0_i32_1 = arith.constant 0 : i32
    return %arg0, %c0_i32, %c0_i32_0 : i32, i32, i32
  }
}

</mosaic_0001>

<bundles_post_ra>
// kernel: tpu_custom_call.1
= control target key start
LH: loop header
LB: loop body
LE: loop exit
PB: predicated region body
PF: predicated region fallthrough
CT: control target
= control target key end

     0   :  { %s4082_s6 = smov 1   ;;  %s4083_s10 = smov 2   ;;  %s4957_s0 = inlined_call_operand.smem [shape: u32[40], index: -1, kind: input, shape index: {}] }
   0x1   :  { %s4147_s5 = sld [smem:[%s4957_s0]]   ;;  %s4084_s14 = smov 3  }
   0x2   :  { %s4152_s9 = sld [smem:[%s4957_s0 + %s4082_s6]]   ;;  %s4085_s18 = smov 4  }
   0x3   :  { %s4157_s13 = sld [smem:[%s4957_s0 + %s4083_s10]]   ;;  %s4086_s22 = smov 5  }
   0x4   :  { %s4162_s17 = sld [smem:[%s4957_s0 + %s4084_s14]]   ;;  %s4087_s26 = smov 6  }
   0x5   :  { %s4167_s21 = sld [smem:[%s4957_s0 + %s4085_s18]]   ;;  %s4088_s30 = smov 7  }
   0x6   :  { %s4172_s25 = sld [smem:[%s4957_s0 + %s4086_s22]]   ;;  %s4089_s4 = smov 8  }
   0x7   :  { %4979 = sst [smem:[#allocation21_spill]] %s4147_s5  ;;  %s4090_s10 = smov 9  }
   0x8   :  { %s4177_s29 = sld [smem:[%s4957_s0 + %s4087_s26]]   ;;  %s4091_s15 = smov 10  }
   0x9   :  { %s4182_s3 = sld [smem:[%s4957_s0 + %s4088_s30]]   ;;  %s4092_s20 = smov 11  }
   0xa   :  { %4980 = sst [smem:[#allocation22_spill]] %s4162_s17  ;;  %s4093_s26 = smov 12  }
   0xb   :  { %s4187_s8 = sld [smem:[%s4957_s0 + %s4089_s4]]   ;;  %s4094_s1 = smov 13  }
   0xc   :  { %4981 = sst [smem:[#allocation23_spill]] %s4172_s25  ;;  %s4095_s7 = smov 14  }
   0xd   :  { %s4192_s14 = sld [smem:[%s4957_s0 + %s4090_s10]]   ;;  %s4097_s22 = smov 16  }
   0xe   :  { %s4197_s19 = sld [smem:[%s4957_s0 + %s4091_s15]]   ;;  %s4096_s15 = smov 15  }
   0xf   :  { %4982 = sst [smem:[#allocation24_spill]] %s4182_s3  ;;  %s4098_s28 = smov 17  }
  0x10   :  { %s4202_s24 = sld [smem:[%s4957_s0 + %s4092_s20]]  }
  0x11   :  { %s4207_s30 = sld [smem:[%s4957_s0 + %s4093_s26]]  }
  0x12   :  { %s4212_s6 = sld [smem:[%s4957_s0 + %s4094_s1]]  }
  0x13   :  { %s4217_s12 = sld [smem:[%s4957_s0 + %s4095_s7]]   ;;  %s4099_s7 = smov 18  }
  0x14   :  { %s4222_s20 = sld [smem:[%s4957_s0 + %s4096_s15]]   ;;  %s4100_s15 = smov 19  }
  0x15   :  { %s4227_s27 = sld [smem:[%s4957_s0 + %s4097_s22]]   ;;  %s4101_s22 = smov 20  }
  0x16   :  { %s4232_s4 = sld [smem:[%s4957_s0 + %s4098_s28]]   ;;  %s4102_s28 = smov 21  }
  0x18   :  { %4983 = sst [smem:[#allocation25_spill]] %s4212_s6 }
  0x19   :  { %4984 = sst [smem:[#allocation26_spill]] %s4217_s12 }
  0x1a   :  { %4985 = sst [smem:[#allocation27_spill]] %s4222_s20 }
  0x1b   :  { %4986 = sst [smem:[#allocation28_spill]] %s4227_s27 }
  0x1c   :  { %4987 = sst [smem:[#allocation29_spill]] %s4232_s4 }
  0x1d   :  { %s4237_s12 = sld [smem:[%s4957_s0 + %s4099_s7]]   ;;  %s4103_s7 = smov 22  }
  0x1e   :  { %s4242_s20 = sld [smem:[%s4957_s0 + %s4100_s15]]   ;;  %s4104_s15 = smov 23  }
  0x1f   :  { %s4247_s27 = sld [smem:[%s4957_s0 + %s4101_s22]]   ;;  %s4105_s22 = smov 24  }
  0x20   :  { %s4252_s6 = sld [smem:[%s4957_s0 + %s4102_s28]]   ;;  %s4106_s28 = smov 25  }
  0x23   :  { %4988 = sst [smem:[#allocation30_spill]] %s4237_s12 }
  0x24   :  { %4989 = sst [smem:[#allocation31_spill]] %s4242_s20 }
  0x25   :  { %4990 = sst [smem:[#allocation32_spill]] %s4247_s27 }
  0x26   :  { %4991 = sst [smem:[#allocation33_spill]] %s4252_s6 }
  0x27   :  { %s4257_s12 = sld [smem:[%s4957_s0 + %s4103_s7]]   ;;  %s4107_s7 = smov 26  }
  0x28   :  { %s4262_s20 = sld [smem:[%s4957_s0 + %s4104_s15]]   ;;  %s4108_s15 = smov 27  }
  0x29   :  { %s4267_s27 = sld [smem:[%s4957_s0 + %s4105_s22]]   ;;  %s4109_s22 = smov 28  }
  0x2a   :  { %s4272_s6 = sld [smem:[%s4957_s0 + %s4106_s28]]   ;;  %s4110_s28 = smov 29  }
  0x2d   :  { %4992 = sst [smem:[#allocation34_spill]] %s4257_s12 }
  0x2e   :  { %4993 = sst [smem:[#allocation35_spill]] %s4262_s20 }
  0x2f   :  { %4994 = sst [smem:[#allocation36_spill]] %s4267_s27 }
  0x30   :  { %4995 = sst [smem:[#allocation37_spill]] %s4272_s6 }
  0x31   :  { %s4277_s12 = sld [smem:[%s4957_s0 + %s4107_s7]]   ;;  %s4111_s7 = smov 30  }
  0x32   :  { %s4282_s20 = sld [smem:[%s4957_s0 + %s4108_s15]]   ;;  %s4112_s15 = smov 31  }
  0x33   :  { %s4287_s27 = sld [smem:[%s4957_s0 + %s4109_s22]]   ;;  %s4113_s22 = smov 32  }
  0x34   :  { %s4292_s6 = sld [smem:[%s4957_s0 + %s4110_s28]]   ;;  %s4114_s28 = smov 33  }
  0x37   :  { %4996 = sst [smem:[#allocation38_spill]] %s4277_s12 }
  0x38   :  { %4997 = sst [smem:[#allocation39_spill]] %s4282_s20 }
  0x39   :  { %4998 = sst [smem:[#allocation40_spill]] %s4287_s27 }
  0x3a   :  { %4999 = sst [smem:[#allocation41_spill]] %s4292_s6 }
  0x3b   :  { %s4297_s12 = sld [smem:[%s4957_s0 + %s4111_s7]]   ;;  %s4115_s7 = smov 34  }
  0x3c   :  { %s4302_s20 = sld [smem:[%s4957_s0 + %s4112_s15]]   ;;  %s4116_s15 = smov 35  }
  0x3d   :  { %s4307_s27 = sld [smem:[%s4957_s0 + %s4113_s22]]   ;;  %s4117_s22 = smov 36  }
  0x3e   :  { %s4312_s6 = sld [smem:[%s4957_s0 + %s4114_s28]]   ;;  %s4118_s28 = smov 37  }
  0x41   :  { %5000 = sst [smem:[#allocation42_spill]] %s4297_s12 }
  0x42   :  { %5001 = sst [smem:[#allocation43_spill]] %s4302_s20 }
  0x43   :  { %5002 = sst [smem:[#allocation44_spill]] %s4307_s27 }
  0x44   :  { %5003 = sst [smem:[#allocation45_spill]] %s4312_s6 }
  0x45   :  { %s4317_s12 = sld [smem:[%s4957_s0 + %s4115_s7]]   ;;  %s4119_s7 = smov 38  }
  0x46   :  { %s4322_s20 = sld [smem:[%s4957_s0 + %s4116_s15]]   ;;  %s4120_s15 = smov 39  }
  0x47   :  { %s4327_s27 = sld [smem:[%s4957_s0 + %s4117_s22]]  }
  0x48   :  { %s4332_s6 = sld [smem:[%s4957_s0 + %s4118_s28]]  }
  0x4b   :  { %5004 = sst [smem:[#allocation46_spill]] %s4317_s12 }
  0x4c   :  { %5005 = sst [smem:[#allocation47_spill]] %s4322_s20 }
  0x4d   :  { %s4337_s12 = sld [smem:[%s4957_s0 + %s4119_s7]]  }
  0x4e   :  { %5006 = sst [smem:[#allocation48_spill]] %s4332_s6 }
  0x4f   :  { %s4342_s20 = sld [smem:[%s4957_s0 + %s4120_s15]]  }
  0x50   :  { %84 = vsyncpa [#allocation4], 0 }
  0x51   :  { %85 = vsyncpa [#allocation7], 0 }
  0x52   :  { %86 = vsyncpa [#allocation10], 0 }
  0x53   :  { %87 = vsyncpa [#allocation13], 0 }
  0x54   :  { %88 = vsyncpa [#allocation5], 0 }
  0x55   :  { %90 = vsyncpa [#allocation5 + $0x1], 0  ;;  %s4344_s22 = smov 0   ;;  %s4346_s23 = smov 0  }
  0x56   :  { %s4348_s26 = smov 0   ;;  %s4350_s28 = smov 0  }
  0x57 LB: > { %s5007_s6 = sld [smem:[#allocation48_spill]]  ;;  %s5008_s4 = sld [smem:[#allocation29_spill]]  ;;  %s4068_s22 = sphi %s4344_s22, %s5063_s22   ;;  %s4080_s28 = sphi %s4350_s28, %s5060_s28   ;;  %s4076_s26 = sphi %s4348_s26, %s5062_s26   ;;  %s4072_s23 = sphi %s4346_s23, %s5064_s23  }
  0x58   : > { %s5009_s3 = sld [smem:[#allocation24_spill]]  ;;  %s5010_s25 = sld [smem:[#allocation23_spill]] }
  0x59   : > { %s5011_s17 = sld [smem:[#allocation22_spill]]  ;;  %5012 = sst [smem:[#allocation49_spill]] %s4068_s22 }
  0x5a   : > { %5013 = sst [smem:[#allocation50_spill]] %s4076_s26  ;;  %s4365_s0 = sadd.s32 4294967295, %s4080_s28  }
  0x5b   : > { %s3344_s1 = sadd.s32 4294967294, %s4080_s28   ;;  %s4369_s2 = sadd.s32 1, %s4080_s28  }
  0x5c   : > { %5014 = sst [smem:[#allocation51_spill]] %s4369_s2  ;;  %s927_s7 = sadd.s32 1, %s4076_s26 }
  0x5d   : > { %s924_s10 = ssub.s32 %s4080_s28, %s4369_s2  ;;  %p937_p0 = scmp.ne.s32.totalorder %s4076_s26, %s4072_s23 }
  0x5e   : > { %p925_p1 = scmp.eq.s32.totalorder %s924_s10, 0  ;;  %p938_p2 = scmp.eq.s32.totalorder %s4365_s0, 1 }
  0x5f   : > { %p943_p3 = scmp.ne.s32.totalorder %s4072_s23, %s4068_s22  ;;  %p944_p4 = scmp.eq.s32.totalorder %s3344_s1, 1 }
  0x60   : > { %s4380_s11 = scalar_select %p925_p1, %s4076_s26, %s927_s7  }
  0x61   : > { %p4382_p5 = por %p938_p2, %p937_p0  ;;  %p4386_p6 = por %p944_p4, %p943_p3 }
  0x62   : > { %5015 = sst [smem:[#allocation52_spill]] %s4380_s11  ;;  %p3345_p7 = scmp.ge.s32.totalorder %s4080_s28, 1 }
  0x63   : > { %s5016_s15 = scalar_select %p4382_p5, 1, 0 }
  0x64   : > { %s5017_s16 = scalar_select %p4386_p6, 1, 0 }
  0x65   : > { %p951_p8 = scmp.lt.s32.totalorder %s4080_s28, 3  ;;  %p4970_p9 = scmp.eq.s32.totalorder %s4365_s0, 0 }
  0x66   : > { %5018 = sst [smem:[#allocation53_spill]] %s5017_s16  ;;  %s4121_s1 = smov [#allocation6]  }
  0x67   : > { %p4393_p10 = pnand %p3345_p7, %p951_p8  ;;  %s978_s7 = sshll.u32 %s4121_s1, 4  ;;  %s979_s7 = int_to_ptr.vmem [resolvable:$true] %s978_s7 }
  0x68   : > { %s4122_s10 = smov [#allocation9]   ;;  %s4123_s2 = smov [#allocation12]  }
  0x69   : > { %s5019_s18 = scalar_select %p4393_p10, 1, 0 }
  0x6a   : > { %p3647_p11 = pneg %p4393_p10  ;;  %s1000_s11 = sshll.u32 %s4122_s10, 4  ;;  %s4405_s11 = int_to_ptr.vmem [resolvable:$true] %s1000_s11 }
  0x6b   : > { %s1025_s16 = sshll.u32 %s4123_s2, 4  ;;  %s3806_s22 = scalar_lea.hbm %s5011_s17, 64  ;;  %s4407_s16 = int_to_ptr.vmem [resolvable:$true] %s1025_s16 }
  0x6c   : > { %p4401_p12 = pnand %p4970_p9, %p3647_p11  ;;  %p3807_p13 = scmp.ne.s32.totalorder %s5011_s17, %s3806_s22 }
  0x6d   : > { %p3813_p3 = scmp.lt.u32.totalorder %s3806_s22, %s5011_s17 }
  0x6e   : > { %p4413_p0 = pneg %p4401_p12 }
  0x70   : > { %p3809_p1 = pnand %p4413_p0, %p3807_p13 }
  0x72   : > { %p3810_p2 = pneg %p3809_p1 }
  0x74   : > { %p3815_p4 = pnand %p3813_p3, %p3810_p2 }
  0x76   : > { %3818 = shalt.err (!%p3815_p4)
}
  0x77   : > { %s3819_s10 = scalar_lea.vmem %s979_s7, 64  ;;  %p3827_p9 = scmp.lt.s32.totalorder %s979_s7, %s979_s7 }
  0x78   : > { %p3820_p7 = scmp.ne.s32.totalorder %s979_s7, %s3819_s10  ;;  %p3828_p6 = scmp.lt.s32.totalorder %s3819_s10, %s3819_s10 }
  0x7a   : > { %p3822_p8 = pnand %p3820_p7, %p4413_p0  ;;  %p3829_p5 = por %p3828_p6, %p3827_p9 }
  0x7c   : > { %p3823_p11 = pneg %p3822_p8 }
  0x7e   : > { %p3830_p10 = pnand %p3829_p5, %p3823_p11 }
  0x80   : > { %3833 = shalt.err (!%p3830_p10)
}
  0x81   : > { %3653 = dma.hbm_to_vmem [thread:$0]  (!%p4401_p12), %s5011_s17, 64, %s979_s7, [#allocation7]  }
  0x82   : > { %s3834_s22 = scalar_lea.hbm %s5010_s25, 16 }
  0x83   : > { %p3835_p13 = scmp.ne.s32.totalorder %s5010_s25, %s3834_s22  ;;  %p3841_p3 = scmp.lt.u32.totalorder %s3834_s22, %s5010_s25 }
  0x85   : > { %p3837_p1 = pnand %p3835_p13, %p4413_p0 }
  0x87   : > { %p3838_p2 = pneg %p3837_p1 }
  0x89   : > { %p3843_p4 = pnand %p3841_p3, %p3838_p2 }
  0x8b   : > { %3846 = shalt.err (!%p3843_p4)
}
  0x8c   : > { %s3847_s2 = scalar_lea.vmem %s4405_s11, 16  ;;  %s3854_s10 = scalar_lea.vmem %s4405_s11, 32 }
  0x8d   : > { %p3848_p5 = scmp.ne.s32.totalorder %s4405_s11, %s3847_s2  ;;  %p3855_p10 = scmp.lt.s32.totalorder %s4405_s11, %s4405_s11 }
  0x8e   : > { %p3856_p7 = scmp.lt.s32.totalorder %s3854_s10, %s3847_s2 }
  0x8f   : > { %p3850_p6 = pnand %p3848_p5, %p4413_p0 }
  0x90   : > { %p3857_p8 = por %p3856_p7, %p3855_p10 }
  0x91   : > { %p3851_p9 = pneg %p3850_p6 }
  0x93   : > { %p3858_p11 = pnand %p3857_p8, %p3851_p9 }
  0x95   : > { %3861 = shalt.err (!%p3858_p11)
}
  0x96   : > { %3659 = dma.hbm_to_vmem [thread:$0]  (!%p4401_p12), %s5010_s25, 16, %s4405_s11, [#allocation10]  }
  0x97   : > { %s3862_s7 = scalar_lea.hbm %s4187_s8, 16 }
  0x98   : > { %p3863_p13 = scmp.ne.s32.totalorder %s4187_s8, %s3862_s7  ;;  %p3869_p3 = scmp.lt.u32.totalorder %s3862_s7, %s4187_s8 }
  0x9a   : > { %p3865_p1 = pnand %p3863_p13, %p4413_p0 }
  0x9c   : > { %p3866_p2 = pneg %p3865_p1 }
  0x9e   : > { %p3871_p4 = pnand %p3869_p3, %p3866_p2 }
  0xa0   : > { %3874 = shalt.err (!%p3871_p4)
}
  0xa1   : > { %s3875_s22 = scalar_lea.vmem %s4407_s16, 16  ;;  %s3882_s2 = scalar_lea.vmem %s4407_s16, 32 }
  0xa2   : > { %p3876_p5 = scmp.ne.s32.totalorder %s4407_s16, %s3875_s22  ;;  %p3883_p10 = scmp.lt.s32.totalorder %s4407_s16, %s4407_s16 }
  0xa3   : > { %p3884_p7 = scmp.lt.s32.totalorder %s3882_s2, %s3875_s22 }
  0xa4   : > { %p3878_p6 = pnand %p3876_p5, %p4413_p0 }
  0xa5   : > { %p3885_p8 = por %p3884_p7, %p3883_p10 }
  0xa6   : > { %p3879_p9 = pneg %p3878_p6 }
  0xa8   : > { %p3886_p11 = pnand %p3885_p8, %p3879_p9 }
  0xaa   : > { %3889 = shalt.err (!%p3886_p11)
}
  0xab   : > { %3665 = dma.hbm_to_vmem [thread:$0]  (!%p4401_p12), %s4187_s8, 16, %s4407_s16, [#allocation13]  }
  0xac   : > { %s4124_s11 = smov [#allocation3]   ;;  %s4125_s7 = smov [#allocation8]  }
  0xad   : > { %s964_s10 = sshll.u32 %s4124_s11, 4  ;;  %s989_s17 = sshll.u32 %s4125_s7, 4  ;;  %s965_s10 = int_to_ptr.vmem [resolvable:$true] %s964_s10  ;;  %s990_s17 = int_to_ptr.vmem [resolvable:$true] %s989_s17 }
  0xae   : > { %s3890_s25 = scalar_lea.hbm %s4152_s9, 64 }
  0xaf   : > { %p3891_p13 = scmp.ne.s32.totalorder %s4152_s9, %s3890_s25  ;;  %p3897_p3 = scmp.lt.u32.totalorder %s3890_s25, %s4152_s9 }
  0xb1   : > { %p3893_p1 = pnand %p3891_p13, %p4413_p0 }
  0xb3   : > { %p3894_p2 = pneg %p3893_p1 }
  0xb5   : > { %p3899_p4 = pnand %p3897_p3, %p3894_p2 }
  0xb7   : > { %3902 = shalt.err (!%p3899_p4)
}
  0xb8   : > { %s3903_s22 = scalar_lea.vmem %s965_s10, 64  ;;  %p3911_p10 = scmp.lt.s32.totalorder %s965_s10, %s965_s10 }
  0xb9   : > { %p3904_p5 = scmp.ne.s32.totalorder %s965_s10, %s3903_s22  ;;  %p3912_p7 = scmp.lt.s32.totalorder %s3903_s22, %s3903_s22 }
  0xbb   : > { %p3906_p6 = pnand %p3904_p5, %p4413_p0  ;;  %p3913_p8 = por %p3912_p7, %p3911_p10 }
  0xbd   : > { %p3907_p9 = pneg %p3906_p6 }
  0xbf   : > { %p3914_p11 = pnand %p3913_p8, %p3907_p9 }
  0xc1   : > { %3917 = shalt.err (!%p3914_p11)
}
  0xc2   : > { %3650 = dma.hbm_to_vmem [thread:$0]  (!%p4401_p12), %s4152_s9, 64, %s965_s10, [#allocation4]  }
  0xc3   : > { %s3918_s25 = scalar_lea.hbm %s4167_s21, 16 }
  0xc4   : > { %p3919_p13 = scmp.ne.s32.totalorder %s4167_s21, %s3918_s25  ;;  %p3925_p3 = scmp.lt.u32.totalorder %s3918_s25, %s4167_s21 }
  0xc6   : > { %p3921_p1 = pnand %p3919_p13, %p4413_p0 }
  0xc8   : > { %p3922_p2 = pneg %p3921_p1 }
  0xca   : > { %p3927_p4 = pnand %p3925_p3, %p3922_p2 }
  0xcc   : > { %3930 = shalt.err (!%p3927_p4)
}
  0xcd   : > { %s3931_s16 = scalar_lea.vmem %s990_s17, 16  ;;  %s3938_s2 = scalar_lea.vmem %s990_s17, 32 }
  0xce   : > { %p3932_p5 = scmp.ne.s32.totalorder %s990_s17, %s3931_s16  ;;  %p3939_p10 = scmp.lt.s32.totalorder %s990_s17, %s990_s17 }
  0xcf   : > { %p3940_p7 = scmp.lt.s32.totalorder %s3938_s2, %s3931_s16 }
  0xd0   : > { %p3934_p6 = pnand %p3932_p5, %p4413_p0 }
  0xd1   : > { %p3941_p8 = por %p3940_p7, %p3939_p10 }
  0xd2   : > { %p3935_p9 = pneg %p3934_p6 }
  0xd4   : > { %p3942_p11 = pnand %p3941_p8, %p3935_p9 }
  0xd6   : > { %3945 = shalt.err (!%p3942_p11)
}
  0xd7   : > { %3656 = dma.hbm_to_vmem [thread:$0]  (!%p4401_p12), %s4167_s21, 16, %s990_s17, [#allocation7]  }
  0xd8   : > { %s4126_s11 = smov [#allocation11]   ;;  %s4127_s7 = smov [#allocation14]  }
  0xd9   : > { %s1011_s10 = sshll.u32 %s4126_s11, 4  ;;  %s1039_s22 = sshll.u32 %s4127_s7, 4  ;;  %s1012_s10 = int_to_ptr.vmem [resolvable:$true] %s1011_s10  ;;  %s1040_s22 = int_to_ptr.vmem [resolvable:$true] %s1039_s22 }
  0xda   : > { %s3946_s25 = scalar_lea.hbm %s4177_s29, 16 }
  0xdb   : > { %p3947_p13 = scmp.ne.s32.totalorder %s4177_s29, %s3946_s25  ;;  %p3953_p3 = scmp.lt.u32.totalorder %s3946_s25, %s4177_s29 }
  0xdd   : > { %p3949_p1 = pnand %p3947_p13, %p4413_p0 }
  0xdf   : > { %p3950_p2 = pneg %p3949_p1 }
  0xe1   : > { %p3955_p4 = pnand %p3953_p3, %p3950_p2 }
  0xe3   : > { %3958 = shalt.err (!%p3955_p4)
}
  0xe4   : > { %s3959_s16 = scalar_lea.vmem %s1012_s10, 16  ;;  %s3966_s17 = scalar_lea.vmem %s1012_s10, 32 }
  0xe5   : > { %p3960_p5 = scmp.ne.s32.totalorder %s1012_s10, %s3959_s16  ;;  %p3967_p10 = scmp.lt.s32.totalorder %s1012_s10, %s1012_s10 }
  0xe6   : > { %p3968_p7 = scmp.lt.s32.totalorder %s3966_s17, %s3959_s16 }
  0xe7   : > { %p3962_p6 = pnand %p3960_p5, %p4413_p0 }
  0xe8   : > { %p3969_p8 = por %p3968_p7, %p3967_p10 }
  0xe9   : > { %p3963_p9 = pneg %p3962_p6 }
  0xeb   : > { %p3970_p11 = pnand %p3969_p8, %p3963_p9 }
  0xed   : > { %3973 = shalt.err (!%p3970_p11)
}
  0xee   : > { %3662 = dma.hbm_to_vmem [thread:$0]  (!%p4401_p12), %s4177_s29, 16, %s1012_s10, [#allocation10]  }
  0xef   : > { %s3974_s2 = scalar_lea.hbm %s4197_s19, 16 }
  0xf0   : > { %p3975_p13 = scmp.ne.s32.totalorder %s4197_s19, %s3974_s2  ;;  %p3981_p3 = scmp.lt.u32.totalorder %s3974_s2, %s4197_s19 }
  0xf2   : > { %p3977_p1 = pnand %p3975_p13, %p4413_p0 }
  0xf4   : > { %p3978_p2 = pneg %p3977_p1 }
  0xf6   : > { %p3983_p4 = pnand %p3981_p3, %p3978_p2 }
  0xf8   : > { %3986 = shalt.err (!%p3983_p4)
}
  0xf9   : > { %s3987_s11 = scalar_lea.vmem %s1040_s22, 16  ;;  %s3994_s7 = scalar_lea.vmem %s1040_s22, 32 }
  0xfa   : > { %p3988_p5 = scmp.ne.s32.totalorder %s1040_s22, %s3987_s11  ;;  %p3995_p10 = scmp.lt.s32.totalorder %s1040_s22, %s1040_s22 }
  0xfb   : > { %p3996_p7 = scmp.lt.s32.totalorder %s3994_s7, %s3987_s11 }
  0xfc   : > { %p3990_p6 = pnand %p3988_p5, %p4413_p0 }
  0xfd   : > { %p3997_p8 = por %p3996_p7, %p3995_p10 }
  0xfe   : > { %p3991_p9 = pneg %p3990_p6 }
 0x100   : > { %p3998_p11 = pnand %p3997_p8, %p3991_p9 }
 0x102   : > { %4001 = shalt.err (!%p3998_p11)
}
 0x103   : > { %3668 = dma.hbm_to_vmem [thread:$0]  (!%p4401_p12), %s4197_s19, 16, %s1040_s22, [#allocation13]  }
 0x104   : > { %p5022_p13 = scmp.ne.s32.totalorder %s5019_s18, 0 }
 0x105   : > { %p5023_p1 = scmp.eq.s32.totalorder (!%p5022_p13), %s4365_s0, 0 }
 0x106   : > { %1144 = sbr.rel (%p5022_p13) target bundleno = 2830 (0xb0e), region = 176 }
 0x10d   : > { %4047 = dma.done.wait (%p5023_p1), [#allocation4], 64   ;;  %p5024_p2 = pmov %p5023_p1 }
 0x10e   : > { %p5025_p0 = pmov %p5023_p1 }
 0x10f   : > { %4049 = vsyncadd (%p5024_p2), [#allocation4], 4294967232 }
 0x110   : > { %4051 = dma.done.wait (%p5025_p0), [#allocation7], 80   ;;  %p5026_p3 = pmov %p5025_p0 }
 0x111   : > { %p5027_p4 = pmov %p5025_p0 }
 0x112   : > { %4053 = vsyncadd (%p5026_p3), [#allocation7], 4294967216 }
 0x113   : > { %4055 = dma.done.wait (%p5027_p4), [#allocation10], 32   ;;  %p5028_p12 = pmov %p5025_p0 }
 0x114   : > { %p5029_p5 = pmov %p5025_p0 }
 0x115   : > { %4057 = vsyncadd (%p5028_p12), [#allocation10], 4294967264 }
 0x116   : > { %4059 = dma.done.wait (%p5029_p5), [#allocation13], 32   ;;  %p5030_p6 = pmov %p5025_p0 }
 0x117   : > { %s5031_s5 = sld [smem:[#allocation21_spill]]  ;;  %p1264_p9 = scmp.lt.s32.totalorder %s4365_s0, 1  ;;  %v1358_v0 = vlaneseq  ;;  %vm1274_vm0 = vcmask 24576   ;;  %vm1277_vm1 = vcmask 31744   ;;  %vm1371_vm2 = vcmask 261120  }
 0x118   : > { %4061 = vsyncadd (%p5030_p6), [#allocation13], 4294967264  ;;  %v4128_v7 = vmov 0.0   ;;  %v3364_v11 = vld [vmem:[#allocation3] ss:$0 sm:$0xff]  ;;  %vm1467_vm5 = vcmask 1043456  }
 0x119   : > { %s1265_s26 = scalar_select %p1264_p9, %s4365_s0, 1  ;;  %v4517_v1 = vshrl.u32 %v1358_v0, 7  ;;  %v4519_v2 = vand.u32 127, %v1358_v0  ;;  %v3366_v12 = vld [vmem:[#allocation3 + $0x1] ss:$0 sm:$0xff]  ;;  %vm4130_vm6 = vmmov 0  }
 0x11a   : > { %v3365_v13 = vld [vmem:[%s4157_s13] ss:$0 sm:$0xff]  ;;  %v3367_v14 = vld [vmem:[#allocation3 + $0x2] ss:$0 sm:$0xff]  ;;  %v3368_v18 = vld [vmem:[#allocation3 + $0x3] ss:$0 sm:$0xff] }
 0x11b   : > { %s3588_s18 = smul.u32 40, %s1265_s26  ;;  %v1363_v3 = vmul.u32 2, %v4517_v1  ;;  %v1360_v54 = vadd.s32 8, %v4517_v1  ;;  %s5032_s10 = sld [smem:[#allocation25_spill]] }
 0x11c   : > { %s5033_s22 = sld [smem:[#allocation26_spill]]  ;;  %s5034_s25 = sld [smem:[#allocation27_spill]] }
 0x11d   : > { %s1268_s1 = scalar_lea.vmem %s5031_s5, %s3588_s18  ;;  %vm1365_vm3 = vcmp.eq.s32.totalorder %v4519_v2, %v1363_v3  ;;  %v1364_v0 = vmul.u32 2, %v1360_v54  ;;  %s5035_s16 = sld [smem:[#allocation28_spill]] }
 0x11e   : > { %v1269_v4 = vld [vmem:[%s1268_s1] sm:$0xff]  ;;  %v1270_v5 = vld [vmem:[%s1268_s1 + $0x8] sm:$0xff]  ;;  %v1271_v6 = vld [vmem:[%s1268_s1 + $0x10] sm:$0xff]  ;;  %v4525_v8 = vsel %vm1365_vm3, 1.0, %v4128_v7  ;;  %s5036_s17 = sld [smem:[#allocation35_spill]]  ;;  %s5037_s2 = sld [smem:[#allocation30_spill]] }
 0x11f   : > { %1275 = vst.msk [vmem:[#allocation2 + $0x7] sm:$0x1] %vm1274_vm0, %v1269_v4  ;;  %3495 = vmatprep.mubr.msk.f32.mxu0 %vm1371_vm2, %v4525_v8  ;;  %v1272_v9 = vld [vmem:[%s1268_s1 + $0x18] sm:$0xff]  ;;  %v1273_v10 = vld [vmem:[%s1268_s1 + $0x20] sm:$0x1]  ;;  %vm1366_vm4 = vcmp.eq.s32.totalorder %v4519_v2, %v1364_v0  ;;  %v4129_v2 = vmov 0.0|0.0  }
 0x120   : > { %1278 = vst.msk [vmem:[#allocation2 + $0x8] sm:$0xff] %vm1277_vm1, %v1269_v4  ;;  %1279 = vst.msk [vmem:[#allocation2 + $0x10] sm:$0xff] %vm1277_vm1, %v1270_v5  ;;  %v3370_v1 = vsel %vm1366_vm4, 1.0, %v4128_v7  ;;  %s5038_s11 = sld [smem:[#allocation31_spill]]  ;;  %s5039_s7 = sld [smem:[#allocation32_spill]] }
 0x121   : > { %1280 = vst.msk [vmem:[#allocation2 + $0x18] sm:$0xff] %vm1277_vm1, %v1271_v6  ;;  %1281 = vst.msk [vmem:[#allocation2 + $0x20] sm:$0xff] %vm1277_vm1, %v1272_v9  ;;  %v1453_v6 = vld [vmem:[#allocation6] sm:$0xf]  ;;  %s5040_s26 = sld [smem:[#allocation33_spill]]  ;;  %s5042_s1 = sld [smem:[#allocation34_spill]] }
 0x122   : > { %1276 = vst.msk [vmem:[#allocation2 + $0x29] sm:$0x1] %vm1274_vm0, %v1273_v10  ;;  %1282 = vst.msk [vmem:[#allocation2 + $0x28] sm:$0x1] %vm1274_vm0, %v1273_v10  ;;  %3498 = vmatprep.subr.msk.mxu1 %vm1467_vm5, %v1453_v6  ;;  %p5056_p7 = scmp.ne.s32.totalorder %s5016_s15, 0 }
 0x123   : > { %3499 = vmatpush3.msk.msra.mxu1 %vm1467_vm5, %v1453_v6 }
 0x124   : > { %3510 = vmatprep.subr.mxu1 %v4128_v7 }
 0x127   : > { %v1283_v15 = vld [vmem:[#allocation2 + $0x7] sm:$0xff]  ;;  %v1284_v16 = vld [vmem:[#allocation2 + $0xf] sm:$0xff]  ;;  %s5041_s18 = smov %s5040_s26 }
 0x128   : > { %v1307_v17 = vld [vmem:[#allocation2 + $0x8] sm:$0xff]  ;;  %v1292_v19 = vmul.f32 %v3364_v11, %v1283_v15  ;;  %v1293_v20 = vmul.f32 %v3364_v11, %v1284_v16  ;;  %v1308_v21 = vld [vmem:[#allocation2 + $0x10] sm:$0xff]  ;;  %v1286_v33 = vld [vmem:[#allocation2 + $0x1f] sm:$0xff] }
 0x129   : > { %v1316_v22 = vmul.f32 %v3366_v12, %v1307_v17  ;;  %v1324_v23 = vld [vmem:[#allocation2 + $0x9] sm:$0xff]  ;;  %v1325_v24 = vld [vmem:[#allocation2 + $0x11] sm:$0xff]  ;;  %v1317_v25 = vmul.f32 %v3366_v12, %v1308_v21  ;;  %v1310_v35 = vld [vmem:[#allocation2 + $0x20] sm:$0xff]  ;;  %v1295_v37 = vmul.f32 %v3364_v11, %v1286_v33 }
 0x12a   : > { %v1341_v26 = vld [vmem:[#allocation2 + $0xa] sm:$0xff]  ;;  %v1342_v27 = vld [vmem:[#allocation2 + $0x12] sm:$0xff]  ;;  %v1303_v29 = vadd.f32 %v3365_v13, %v1292_v19  ;;  %v1304_v30 = vadd.f32 %v3365_v13, %v1293_v20  ;;  %v1333_v31 = vmul.f32 %v3367_v14, %v1324_v23  ;;  %v1334_v32 = vmul.f32 %v3367_v14, %v1325_v24  ;;  %v1327_v41 = vld [vmem:[#allocation2 + $0x21] sm:$0xff] }
 0x12b   : > { %v1285_v28 = vld [vmem:[#allocation2 + $0x17] sm:$0xff]  ;;  %v1319_v39 = vmul.f32 %v3366_v12, %v1310_v35  ;;  %v1350_v44 = vmul.f32 %v3368_v18, %v1341_v26  ;;  %v1351_v45 = vmul.f32 %v3368_v18, %v1342_v27  ;;  %v1344_v47 = vld [vmem:[#allocation2 + $0x22] sm:$0xff]  ;;  %v1306_v49 = vadd.f32 %v3365_v13, %v1295_v37 }
 0x12c   : > { %v1309_v34 = vld [vmem:[#allocation2 + $0x18] sm:$0xff]  ;;  %v1294_v36 = vmul.f32 %v3364_v11, %v1285_v28  ;;  %v1320_v42 = vadd.f32 %v1316_v22, %v1303_v29  ;;  %v1321_v43 = vadd.f32 %v1317_v25, %v1304_v30  ;;  %v1336_v51 = vmul.f32 %v3367_v14, %v1327_v41  ;;  %v1911_v11 = vld [vmem:[%s4192_s14] sm:$0xff] }
 0x12d   : > { %v1318_v38 = vmul.f32 %v3366_v12, %v1309_v34  ;;  %v1326_v40 = vld [vmem:[#allocation2 + $0x19] sm:$0xff]  ;;  %v1323_v56 = vadd.f32 %v1319_v39, %v1306_v49  ;;  %v1353_v58 = vmul.f32 %v3368_v18, %v1344_v47  ;;  %v3373_v12 = vld [vmem:[#allocation8] ss:$0 sm:$0xff] }
 0x12e   : > { %v1343_v46 = vld [vmem:[#allocation2 + $0x1a] sm:$0xff]  ;;  %v1305_v48 = vadd.f32 %v3365_v13, %v1294_v36  ;;  %v1335_v50 = vmul.f32 %v3367_v14, %v1326_v40  ;;  %v1337_v52 = vadd.f32 %v1333_v31, %v1320_v42  ;;  %v1338_v53 = vadd.f32 %v1334_v32, %v1321_v43 }
 0x12f   : > { %v1352_v57 = vmul.f32 %v3368_v18, %v1343_v46  ;;  %v1340_v62 = vadd.f32 %v1336_v51, %v1323_v56  ;;  %v3377_v14 = vld [vmem:[#allocation9] ss:$0 sm:$0xff]  ;;  %v4131_v40 = vmov 683565275   ;;  %v4133_v46 = vmov 2131351028  }
 0x130   : > { %v1322_v55 = vadd.f32 %v1318_v38, %v1305_v48  ;;  %v1354_v59 = vadd.f32 %v1350_v44, %v1337_v52  ;;  %v1355_v60 = vadd.f32 %v1351_v45, %v1338_v53  ;;  %v4132_v44 = vmov 2475754826  }
 0x131   : > { %v1357_v4 = vadd.f32 %v1353_v58, %v1340_v62  ;;  %v4134_v48 = vmov 2102212464  }
 0x132   : > { %v1339_v61 = vadd.f32 %v1335_v50, %v1322_v55  ;;  %v3554_v63 = vpack.c.bf16 %v1355_v60, %v1354_v59  ;;  %v4135_v50 = vmov 920167782  }
 0x134   : > { %v1356_v3 = vadd.f32 %v1352_v57, %v1339_v61  ;;  %3555 = vmatprep.subr.bf16.mxu0 %v3554_v63  ;;  %v4136_v57 = vmov 1326507024  }
 0x135   : > { %3557 = vmatpush3.bf16.msra.mxu0 %v3554_v63 }
 0x136   : > { %v3558_v5 = vpack.c.bf16 %v1357_v4, %v1356_v3 }
 0x138   : > { %3559 = vmatprep.subr.bf16.mxu0 %v3558_v5 }
 0x139   : > { %3561 = vmatpush3.bf16.msra.mxu0 %v3558_v5 }
 0x13a   : > { %3562 = vmatprep.subr.bf16.mxu0 %v4129_v2 }
 0x13c   : > { %3496 = vmatmul.mubr.msk.f32.vlgmr.msra.gmra.mrb[0].mxu0 %vm1371_vm2, %v3370_v1 }
 0x13d   : > { %3507 = vmatprep.mubr.msk.f32.mxu0 %vm4130_vm6, %v4128_v7 }
 0x20f   : > { %v3497_v9 = vpop.f32.mrb[0].mxu0 }
 0x210   : > { %v1444_v10 = vpop.f32.mrb[1].mxu0 }
 0x211   : > { %3500 = vmatprep.mubr.msk.f32.mxu1 %vm1277_vm1, %v1444_v10 }
 0x212   : > { %3501 = vmatmul.mubr.msk.f32.vlgmr.msra.gmra.mrb[0].mxu1 %vm1277_vm1, %v3497_v9 }
 0x213   : > { %3512 = vmatprep.mubr.msk.f32.mxu1 %vm4130_vm6, %v4128_v7  ;;  %3511 = vmatpush3.msra.mxu1 %v1911_v11 }
 0x214   : > { %3569 = vmatprep.subr.bf16.mxu1 %v4129_v2 }
 0x2e5   : > { %v3502_v13 = vpop.f32.mrb[0].mxu1 }
 0x2e6   : > { %v4551_v15 = vadd.f32 %v3502_v13, %v3373_v12  ;;  %v1537_v16 = vpop.f32.mrb[1].mxu1 }
 0x2e7   : > { %v4553_v17 = vadd.f32 %v3373_v12, %v1537_v16 }
 0x2e8   : > { %v4556_v18 = vmul.f32 %v3377_v14, %v4551_v15 }
 0x2e9   : > { %v4559_v19 = vmul.f32 %v3377_v14, %v4553_v17 }
 0x2ea   : > { %v1659_v20 = vand.u32 2147483647, %v4556_v18  ;;  %v1662_v21 = vand.u32 2139095040, %v4556_v18 }
 0x2eb   : > { %v1558_v22 = vand.u32 2139095040, %v4559_v19  ;;  %v1555_v25 = vand.u32 2147483647, %v4559_v19 }
 0x2ec   : > { %v1663_v23 = vshrl.u32 %v1662_v21, 23  ;;  %v1666_v24 = vand.u32 8388607, %v1659_v20 }
 0x2ed   : > { %v1559_v26 = vshrl.u32 %v1558_v22, 23  ;;  %v4569_v31 = vand.u32 8388607, %v1555_v25 }
 0x2ee   : > { %v3382_v27 = vadd.s32 4294967169, %v1663_v23  ;;  %v1667_v30 = vor.u32 8388608, %v1666_v24 }
 0x2ef   : > { %v3378_v28 = vadd.s32 4294967169, %v1559_v26  ;;  %v1563_v38 = vor.u32 8388608, %v4569_v31 }
 0x2f0   : > { %v1669_v29 = vadd.s32 1, %v3382_v27  ;;  %v4571_v37 = vshll.u32 %v1667_v30, 8 }
 0x2f1   : > { %v1565_v32 = vadd.s32 1, %v3378_v28 }
 0x2f2   : > { %vm1670_vm7 = vcmp.gt.s32.totalorder %v1669_v29, 0 }
 0x2f3   : > { %v1671_v33 = vsel %vm1670_vm7, %v1669_v29, 0  ;;  %vm1566_vm8 = vcmp.gt.s32.totalorder %v1565_v32, 0  ;;  %vm1661_vm7 = vcmp.lt.s32.totalorder %v4556_v18, 0 }
 0x2f4   : > { %v1672_v34 = vshrl.u32 %v1671_v33, 5  ;;  %v1673_v35 = vand.u32 31, %v1671_v33  ;;  %v1567_v36 = vsel %vm1566_vm8, %v1565_v32, 0  ;;  %vm1660_vm8 = vcmp.le.f32.partialorder %v1659_v20, 0.7853982 }
 0x2f5   : > { %v4575_v42 = vshrl.u32 %v1567_v36, 5  ;;  %v1569_v43 = vand.u32 31, %v1567_v36 }
 0x2f6   : > { %v1674_v39 = vsub.s32 32, %v1673_v35  ;;  %v1676_v41 = vshll.u32 %v4131_v40, %v1673_v35  ;;  %v1679_v45 = vshll.u32 %v4132_v44, %v1673_v35  ;;  %v1682_v47 = vshll.u32 %v4133_v46, %v1673_v35 }
 0x2f7   : > { %v1685_v49 = vshll.u32 %v4134_v48, %v1673_v35  ;;  %v1688_v51 = vshll.u32 %v4135_v50, %v1673_v35  ;;  %vm1691_vm9 = vcmp.lt.s32.totalorder %v1672_v34, 1  ;;  %vm1692_vm10 = vcmp.lt.s32.totalorder %v1672_v34, 2 }
 0x2f8   : > { %v1677_v52 = vshrl.u32 %v4132_v44, %v1674_v39  ;;  %v1680_v53 = vshrl.u32 %v4133_v46, %v1674_v39  ;;  %v1683_v54 = vshrl.u32 %v4134_v48, %v1674_v39  ;;  %v1675_v55 = vshrl.u32 %v4131_v40, %v1674_v39 }
 0x2f9   : > { %v1686_v56 = vshrl.u32 %v4135_v50, %v1674_v39  ;;  %v1689_v58 = vshrl.u32 %v4136_v57, %v1674_v39  ;;  %v1570_v62 = vsub.s32 32, %v1569_v43  ;;  %vm1693_vm11 = vcmp.lt.s32.totalorder %v1672_v34, 3 }
 0x2fa   : > { %v1678_v59 = vor.u32 %v1677_v52, %v1676_v41  ;;  %v1681_v60 = vor.u32 %v1680_v53, %v1679_v45  ;;  %v1684_v61 = vor.u32 %v1683_v54, %v1682_v47  ;;  %vm1694_vm12 = vcmp.lt.s32.totalorder %v1672_v34, 4 }
 0x2fb   : > { %v1687_v63 = vor.u32 %v1686_v56, %v1685_v49  ;;  %v1690_v0 = vor.u32 %v1689_v58, %v1688_v51  ;;  %v1572_v11 = vshll.u32 %v4131_v40, %v1569_v43  ;;  %v1573_v14 = vshrl.u32 %v4132_v44, %v1570_v62 }
 0x2fc   : > { %v1695_v3 = vsel %vm1691_vm9, %v1675_v55, %v1678_v59  ;;  %v1696_v4 = vsel %vm1694_vm12, %v1684_v61, 2102212464  ;;  %v1699_v5 = vsel %vm1691_vm9, %v1678_v59, %v1681_v60  ;;  %v1703_v1 = vsel %vm1691_vm9, %v1681_v60, %v1684_v61 }
 0x2fd   : > { %v1697_v6 = vsel %vm1693_vm11, %v1681_v60, %v1696_v4  ;;  %v1700_v9 = vsel %vm1694_vm12, %v1687_v63, 920167782  ;;  %v1704_v10 = vsel %vm1694_vm12, %v1690_v0, 1326507024  ;;  %v1575_v16 = vshll.u32 %v4132_v44, %v1569_v43 }
 0x2fe   : > { %v1701_v12 = vsel %vm1693_vm11, %v1684_v61, %v1700_v9  ;;  %v1705_v13 = vsel %vm1693_vm11, %v1687_v63, %v1704_v10  ;;  %v1698_v21 = vsel %vm1692_vm10, %v1695_v3, %v1697_v6  ;;  %v1576_v24 = vshrl.u32 %v4133_v46, %v1570_v62 }
 0x2ff   : > { %v1702_v22 = vsel %vm1692_vm10, %v1699_v5, %v1701_v12  ;;  %v1706_v23 = vsel %vm1692_vm10, %v1703_v1, %v1705_v13  ;;  %v1574_v30 = vor.u32 %v1573_v14, %v1572_v11  ;;  %v1578_v32 = vshll.u32 %v4133_v46, %v1569_v43 }
 0x300   : > { %v4598_v26 = vmul.u32.u64.low %v4571_v37, %v1706_v23  ;;  %v4599_v27 = vmul.u32.u64.high %v4571_v37, %v1706_v23, %v4598_v26  ;;  %v4602_v28 = vmul.u32.u64.low %v4571_v37, %v1702_v22  ;;  %v4603_v29 = vmul.u32.u64.high %v4571_v37, %v1702_v22, %v4602_v28 }
 0x301   : > { %v1577_v31 = vor.u32 %v1576_v24, %v1575_v16  ;;  %v1579_v33 = vshrl.u32 %v4134_v48, %v1570_v62  ;;  %v1581_v35 = vshll.u32 %v4134_v48, %v1569_v43  ;;  %v1582_v34 = vshrl.u32 %v4135_v50, %v1570_v62 }
 0x302   : > { %v1585_v36 = vshrl.u32 %v4136_v57, %v1570_v62  ;;  %v1603_v39 = vshll.u32 %v1563_v38, 8  ;;  %v1714_v41 = vmul.u32 %v4571_v37, %v1698_v21  ;;  %v1571_v45 = vshrl.u32 %v4131_v40, %v1570_v62 }
 0x303   : > { %v1580_v47 = vor.u32 %v1579_v33, %v1578_v32  ;;  %v1584_v49 = vshll.u32 %v4135_v50, %v1569_v43  ;;  %vm1716_vm13 = vc.u32 %v4599_v27, %v4602_v28  ;;  %v1717_v51 = vadd.s32 1, %v4603_v29 }
 0x304   : > { %v1583_v52 = vor.u32 %v1582_v34, %v1581_v35  ;;  %vm1587_vm14 = vcmp.lt.s32.totalorder %v4575_v42, 1  ;;  %vm1589_vm15 = vcmp.lt.s32.totalorder %v4575_v42, 3  ;;  %vm1590_vm0 = vcmp.lt.s32.totalorder %v4575_v42, 4 }
 0x305   : > { %v1586_v53 = vor.u32 %v1585_v36, %v1584_v49  ;;  %v1595_v38 = vsel %vm1587_vm14, %v1574_v30, %v1577_v31  ;;  %v1718_v37 = vsel %vm1716_vm13, %v1717_v51, %v4603_v29  ;;  %v1592_v54 = vsel %vm1590_vm0, %v1580_v47, 2102212464 }
 0x306   : > { %v1596_v55 = vsel %vm1590_vm0, %v1583_v52, 920167782  ;;  %v1599_v56 = vsel %vm1587_vm14, %v1577_v31, %v1580_v47  ;;  %v1719_v58 = vadd.s32 %v1718_v37, %v1714_v41  ;;  %vm1588_vm1 = vcmp.lt.s32.totalorder %v4575_v42, 2 }
 0x307   : > { %v1597_v43 = vsel %vm1589_vm15, %v1580_v47, %v1596_v55  ;;  %v1600_v59 = vsel %vm1590_vm0, %v1586_v53, 1326507024  ;;  %v1591_v60 = vsel %vm1587_vm14, %v1571_v45, %v1574_v30  ;;  %v1593_v61 = vsel %vm1589_vm15, %v1577_v31, %v1592_v54 }
 0x308   : > { %v1598_v62 = vsel %vm1588_vm1, %v1595_v38, %v1597_v43  ;;  %v1601_v63 = vsel %vm1589_vm15, %v1583_v52, %v1600_v59  ;;  %v1720_v0 = vadd.s32 536870912, %v1719_v58  ;;  %v1594_v10 = vsel %vm1588_vm1, %v1591_v60, %v1593_v61 }
 0x309   : > { %v1602_v3 = vsel %vm1588_vm1, %v1599_v56, %v1601_v63  ;;  %v4620_v4 = vmul.u32.u64.low %v1603_v39, %v1598_v62  ;;  %v4621_v5 = vmul.u32.u64.high %v1603_v39, %v1598_v62, %v4620_v4  ;;  %v1610_v42 = vmul.u32 %v1603_v39, %v1594_v10 }
 0x30a   : > { %v4623_v1 = vmul.u32.u64.low %v1603_v39, %v1602_v3  ;;  %v4624_v6 = vmul.u32.u64.high %v1603_v39, %v1602_v3, %v4623_v1  ;;  %v1721_v9 = vshrl.u32 %v1720_v0, 30  ;;  %v1715_v35 = vadd.s32 %v4602_v28, %v4599_v27 }
 0x30b   : > { %v1613_v12 = vadd.s32 1, %v4621_v5  ;;  %vm1557_vm9 = vcmp.lt.s32.totalorder %v4559_v19, 0  ;;  %vm1556_vm10 = vcmp.le.f32.partialorder %v1555_v25, 0.7853982  ;;  %vm1751_vm14 = vweird.f32 %v4556_v18 }
 0x30c   : > { %v1722_v11 = vshll.u32 %v1721_v9, 30  ;;  %vm1612_vm3 = vc.u32 %v4624_v6, %v4620_v4  ;;  %v1611_v56 = vadd.s32 %v4620_v4, %v4624_v6  ;;  %v1745_v28 = vsub.s32 4, %v1721_v9 }
 0x30d   : > { %v1614_v14 = vsel %vm1612_vm3, %v1613_v12, %v4621_v5  ;;  %vm1778_vm15 = vcmask 64519   ;;  %vm1780_vm0 = vcmask 64512  }
 0x30e   : > { %v1723_v13 = vsub.s32 %v1719_v58, %v1722_v11  ;;  %v1615_v16 = vadd.s32 %v1614_v14, %v1610_v42  ;;  %v1746_v5 = vsel %vm1661_vm7, %v1745_v28, %v1721_v9 }
 0x30f   : > { %v1748_v6 = vsel %vm1660_vm8, 0, %v1746_v5 }
 0x310   : > { %v1725_v21 = vsub.s32 0, %v1723_v13  ;;  %v1616_v22 = vadd.s32 536870912, %v1615_v16 }
 0x312   : > { %v3383_v23 = vmin.u32 %v1725_v21, %v1723_v13  ;;  %v1617_v24 = vshrl.u32 %v1616_v22, 30 }
 0x314   : > { %v1727_v26 = vclz %v3383_v23  ;;  %v1618_v29 = vshll.u32 %v1617_v24, 30  ;;  %v1641_v42 = vsub.s32 4, %v1617_v24 }
 0x316   : > { %v3384_v30 = vadd.s32 4294967294, %v1727_v26  ;;  %v1619_v31 = vsub.s32 %v1615_v16, %v1618_v29  ;;  %v1642_v16 = vsel %vm1557_vm9, %v1641_v42, %v1617_v24 }
 0x317   : > { %v1644_v23 = vsel %vm1556_vm10, 0, %v1642_v16 }
 0x318   : > { %vm3385_vm4 = vcmp.lt.s32.totalorder %v3384_v30, 0  ;;  %v1621_v33 = vsub.s32 0, %v1619_v31 }
 0x319   : > { %v1730_v32 = vsel %vm3385_vm4, 0, %v3384_v30 }
 0x31a   : > { %v1731_v34 = vsub.s32 32, %v1730_v32  ;;  %v1735_v36 = vsub.s32 4294967266, %v1730_v32  ;;  %v3379_v39 = vmin.u32 %v1621_v33, %v1619_v31  ;;  %v1732_v41 = vshll.u32 %v1723_v13, %v1730_v32 }
 0x31b   : > { %v1752_v13 = vadd.s32 3, %v1748_v6  ;;  %v1648_v32 = vadd.s32 3, %v1644_v23  ;;  %v3391_v6 = vld [vmem:[%s5009_s3 + $0x3] ss:$0 sm:$0xff] }
 0x31c   : > { %v1733_v45 = vshrl.u32 %v1715_v35, %v1731_v34  ;;  %v1736_v47 = vadd.s32 127, %v1735_v36  ;;  %v1623_v49 = vclz %v3379_v39  ;;  %v3386_v35 = vld [vmem:[#allocation11] ss:$0 sm:$0xff] }
 0x31d   : > { %v1753_v9 = vand.u32 3, %v1752_v13  ;;  %v1649_v36 = vand.u32 3, %v1648_v32 }
 0x31e   : > { %v1734_v51 = vor.u32 %v1733_v45, %v1732_v41  ;;  %v1737_v52 = vshll.u32 %v1736_v47, 23  ;;  %v3380_v53 = vadd.s32 4294967294, %v1623_v49 }
 0x31f   : > { %vm1758_vm11 = vcmp.eq.s32.totalorder %v1753_v9, 2  ;;  %vm1755_vm12 = vcmp.eq.s32.totalorder %v1753_v9, 0  ;;  %vm1754_vm13 = vcmp.lt.s32.totalorder %v1753_v9, 2  ;;  %vm1654_vm1 = vcmp.eq.s32.totalorder %v1649_v36, 2 }
 0x320   : > { %v1738_v38 = vor.u32 4788187, %v1737_v52  ;;  %vm3381_vm5 = vcmp.lt.s32.totalorder %v3380_v53, 0  ;;  %v1741_v54 = vcvt.s32.f32 %v1734_v51  ;;  %vm1651_vm3 = vcmp.eq.s32.totalorder %v1649_v36, 0 }
 0x321   : > { %v1626_v55 = vsel %vm3381_vm5, 0, %v3380_v53  ;;  %vm1650_vm4 = vcmp.lt.s32.totalorder %v1649_v36, 2  ;;  %vm1647_vm5 = vweird.f32 %v4559_v19 }
 0x322   : > { %v1739_v37 = vand.u32 2147483647, %v1738_v38  ;;  %v1627_v58 = vsub.s32 32, %v1626_v55  ;;  %v1631_v43 = vsub.s32 4294967266, %v1626_v55  ;;  %v1628_v59 = vshll.u32 %v1619_v31, %v1626_v55  ;;  %v3387_v55 = vld [vmem:[%s5009_s3] ss:$0 sm:$0xff] }
 0x324   : > { %v1742_v27 = vmul.f32 %v1741_v54, %v1739_v37  ;;  %v1629_v60 = vshrl.u32 %v1611_v56, %v1627_v58  ;;  %v1632_v61 = vadd.s32 127, %v1631_v43  ;;  %v3388_v56 = vld [vmem:[#allocation12] ss:$0 sm:$0xff]  ;;  %v3389_v43 = vld [vmem:[%s5009_s3 + $0x1] ss:$0 sm:$0xff] }
 0x326   : > { %v1743_v62 = vxor.u32 2147483648, %v1742_v27  ;;  %v1630_v63 = vor.u32 %v1629_v60, %v1628_v59  ;;  %v1633_v0 = vshll.u32 %v1632_v61, 23 }
 0x328   : > { %v1744_v3 = vsel %vm1661_vm7, %v1743_v62, %v1742_v27  ;;  %v1634_v4 = vor.u32 4788187, %v1633_v0  ;;  %v1637_v11 = vcvt.s32.f32 %v1630_v63  ;;  %vm1776_vm7 = vcmask 57344   ;;  %v3390_v63 = vld [vmem:[%s5009_s3 + $0x2] ss:$0 sm:$0xff] }
 0x329   : > { %v1747_v1 = vsel %vm1660_vm8, %v4556_v18, %v1744_v3  ;;  %vm2236_vm8 = vcmask 122880  }
 0x32a   : > { %3776 = vcosq.f32 %v1747_v1  ;;  %v1635_v10 = vand.u32 2147483647, %v1634_v4 }
 0x32b   : > { %3778 = vsinq.f32 %v1747_v1 }
 0x32c   : > { %v1638_v12 = vmul.f32 %v1637_v11, %v1635_v10 }
 0x32e   : > { %v1639_v14 = vxor.u32 2147483648, %v1638_v12 }
 0x330   : > { %v1640_v20 = vsel %vm1557_vm9, %v1639_v14, %v1638_v12  ;;  %vm1837_vm9 = vcmask 1046528  }
 0x331   : > { %v1643_v21 = vsel %vm1556_vm10, %v4559_v19, %v1640_v20  ;;  %vm4137_vm10 = vmmov 1  }
 0x332   : > { %3780 = vcosq.f32 %v1643_v21 }
 0x333   : > { %3782 = vsinq.f32 %v1643_v21 }
 0x334   : > { %v3777_v22 = vpop.eup %3776 }
 0x335   : > { %v3779_v26 = vpop.eup %3778  ;;  %v1759_v29 = vxor.u32 2147483648, %v3777_v22 }
 0x336   : > { %v1756_v30 = vxor.u32 2147483648, %v3779_v26 }
 0x337   : > { %v1760_v31 = vsel %vm1758_vm11, %v1759_v29, %v3779_v26  ;;  %vm3564_vm11 = vmpackc.low %vm1837_vm9, %vm4137_vm10  ;;  %v3394_v29 = vld [vmem:[#allocation14] ss:$0 sm:$0xff] }
 0x338   : > { %v1757_v33 = vsel %vm1755_vm12, %v3777_v22, %v1756_v30  ;;  %vm1834_vm12 = vcmask 121856  }
 0x339   : > { %v1761_v25 = vsel %vm1754_vm13, %v1757_v33, %v1760_v31  ;;  %v3396_v31 = vld [vmem:[%s4202_s24] ss:$0 sm:$0xff] }
 0x33a   : > { %v1762_v24 = vsel %vm1751_vm14, nan, %v1761_v25 }
 0x33b   : > { %v1765_v34 = vmul.f32 %v1762_v24, %v1762_v24 }
 0x33c   : > { %v3781_v39 = vpop.eup %3780 }
 0x33d   : > { %v1773_v41 = vmul.f32 %v3386_v35, %v1765_v34  ;;  %v3783_v45 = vpop.eup %3782  ;;  %v1655_v47 = vxor.u32 2147483648, %v3781_v39 }
 0x33e   : > { %v1652_v51 = vxor.u32 2147483648, %v3783_v45 }
 0x33f   : > { %v1775_v49 = vadd.f32 %v1773_v41, %v4551_v15  ;;  %v1656_v52 = vsel %vm1654_vm1, %v1655_v47, %v3783_v45 }
 0x340   : > { %v1653_v18 = vsel %vm1651_vm3, %v3781_v39, %v1652_v51 }
 0x341   : > { %1779 = vst.msk [vmem:[#allocation2 + $0x11] sm:$0x80] %vm1778_vm15, %v1775_v49  ;;  %v1657_v53 = vsel %vm1650_vm4, %v1653_v18, %v1656_v52 }
 0x342   : > { %1782 = vst.msk [vmem:[#allocation2 + $0x10] sm:$0xff] %vm1780_vm0, %v1775_v49  ;;  %v1658_v38 = vsel %vm1647_vm5, nan, %v1657_v53 }
 0x343   : > { %v1764_v37 = vmul.f32 %v1658_v38, %v1658_v38 }
 0x345   : > { %v1772_v54 = vmul.f32 %v3386_v35, %v1764_v37 }
 0x347   : > { %v1774_v15 = vadd.f32 %v1772_v54, %v4553_v17 }
 0x349   : > { %1777 = vst.msk [vmem:[#allocation2 + $0x7] sm:$0x1] %vm1776_vm7, %v1774_v15  ;;  %v1802_v58 = vld [vmem:[#allocation2 + $0x10] sm:$0x7f] }
 0x34a   : > { %1781 = vst.msk [vmem:[#allocation2 + $0x8] sm:$0xff] %vm1780_vm0, %v1774_v15  ;;  %v1813_v62 = vld [vmem:[#allocation2 + $0x11] sm:$0x7f]  ;;  %v1809_v1 = vmul.f32 %v3389_v43, %v1802_v58 }
 0x34b   : > { %v1824_v4 = vld [vmem:[#allocation2 + $0x12] sm:$0x7f]  ;;  %v1820_v42 = vmul.f32 %v3390_v63, %v1813_v62 }
 0x34c   : > { %v1831_v16 = vmul.f32 %v3391_v6, %v1824_v4 }
 0x351   : > { %v1783_v27 = vld [vmem:[#allocation2 + $0x7] sm:$0xff]  ;;  %v1784_v28 = vld [vmem:[#allocation2 + $0xf] sm:$0x7f] }
 0x352   : > { %v1801_v19 = vld [vmem:[#allocation2 + $0x8] sm:$0xff]  ;;  %2237 = vst.msk [vmem:[#allocation2 + $0x7] sm:$0x1] %vm2236_vm8, %v4128_v7  ;;  %v1790_v59 = vmul.f32 %v3387_v55, %v1783_v27  ;;  %v1791_v60 = vmul.f32 %v3387_v55, %v1784_v28 }
 0x353   : > { %v1812_v61 = vld [vmem:[#allocation2 + $0x9] sm:$0xff]  ;;  %v1808_v5 = vmul.f32 %v3389_v43, %v1801_v19 }
 0x354   : > { %v1823_v17 = vld [vmem:[#allocation2 + $0xa] sm:$0xff]  ;;  %v1799_v0 = vadd.f32 %v3388_v56, %v1790_v59  ;;  %v1800_v3 = vadd.f32 %v3388_v56, %v1791_v60  ;;  %v1819_v12 = vmul.f32 %v3390_v63, %v1812_v61 }
 0x355   : > { %2238 = vst.msk [vmem:[#allocation2 + $0x10] sm:$0x1] %vm2236_vm8, %v4128_v7  ;;  %v1830_v20 = vmul.f32 %v3391_v6, %v1823_v17 }
 0x356   : > { %v1810_v10 = vadd.f32 %v1808_v5, %v1799_v0  ;;  %v1811_v11 = vadd.f32 %v1809_v1, %v1800_v3 }
 0x358   : > { %v1821_v13 = vadd.f32 %v1819_v12, %v1810_v10  ;;  %v1822_v14 = vadd.f32 %v1820_v42, %v1811_v11 }
 0x35a   : > { %v1832_v9 = vadd.f32 %v1830_v20, %v1821_v13  ;;  %v1833_v21 = vadd.f32 %v1831_v16, %v1822_v14 }
 0x35c   : > { %v3563_v22 = vpack.c.bf16 %v1833_v21, %v1832_v9 }
 0x35e   : > { %3565 = vmatpush3.bf16.msk.msra.mxu0 %vm3564_vm11, %v3563_v22 }
 0x35f   : > { %3566 = vmatprep.subr.bf16.mxu0 %v4129_v2 }
 0x361   : > { %3508 = vmatmul.mubr.msk.f32.vlgmr.msra.gmra.mrb[2].mxu0 %vm1834_vm12, %v4525_v8 }
 0x362   : > { %3519 = vmatprep.mubr.msk.f32.mxu0 %vm4130_vm6, %v4128_v7 }
 0x434   : > { %v1907_v23 = vpop.f32.mrb[2].mxu0 }
 0x435   : > { %v3509_v26 = vpop.f32.mrb[3].mxu0  ;;  %3513 = vmatmul.mubr.msk.f32.vlgmr.msra.gmra.mrb[2].mxu1 %vm1780_vm0, %v1907_v23 }
 0x436   : > { %3526 = vmatprep.mubr.msk.f32.mxu1 %vm4130_vm6, %v4128_v7 }
 0x508   : > { %v1988_v30 = vpop.f32.mrb[2].mxu1 }
 0x509   : > { %v4661_v32 = vadd.f32 %v3394_v29, %v1988_v30  ;;  %v3514_v33 = vpop.f32.mrb[3].mxu1 }
 0x50b   : > { %v4664_v25 = vmul.f32 %v3396_v31, %v4661_v32 }
 0x50d   : > { %v2003_v8 = vand.u32 2139095040, %v4664_v25  ;;  %v2000_v36 = vand.u32 2147483647, %v4664_v25  ;;  %vm2002_vm5 = vcmp.lt.s32.totalorder %v4664_v25, 0  ;;  %vm2092_vm12 = vweird.f32 %v4664_v25 }
 0x50f   : > { %v2004_v24 = vshrl.u32 %v2003_v8, 23  ;;  %v2007_v45 = vand.u32 8388607, %v2000_v36  ;;  %vm2001_vm7 = vcmp.le.f32.partialorder %v2000_v36, 0.7853982 }
 0x511   : > { %v3397_v35 = vadd.s32 4294967169, %v2004_v24  ;;  %v2008_v58 = vor.u32 8388608, %v2007_v45 }
 0x513   : > { %v2010_v34 = vadd.s32 1, %v3397_v35  ;;  %v2048_v1 = vshll.u32 %v2008_v58, 8 }
 0x515   : > { %vm2011_vm13 = vcmp.gt.s32.totalorder %v2010_v34, 0 }
 0x516   : > { %v2012_v39 = vsel %vm2011_vm13, %v2010_v34, 0  ;;  %v2272_v34 = vld [vmem:[%s5008_s4] sm:$0xff] }
 0x517   : > { %v2014_v41 = vand.u32 31, %v2012_v39  ;;  %v2013_v49 = vshrl.u32 %v2012_v39, 5  ;;  %v2273_v39 = vld [vmem:[%s5008_s4 + $0x8] sm:$0xff] }
 0x519   : > { %v2015_v47 = vsub.s32 32, %v2014_v41  ;;  %v2017_v51 = vshll.u32 %v4131_v40, %v2014_v41  ;;  %v2020_v52 = vshll.u32 %v4132_v44, %v2014_v41  ;;  %v2023_v38 = vshll.u32 %v4133_v46, %v2014_v41 }
 0x51a   : > { %v2026_v54 = vshll.u32 %v4134_v48, %v2014_v41  ;;  %v2029_v55 = vshll.u32 %v4135_v50, %v2014_v41  ;;  %vm2032_vm14 = vcmp.lt.s32.totalorder %v2013_v49, 1  ;;  %vm2035_vm15 = vcmp.lt.s32.totalorder %v2013_v49, 4 }
 0x51b   : > { %v2018_v18 = vshrl.u32 %v4132_v44, %v2015_v47  ;;  %v2021_v53 = vshrl.u32 %v4133_v46, %v2015_v47  ;;  %v2024_v37 = vshrl.u32 %v4134_v48, %v2015_v47  ;;  %v2027_v15 = vshrl.u32 %v4135_v50, %v2015_v47 }
 0x51c   : > { %v2030_v56 = vshrl.u32 %v4136_v57, %v2015_v47  ;;  %v2016_v62 = vshrl.u32 %v4131_v40, %v2015_v47  ;;  %vm2034_vm0 = vcmp.lt.s32.totalorder %v2013_v49, 3  ;;  %vm2033_vm1 = vcmp.lt.s32.totalorder %v2013_v49, 2 }
 0x51d   : > { %v2019_v43 = vor.u32 %v2018_v18, %v2017_v51  ;;  %v2022_v27 = vor.u32 %v2021_v53, %v2020_v52  ;;  %v2025_v28 = vor.u32 %v2024_v37, %v2023_v38  ;;  %v2028_v19 = vor.u32 %v2027_v15, %v2026_v54 }
 0x51e   : > { %v2031_v59 = vor.u32 %v2030_v56, %v2029_v55  ;;  %v3567_v49 = vpack.c.bf16 %v2273_v39, %v2272_v34 }
 0x51f   : > { %v2037_v60 = vsel %vm2035_vm15, %v2025_v28, 2102212464  ;;  %v2040_v61 = vsel %vm2032_vm14, %v2019_v43, %v2022_v27  ;;  %v2044_v17 = vsel %vm2032_vm14, %v2022_v27, %v2025_v28  ;;  %v2041_v63 = vsel %vm2035_vm15, %v2028_v19, 920167782 }
 0x520   : > { %v2045_v0 = vsel %vm2035_vm15, %v2031_v59, 1326507024  ;;  %v2042_v3 = vsel %vm2034_vm0, %v2025_v28, %v2041_v63  ;;  %v2036_v4 = vsel %vm2032_vm14, %v2016_v62, %v2019_v43  ;;  %v2038_v6 = vsel %vm2034_vm0, %v2022_v27, %v2037_v60  ;;  %3568 = vmatpush3.bf16.msra.mxu0 %v3567_v49 }
 0x521   : > { %v2046_v5 = vsel %vm2034_vm0, %v2028_v19, %v2045_v0  ;;  %v2043_v10 = vsel %vm2033_vm1, %v2040_v61, %v2042_v3  ;;  %v2039_v20 = vsel %vm2033_vm1, %v2036_v4, %v2038_v6  ;;  %3572 = vmatprep.subr.bf16.mxu0 %v4129_v2 }
 0x522   : > { %v2047_v11 = vsel %vm2033_vm1, %v2044_v17, %v2046_v5  ;;  %v4684_v13 = vmul.u32.u64.low %v2048_v1, %v2043_v10  ;;  %v4685_v14 = vmul.u32.u64.high %v2048_v1, %v2043_v10, %v4684_v13  ;;  %v2055_v9 = vmul.u32 %v2048_v1, %v2039_v20  ;;  %v3402_v10 = vld [vmem:[%s5032_s10] ss:$0 sm:$0xff]  ;;  %s5043_s10 = sld [smem:[#allocation41_spill]] }
 0x523   : > { %v4681_v12 = vmul.u32.u64.low %v2048_v1, %v2047_v11  ;;  %v4682_v42 = vmul.u32.u64.high %v2048_v1, %v2047_v11, %v4681_v12  ;;  %v3401_v1 = vld [vmem:[%s4207_s30] ss:$0 sm:$0xff] }
 0x524   : > { %v2058_v16 = vadd.s32 1, %v4685_v14 }
 0x525   : > { %vm2057_vm3 = vc.u32 %v4682_v42, %v4684_v13  ;;  %v2056_v41 = vadd.s32 %v4684_v13, %v4682_v42 }
 0x526   : > { %v2059_v21 = vsel %vm2057_vm3, %v2058_v16, %v4685_v14 }
 0x527   : > { %v2060_v22 = vadd.s32 %v2059_v21, %v2055_v9 }
 0x529   : > { %v2061_v23 = vadd.s32 536870912, %v2060_v22 }
 0x52b   : > { %v2062_v26 = vshrl.u32 %v2061_v23, 30 }
 0x52d   : > { %v2063_v29 = vshll.u32 %v2062_v26, 30  ;;  %v2086_v56 = vsub.s32 4, %v2062_v26 }
 0x52f   : > { %v2064_v30 = vsub.s32 %v2060_v22, %v2063_v29  ;;  %v2087_v27 = vsel %vm2002_vm5, %v2086_v56, %v2062_v26 }
 0x530   : > { %v2089_v19 = vsel %vm2001_vm7, 0, %v2087_v27 }
 0x531   : > { %v2066_v31 = vsub.s32 0, %v2064_v30  ;;  %v2093_v59 = vadd.s32 3, %v2089_v19 }
 0x533   : > { %v3398_v33 = vmin.u32 %v2066_v31, %v2064_v30  ;;  %v2094_v60 = vand.u32 3, %v2093_v59 }
 0x535   : > { %v2068_v8 = vclz %v3398_v33  ;;  %vm2099_vm9 = vcmp.eq.s32.totalorder %v2094_v60, 2  ;;  %vm2096_vm10 = vcmp.eq.s32.totalorder %v2094_v60, 0  ;;  %vm2095_vm11 = vcmp.lt.s32.totalorder %v2094_v60, 2 }
 0x537   : > { %v3399_v24 = vadd.s32 4294967294, %v2068_v8 }
 0x539   : > { %vm3400_vm4 = vcmp.lt.s32.totalorder %v3399_v24, 0 }
 0x53a   : > { %v2071_v35 = vsel %vm3400_vm4, 0, %v3399_v24 }
 0x53b   : > { %v2072_v45 = vsub.s32 32, %v2071_v35  ;;  %v2076_v47 = vsub.s32 4294967266, %v2071_v35  ;;  %v2073_v51 = vshll.u32 %v2064_v30, %v2071_v35 }
 0x53d   : > { %v2074_v52 = vshrl.u32 %v2056_v41, %v2072_v45  ;;  %v2077_v18 = vadd.s32 127, %v2076_v47 }
 0x53f   : > { %v2075_v53 = vor.u32 %v2074_v52, %v2073_v51  ;;  %v2078_v38 = vshll.u32 %v2077_v18, 23 }
 0x541   : > { %v2079_v37 = vor.u32 4788187, %v2078_v38  ;;  %v2082_v15 = vcvt.s32.f32 %v2075_v53 }
 0x543   : > { %v2080_v54 = vand.u32 2147483647, %v2079_v37 }
 0x545   : > { %v2083_v55 = vmul.f32 %v2082_v15, %v2080_v54 }
 0x547   : > { %v2084_v58 = vxor.u32 2147483648, %v2083_v55 }
 0x549   : > { %v2085_v43 = vsel %vm2002_vm5, %v2084_v58, %v2083_v55 }
 0x54a   : > { %v2088_v28 = vsel %vm2001_vm7, %v4664_v25, %v2085_v43 }
 0x54b   : > { %3784 = vcosq.f32 %v2088_v28 }
 0x54c   : > { %3786 = vsinq.f32 %v2088_v28 }
 0x555   : > { %v3785_v61 = vpop.eup %3784 }
 0x556   : > { %v3787_v17 = vpop.eup %3786  ;;  %v2100_v62 = vxor.u32 2147483648, %v3785_v61 }
 0x557   : > { %v2097_v63 = vxor.u32 2147483648, %v3787_v17 }
 0x558   : > { %v2101_v0 = vsel %vm2099_vm9, %v2100_v62, %v3787_v17 }
 0x559   : > { %v2098_v36 = vsel %vm2096_vm10, %v3785_v61, %v2097_v63 }
 0x55a   : > { %v2102_v3 = vsel %vm2095_vm11, %v2098_v36, %v2101_v0 }
 0x55b   : > { %v2103_v5 = vsel %vm2092_vm12, nan, %v2102_v3 }
 0x55c   : > { %v2105_v4 = vmul.f32 %v2103_v5, %v2103_v5 }
 0x55e   : > { %v2112_v6 = vmul.f32 %v3401_v1, %v2105_v4 }
 0x560   : > { %v4702_v11 = vadd.f32 %v2112_v6, %v4661_v32 }
 0x562   : > { %v4705_v12 = vmul.f32 %v3402_v10, %v4702_v11 }
 0x564   : > { %v2125_v42 = vand.u32 2139095040, %v4705_v12  ;;  %v2122_v16 = vand.u32 2147483647, %v4705_v12  ;;  %vm2124_vm5 = vcmp.lt.s32.totalorder %v4705_v12, 0  ;;  %vm2214_vm12 = vweird.f32 %v4705_v12 }
 0x566   : > { %v2126_v13 = vshrl.u32 %v2125_v42, 23  ;;  %v2129_v21 = vand.u32 8388607, %v2122_v16  ;;  %vm2123_vm7 = vcmp.le.f32.partialorder %v2122_v16, 0.7853982 }
 0x568   : > { %v3403_v14 = vadd.s32 4294967169, %v2126_v13  ;;  %v2130_v39 = vor.u32 8388608, %v2129_v21 }
 0x56a   : > { %v2132_v20 = vadd.s32 1, %v3403_v14  ;;  %v2170_v56 = vshll.u32 %v2130_v39, 8 }
 0x56c   : > { %vm2133_vm13 = vcmp.gt.s32.totalorder %v2132_v20, 0 }
 0x56d   : > { %v2134_v25 = vsel %vm2133_vm13, %v2132_v20, 0  ;;  %vm2239_vm13 = vcmask 130048  }
 0x56e   : > { %v2136_v9 = vand.u32 31, %v2134_v25  ;;  %v2135_v23 = vshrl.u32 %v2134_v25, 5 }
 0x570   : > { %v2137_v22 = vsub.s32 32, %v2136_v9  ;;  %v2139_v32 = vshll.u32 %v4131_v40, %v2136_v9  ;;  %v2142_v26 = vshll.u32 %v4132_v44, %v2136_v9  ;;  %v2145_v31 = vshll.u32 %v4133_v46, %v2136_v9 }
 0x571   : > { %v2148_v8 = vshll.u32 %v4134_v48, %v2136_v9  ;;  %v2151_v35 = vshll.u32 %v4135_v50, %v2136_v9  ;;  %vm2154_vm14 = vcmp.lt.s32.totalorder %v2135_v23, 1  ;;  %vm2157_vm15 = vcmp.lt.s32.totalorder %v2135_v23, 4 }
 0x572   : > { %v2140_v29 = vshrl.u32 %v4132_v44, %v2137_v22  ;;  %v2143_v30 = vshrl.u32 %v4133_v46, %v2137_v22  ;;  %v2146_v33 = vshrl.u32 %v4134_v48, %v2137_v22  ;;  %v2149_v24 = vshrl.u32 %v4135_v50, %v2137_v22 }
 0x573   : > { %v2152_v34 = vshrl.u32 %v4136_v57, %v2137_v22  ;;  %v2138_v38 = vshrl.u32 %v4131_v40, %v2137_v22  ;;  %vm2156_vm0 = vcmp.lt.s32.totalorder %v2135_v23, 3  ;;  %vm2155_vm1 = vcmp.lt.s32.totalorder %v2135_v23, 2 }
 0x574   : > { %v2141_v41 = vor.u32 %v2140_v29, %v2139_v32  ;;  %v2144_v45 = vor.u32 %v2143_v30, %v2142_v26  ;;  %v2147_v47 = vor.u32 %v2146_v33, %v2145_v31  ;;  %v2150_v49 = vor.u32 %v2149_v24, %v2148_v8 }
 0x575   : > { %v2153_v51 = vor.u32 %v2152_v34, %v2151_v35 }
 0x576   : > { %v2159_v52 = vsel %vm2157_vm15, %v2147_v47, 2102212464  ;;  %v2162_v18 = vsel %vm2154_vm14, %v2141_v41, %v2144_v45  ;;  %v2166_v53 = vsel %vm2154_vm14, %v2144_v45, %v2147_v47  ;;  %v2163_v37 = vsel %vm2157_vm15, %v2150_v49, 920167782 }
 0x577   : > { %v2167_v54 = vsel %vm2157_vm15, %v2153_v51, 1326507024  ;;  %v2164_v15 = vsel %vm2156_vm0, %v2147_v47, %v2163_v37  ;;  %v2158_v58 = vsel %vm2154_vm14, %v2138_v38, %v2141_v41  ;;  %v2160_v43 = vsel %vm2156_vm0, %v2144_v45, %v2159_v52 }
 0x578   : > { %v2168_v55 = vsel %vm2156_vm0, %v2150_v49, %v2167_v54  ;;  %v2165_v27 = vsel %vm2155_vm1, %v2162_v18, %v2164_v15  ;;  %v2161_v17 = vsel %vm2155_vm1, %v2158_v58, %v2160_v43  ;;  %v3407_v54 = vld [vmem:[%s5033_s22] ss:$0 sm:$0xff]  ;;  %s5044_s22 = sld [smem:[#allocation36_spill]] }
 0x579   : > { %v2169_v28 = vsel %vm2155_vm1, %v2166_v53, %v2168_v55  ;;  %v4725_v60 = vmul.u32.u64.low %v2170_v56, %v2165_v27  ;;  %v4726_v61 = vmul.u32.u64.high %v2170_v56, %v2165_v27, %v4725_v60  ;;  %v2177_v63 = vmul.u32 %v2170_v56, %v2161_v17  ;;  %v3408_v58 = vld [vmem:[%s5034_s25] ss:$0 sm:$0xff]  ;;  %v3410_v27 = vld [vmem:[%s5034_s25 + $0x1] ss:$0 sm:$0xff] }
 0x57a   : > { %v4722_v19 = vmul.u32.u64.low %v2170_v56, %v2169_v28  ;;  %v4723_v59 = vmul.u32.u64.high %v2170_v56, %v2169_v28, %v4722_v19  ;;  %v3409_v43 = vld [vmem:[%s5035_s16] ss:$0 sm:$0xff]  ;;  %s5045_s16 = sld [smem:[#allocation37_spill]] }
 0x57b   : > { %v2180_v62 = vadd.s32 1, %v4726_v61 }
 0x57c   : > { %vm2179_vm3 = vc.u32 %v4723_v59, %v4725_v60  ;;  %v2178_v20 = vadd.s32 %v4725_v60, %v4723_v59  ;;  %v3411_v60 = vld [vmem:[%s5034_s25 + $0x2] ss:$0 sm:$0xff] }
 0x57d   : > { %v2181_v0 = vsel %vm2179_vm3, %v2180_v62, %v4726_v61 }
 0x57e   : > { %v2182_v36 = vadd.s32 %v2181_v0, %v2177_v63 }
 0x580   : > { %v2183_v3 = vadd.s32 536870912, %v2182_v36 }
 0x582   : > { %v2184_v5 = vshrl.u32 %v2183_v3, 30  ;;  %v2511_v3 = vld [vmem:[%s5036_s17 + $0x8] sm:$0xff] }
 0x584   : > { %v2185_v1 = vshll.u32 %v2184_v5, 30  ;;  %v2208_v8 = vsub.s32 4, %v2184_v5 }
 0x586   : > { %v2186_v4 = vsub.s32 %v2182_v36, %v2185_v1  ;;  %v2209_v34 = vsel %vm2124_vm5, %v2208_v8, %v2184_v5  ;;  %v2510_v36 = vld [vmem:[%s5036_s17] sm:$0xff] }
 0x587   : > { %v2211_v41 = vsel %vm2123_vm7, 0, %v2209_v34  ;;  %v3570_v5 = vpack.c.bf16 %v2511_v3, %v2510_v36  ;;  %v3412_v1 = vld [vmem:[%s5037_s2] ss:$0 sm:$0xff]  ;;  %s5046_s2 = sld [smem:[#allocation38_spill]] }
 0x588   : > { %v2188_v6 = vsub.s32 0, %v2186_v4  ;;  %v2215_v45 = vadd.s32 3, %v2211_v41 }
 0x589   : > { %3571 = vmatpush3.bf16.msra.mxu1 %v3570_v5 }
 0x58a   : > { %v3404_v10 = vmin.u32 %v2188_v6, %v2186_v4  ;;  %v2216_v47 = vand.u32 3, %v2215_v45  ;;  %3575 = vmatprep.subr.bf16.mxu1 %v4129_v2  ;;  %v3414_v6 = vld [vmem:[%s5038_s11] ss:$0 sm:$0xff]  ;;  %s5047_s11 = sld [smem:[#allocation39_spill]] }
 0x58c   : > { %v2190_v42 = vclz %v3404_v10  ;;  %vm2221_vm9 = vcmp.eq.s32.totalorder %v2216_v47, 2  ;;  %vm2218_vm10 = vcmp.eq.s32.totalorder %v2216_v47, 0  ;;  %vm2217_vm11 = vcmp.lt.s32.totalorder %v2216_v47, 2 }
 0x58e   : > { %v3405_v13 = vadd.s32 4294967294, %v2190_v42 }
 0x590   : > { %vm3406_vm4 = vcmp.lt.s32.totalorder %v3405_v13, 0 }
 0x591   : > { %v2193_v14 = vsel %vm3406_vm4, 0, %v3405_v13 }
 0x592   : > { %v2194_v25 = vsub.s32 32, %v2193_v14  ;;  %v2198_v9 = vsub.s32 4294967266, %v2193_v14  ;;  %v2195_v21 = vshll.u32 %v2186_v4, %v2193_v14 }
 0x594   : > { %v2196_v22 = vshrl.u32 %v2178_v20, %v2194_v25  ;;  %v2199_v23 = vadd.s32 127, %v2198_v9 }
 0x596   : > { %v2197_v32 = vor.u32 %v2196_v22, %v2195_v21  ;;  %v2200_v26 = vshll.u32 %v2199_v23, 23 }
 0x598   : > { %v2201_v29 = vor.u32 4788187, %v2200_v26  ;;  %v2204_v31 = vcvt.s32.f32 %v2197_v32 }
 0x59a   : > { %v2202_v30 = vand.u32 2147483647, %v2201_v29 }
 0x59c   : > { %v2205_v33 = vmul.f32 %v2204_v31, %v2202_v30 }
 0x59e   : > { %v2206_v24 = vxor.u32 2147483648, %v2205_v33 }
 0x5a0   : > { %v2207_v35 = vsel %vm2124_vm5, %v2206_v24, %v2205_v33 }
 0x5a1   : > { %v2210_v39 = vsel %vm2123_vm7, %v4705_v12, %v2207_v35 }
 0x5a2   : > { %3788 = vcosq.f32 %v2210_v39 }
 0x5a3   : > { %3790 = vsinq.f32 %v2210_v39 }
 0x5ac   : > { %v3789_v49 = vpop.eup %3788 }
 0x5ad   : > { %v3791_v51 = vpop.eup %3790  ;;  %v2222_v52 = vxor.u32 2147483648, %v3789_v49 }
 0x5ae   : > { %v2219_v18 = vxor.u32 2147483648, %v3791_v51 }
 0x5af   : > { %v2223_v16 = vsel %vm2221_vm9, %v2222_v52, %v3791_v51 }
 0x5b0   : > { %v2220_v53 = vsel %vm2218_vm10, %v3789_v49, %v2219_v18 }
 0x5b1   : > { %v2224_v38 = vsel %vm2217_vm11, %v2220_v53, %v2223_v16 }
 0x5b2   : > { %v2225_v37 = vsel %vm2214_vm12, nan, %v2224_v38 }
 0x5b3   : > { %v2227_v15 = vmul.f32 %v2225_v37, %v2225_v37 }
 0x5b5   : > { %v2234_v55 = vmul.f32 %v3407_v54, %v2227_v15 }
 0x5b7   : > { %v2235_v56 = vadd.f32 %v2234_v55, %v4702_v11 }
 0x5b9   : > { %2240 = vst.msk [vmem:[#allocation2 + $0x8] sm:$0xff] %vm2239_vm13, %v2235_v56 }
 0x5c0   : > { %v2241_v28 = vld [vmem:[#allocation2 + $0x7] sm:$0xff] }
 0x5c1   : > { %v2256_v19 = vld [vmem:[#allocation2 + $0x8] sm:$0xff]  ;;  %v2247_v12 = vmul.f32 %v3408_v58, %v2241_v28  ;;  %2476 = vst.msk [vmem:[#allocation2 + $0x7] sm:$0x1] %vm2236_vm8, %v4128_v7 }
 0x5c2   : > { %v2264_v59 = vld [vmem:[#allocation2 + $0x9] sm:$0xff]  ;;  %v2262_v17 = vmul.f32 %v3410_v27, %v2256_v19 }
 0x5c3   : > { %2477 = vst.msk [vmem:[#allocation2 + $0x10] sm:$0x1] %vm2236_vm8, %v4128_v7  ;;  %v2255_v61 = vadd.f32 %v3409_v43, %v2247_v12  ;;  %v2270_v63 = vmul.f32 %v3411_v60, %v2264_v59 }
 0x5c5   : > { %v2263_v62 = vadd.f32 %v2262_v17, %v2255_v61 }
 0x5c7   : > { %v2271_v0 = vadd.f32 %v2270_v63, %v2263_v62 }
 0x5c9   : > { %3520 = vmatmul.mubr.msk.f32.vlgmr.msra.gmra.mrb[4].mxu0 %vm2239_vm13, %v2271_v0 }
 0x5ca   : > { %3533 = vmatprep.mubr.msk.f32.mxu0 %vm4130_vm6, %v4128_v7 }
 0x69c   : > { %v2350_v4 = vpop.f32.mrb[4].mxu0 }
 0x69d   : > { %v4756_v10 = vadd.f32 %v3412_v1, %v2350_v4  ;;  %v3521_v42 = vpop.f32.mrb[5].mxu0 }
 0x69f   : > { %v4759_v13 = vmul.f32 %v3414_v6, %v4756_v10 }
 0x6a1   : > { %v2365_v14 = vand.u32 2139095040, %v4759_v13  ;;  %v2362_v21 = vand.u32 2147483647, %v4759_v13  ;;  %vm2364_vm7 = vcmp.lt.s32.totalorder %v4759_v13, 0 }
 0x6a3   : > { %v2366_v20 = vshrl.u32 %v2365_v14, 23  ;;  %v2369_v32 = vand.u32 8388607, %v2362_v21  ;;  %vm2363_vm9 = vcmp.le.f32.partialorder %v2362_v21, 0.7853982 }
 0x6a5   : > { %v3415_v25 = vadd.s32 4294967169, %v2366_v20  ;;  %v2370_v47 = vor.u32 8388608, %v2369_v32 }
 0x6a7   : > { %v2372_v9 = vadd.s32 1, %v3415_v25  ;;  %v2410_v43 = vshll.u32 %v2370_v47, 8 }
 0x6a9   : > { %vm2373_vm14 = vcmp.gt.s32.totalorder %v2372_v9, 0 }
 0x6aa   : > { %v2374_v22 = vsel %vm2373_vm14, %v2372_v9, 0  ;;  %vm2454_vm14 = vweird.f32 %v4759_v13 }
 0x6ab   : > { %v2376_v23 = vand.u32 31, %v2374_v22  ;;  %v2375_v29 = vshrl.u32 %v2374_v22, 5 }
 0x6ad   : > { %v2377_v26 = vsub.s32 32, %v2376_v23  ;;  %v2379_v30 = vshll.u32 %v4131_v40, %v2376_v23  ;;  %v2382_v31 = vshll.u32 %v4132_v44, %v2376_v23  ;;  %v2385_v24 = vshll.u32 %v4133_v46, %v2376_v23 }
 0x6ae   : > { %v2388_v34 = vshll.u32 %v4134_v48, %v2376_v23  ;;  %v2391_v41 = vshll.u32 %v4135_v50, %v2376_v23  ;;  %vm2394_vm15 = vcmp.lt.s32.totalorder %v2375_v29, 1  ;;  %vm2397_vm0 = vcmp.lt.s32.totalorder %v2375_v29, 4 }
 0x6af   : > { %v2380_v33 = vshrl.u32 %v4132_v44, %v2377_v26  ;;  %v2383_v8 = vshrl.u32 %v4133_v46, %v2377_v26  ;;  %v2386_v35 = vshrl.u32 %v4134_v48, %v2377_v26  ;;  %v2389_v39 = vshrl.u32 %v4135_v50, %v2377_v26 }
 0x6b0   : > { %v2392_v45 = vshrl.u32 %v4136_v57, %v2377_v26  ;;  %v2378_v54 = vshrl.u32 %v4131_v40, %v2377_v26  ;;  %vm2396_vm1 = vcmp.lt.s32.totalorder %v2375_v29, 3  ;;  %vm2395_vm3 = vcmp.lt.s32.totalorder %v2375_v29, 2 }
 0x6b1   : > { %v2381_v49 = vor.u32 %v2380_v33, %v2379_v30  ;;  %v2384_v51 = vor.u32 %v2383_v8, %v2382_v31  ;;  %v2387_v52 = vor.u32 %v2386_v35, %v2385_v24  ;;  %v2390_v18 = vor.u32 %v2389_v39, %v2388_v34 }
 0x6b2   : > { %v2393_v16 = vor.u32 %v2392_v45, %v2391_v41 }
 0x6b3   : > { %v2399_v53 = vsel %vm2397_vm0, %v2387_v52, 2102212464  ;;  %v2402_v38 = vsel %vm2394_vm15, %v2381_v49, %v2384_v51  ;;  %v2406_v37 = vsel %vm2394_vm15, %v2384_v51, %v2387_v52  ;;  %v2403_v15 = vsel %vm2397_vm0, %v2390_v18, 920167782 }
 0x6b4   : > { %v2407_v55 = vsel %vm2397_vm0, %v2393_v16, 1326507024  ;;  %v2404_v56 = vsel %vm2396_vm1, %v2387_v52, %v2403_v15  ;;  %v2398_v27 = vsel %vm2394_vm15, %v2378_v54, %v2381_v49  ;;  %v2400_v28 = vsel %vm2396_vm1, %v2384_v51, %v2399_v53 }
 0x6b5   : > { %v2408_v58 = vsel %vm2396_vm1, %v2390_v18, %v2407_v55  ;;  %v2405_v19 = vsel %vm2395_vm3, %v2402_v38, %v2404_v56  ;;  %v2401_v62 = vsel %vm2395_vm3, %v2398_v27, %v2400_v28  ;;  %v3419_v56 = vld [vmem:[%s5039_s7] ss:$0 sm:$0xff]  ;;  %s5048_s7 = sld [smem:[#allocation40_spill]] }
 0x6b6   : > { %v2409_v59 = vsel %vm2395_vm3, %v2406_v37, %v2408_v58  ;;  %v4779_v61 = vmul.u32.u64.low %v2410_v43, %v2405_v19  ;;  %v4780_v17 = vmul.u32.u64.high %v2410_v43, %v2405_v19, %v4779_v61  ;;  %v2417_v0 = vmul.u32 %v2410_v43, %v2401_v62  ;;  %v3420_v28 = vld [vmem:[%s5040_s26] ss:$0 sm:$0xff]  ;;  %s5049_s26 = sld [smem:[#allocation47_spill]] }
 0x6b7   : > { %v4776_v12 = vmul.u32.u64.low %v2410_v43, %v2409_v59  ;;  %v4777_v60 = vmul.u32.u64.high %v2410_v43, %v2409_v59, %v4776_v12  ;;  %v3421_v19 = vld [vmem:[%s5042_s1] ss:$0 sm:$0xff]  ;;  %v3422_v59 = vld [vmem:[%s5041_s18 + $0x1] ss:$0 sm:$0xff] }
 0x6b8   : > { %v2420_v63 = vadd.s32 1, %v4780_v17 }
 0x6b9   : > { %vm2419_vm4 = vc.u32 %v4777_v60, %v4779_v61  ;;  %v2418_v22 = vadd.s32 %v4779_v61, %v4777_v60 }
 0x6ba   : > { %v2421_v36 = vsel %vm2419_vm4, %v2420_v63, %v4780_v17  ;;  %v3423_v17 = vld [vmem:[%s5041_s18 + $0x2] ss:$0 sm:$0xff] }
 0x6bb   : > { %v2422_v3 = vadd.s32 %v2421_v36, %v2417_v0 }
 0x6bc   : > { %s5050_s1 = smov %s5049_s26 }
 0x6bd   : > { %v2423_v5 = vadd.s32 536870912, %v2422_v3 }
 0x6bf   : > { %v2424_v1 = vshrl.u32 %v2423_v5, 30  ;;  %v2750_v5 = vld [vmem:[%s5043_s10 + $0x8] sm:$0xff] }
 0x6c1   : > { %v2425_v4 = vshll.u32 %v2424_v1, 30  ;;  %v2448_v39 = vsub.s32 4, %v2424_v1 }
 0x6c3   : > { %v2426_v6 = vsub.s32 %v2422_v3, %v2425_v4  ;;  %v2449_v47 = vsel %vm2364_vm7, %v2448_v39, %v2424_v1  ;;  %v2749_v3 = vld [vmem:[%s5043_s10] sm:$0xff] }
 0x6c4   : > { %v2451_v51 = vsel %vm2363_vm9, 0, %v2449_v47  ;;  %v3573_v1 = vpack.c.bf16 %v2750_v5, %v2749_v3  ;;  %v3424_v4 = vld [vmem:[%s5044_s22] ss:$0 sm:$0xff]  ;;  %s5051_s22 = sld [smem:[#allocation42_spill]] }
 0x6c5   : > { %v2428_v42 = vsub.s32 0, %v2426_v6  ;;  %v2455_v52 = vadd.s32 3, %v2451_v51 }
 0x6c6   : > { %3574 = vmatpush3.bf16.msra.mxu0 %v3573_v1 }
 0x6c7   : > { %v3416_v14 = vmin.u32 %v2428_v42, %v2426_v6  ;;  %v2456_v18 = vand.u32 3, %v2455_v52 }
 0x6c9   : > { %v2430_v20 = vclz %v3416_v14  ;;  %vm2461_vm10 = vcmp.eq.s32.totalorder %v2456_v18, 2  ;;  %vm2458_vm11 = vcmp.eq.s32.totalorder %v2456_v18, 0  ;;  %vm2457_vm12 = vcmp.lt.s32.totalorder %v2456_v18, 2 }
 0x6cb   : > { %v3417_v25 = vadd.s32 4294967294, %v2430_v20  ;;  %v3426_v20 = vld [vmem:[%s5045_s16] ss:$0 sm:$0xff]  ;;  %s5052_s16 = sld [smem:[#allocation43_spill]] }
 0x6cd   : > { %vm3418_vm5 = vcmp.lt.s32.totalorder %v3417_v25, 0 }
 0x6ce   : > { %v2433_v9 = vsel %vm3418_vm5, 0, %v3417_v25 }
 0x6cf   : > { %v2434_v23 = vsub.s32 32, %v2433_v9  ;;  %v2438_v32 = vsub.s32 4294967266, %v2433_v9  ;;  %v2435_v26 = vshll.u32 %v2426_v6, %v2433_v9 }
 0x6d1   : > { %v2436_v29 = vshrl.u32 %v2418_v22, %v2434_v23  ;;  %v2439_v30 = vadd.s32 127, %v2438_v32 }
 0x6d3   : > { %v2437_v31 = vor.u32 %v2436_v29, %v2435_v26  ;;  %v2440_v33 = vshll.u32 %v2439_v30, 23 }
 0x6d5   : > { %v2441_v8 = vor.u32 4788187, %v2440_v33  ;;  %v2444_v35 = vcvt.s32.f32 %v2437_v31 }
 0x6d7   : > { %v2442_v24 = vand.u32 2147483647, %v2441_v8 }
 0x6d9   : > { %v2445_v34 = vmul.f32 %v2444_v35, %v2442_v24 }
 0x6db   : > { %v2446_v41 = vxor.u32 2147483648, %v2445_v34 }
 0x6dd   : > { %v2447_v45 = vsel %vm2364_vm7, %v2446_v41, %v2445_v34 }
 0x6de   : > { %v2450_v49 = vsel %vm2363_vm9, %v4759_v13, %v2447_v45 }
 0x6df   : > { %3792 = vcosq.f32 %v2450_v49 }
 0x6e0   : > { %3794 = vsinq.f32 %v2450_v49 }
 0x6e9   : > { %v3793_v16 = vpop.eup %3792 }
 0x6ea   : > { %v3795_v53 = vpop.eup %3794  ;;  %v2462_v38 = vxor.u32 2147483648, %v3793_v16 }
 0x6eb   : > { %v2459_v37 = vxor.u32 2147483648, %v3795_v53 }
 0x6ec   : > { %v2463_v21 = vsel %vm2461_vm10, %v2462_v38, %v3795_v53 }
 0x6ed   : > { %v2460_v54 = vsel %vm2458_vm11, %v3793_v16, %v2459_v37 }
 0x6ee   : > { %v2464_v15 = vsel %vm2457_vm12, %v2460_v54, %v2463_v21 }
 0x6ef   : > { %v2465_v55 = vsel %vm2454_vm14, nan, %v2464_v15 }
 0x6f0   : > { %v2467_v58 = vmul.f32 %v2465_v55, %v2465_v55 }
 0x6f2   : > { %v2474_v43 = vmul.f32 %v3419_v56, %v2467_v58 }
 0x6f4   : > { %v2475_v27 = vadd.f32 %v2474_v43, %v4756_v10 }
 0x6f6   : > { %2478 = vst.msk [vmem:[#allocation2 + $0x8] sm:$0xff] %vm2239_vm13, %v2475_v27 }
 0x6fd   : > { %v2479_v12 = vld [vmem:[#allocation2 + $0x7] sm:$0xff] }
 0x6fe   : > { %v2494_v60 = vld [vmem:[#allocation2 + $0x8] sm:$0xff]  ;;  %v2485_v13 = vmul.f32 %v3420_v28, %v2479_v12  ;;  %2715 = vst.msk [vmem:[#allocation2 + $0x7] sm:$0x1] %vm2236_vm8, %v4128_v7 }
 0x6ff   : > { %v2502_v61 = vld [vmem:[#allocation2 + $0x9] sm:$0xff]  ;;  %v2500_v62 = vmul.f32 %v3422_v59, %v2494_v60 }
 0x700   : > { %2716 = vst.msk [vmem:[#allocation2 + $0x10] sm:$0x1] %vm2236_vm8, %v4128_v7  ;;  %v2493_v10 = vadd.f32 %v3421_v19, %v2485_v13  ;;  %v2508_v0 = vmul.f32 %v3423_v17, %v2502_v61 }
 0x702   : > { %v2501_v63 = vadd.f32 %v2500_v62, %v2493_v10 }
 0x704   : > { %v2509_v36 = vadd.f32 %v2508_v0, %v2501_v63 }
 0x706   : > { %3527 = vmatmul.mubr.msk.f32.vlgmr.msra.gmra.mrb[4].mxu1 %vm2239_vm13, %v2509_v36 }
 0x707   : > { %3544 = vmatprep.mubr.msk.f32.mxu1 %vm4130_vm6, %v4128_v7 }
 0x7d9   : > { %v2588_v6 = vpop.f32.mrb[4].mxu1 }
 0x7da   : > { %v2589_v42 = vadd.f32 %v3424_v4, %v2588_v6  ;;  %v3528_v14 = vpop.f32.mrb[5].mxu1 }
 0x7dc   : > { %v4810_v25 = vadd.f32 %v2589_v42, %v4702_v11 }
 0x7de   : > { %v4813_v9 = vmul.f32 %v3426_v20, %v4810_v25 }
 0x7e0   : > { %v2604_v22 = vand.u32 2139095040, %v4813_v9  ;;  %v2601_v29 = vand.u32 2147483647, %v4813_v9  ;;  %vm2603_vm7 = vcmp.lt.s32.totalorder %v4813_v9, 0  ;;  %vm2693_vm14 = vweird.f32 %v4813_v9 }
 0x7e2   : > { %v2605_v23 = vshrl.u32 %v2604_v22, 23  ;;  %v2608_v33 = vand.u32 8388607, %v2601_v29  ;;  %vm2602_vm9 = vcmp.le.f32.partialorder %v2601_v29, 0.7853982 }
 0x7e4   : > { %v3427_v32 = vadd.s32 4294967169, %v2605_v23  ;;  %v2609_v18 = vor.u32 8388608, %v2608_v33 }
 0x7e6   : > { %v2611_v26 = vadd.s32 1, %v3427_v32  ;;  %v2649_v19 = vshll.u32 %v2609_v18, 8 }
 0x7e8   : > { %vm2612_vm8 = vcmp.gt.s32.totalorder %v2611_v26, 0 }
 0x7e9   : > { %v2613_v30 = vsel %vm2612_vm8, %v2611_v26, 0  ;;  %vm2953_vm8 = vcmask 253952  }
 0x7ea   : > { %v2615_v31 = vand.u32 31, %v2613_v30  ;;  %v2614_v24 = vshrl.u32 %v2613_v30, 5 }
 0x7ec   : > { %v2616_v8 = vsub.s32 32, %v2615_v31  ;;  %v2618_v11 = vshll.u32 %v4131_v40, %v2615_v31  ;;  %v2621_v35 = vshll.u32 %v4132_v44, %v2615_v31  ;;  %v2624_v41 = vshll.u32 %v4133_v46, %v2615_v31 }
 0x7ed   : > { %v2627_v47 = vshll.u32 %v4134_v48, %v2615_v31  ;;  %v2630_v51 = vshll.u32 %v4135_v50, %v2615_v31  ;;  %vm2633_vm15 = vcmp.lt.s32.totalorder %v2614_v24, 1  ;;  %vm2636_vm0 = vcmp.lt.s32.totalorder %v2614_v24, 4 }
 0x7ee   : > { %v2619_v34 = vshrl.u32 %v4132_v44, %v2616_v8  ;;  %v2622_v39 = vshrl.u32 %v4133_v46, %v2616_v8  ;;  %v2625_v45 = vshrl.u32 %v4134_v48, %v2616_v8  ;;  %v2628_v49 = vshrl.u32 %v4135_v50, %v2616_v8 }
 0x7ef   : > { %v2631_v52 = vshrl.u32 %v4136_v57, %v2616_v8  ;;  %v2617_v56 = vshrl.u32 %v4131_v40, %v2616_v8  ;;  %vm2635_vm1 = vcmp.lt.s32.totalorder %v2614_v24, 3  ;;  %vm2634_vm3 = vcmp.lt.s32.totalorder %v2614_v24, 2 }
 0x7f0   : > { %v2620_v16 = vor.u32 %v2619_v34, %v2618_v11  ;;  %v2623_v53 = vor.u32 %v2622_v39, %v2621_v35  ;;  %v2626_v38 = vor.u32 %v2625_v45, %v2624_v41  ;;  %v2629_v37 = vor.u32 %v2628_v49, %v2627_v47 }
 0x7f1   : > { %v2632_v21 = vor.u32 %v2631_v52, %v2630_v51 }
 0x7f2   : > { %v2638_v54 = vsel %vm2636_vm0, %v2626_v38, 2102212464  ;;  %v2641_v15 = vsel %vm2633_vm15, %v2620_v16, %v2623_v53  ;;  %v2645_v55 = vsel %vm2633_vm15, %v2623_v53, %v2626_v38  ;;  %v2642_v58 = vsel %vm2636_vm0, %v2629_v37, 920167782 }
 0x7f3   : > { %v2646_v43 = vsel %vm2636_vm0, %v2632_v21, 1326507024  ;;  %v2643_v27 = vsel %vm2635_vm1, %v2626_v38, %v2642_v58  ;;  %v2637_v59 = vsel %vm2633_vm15, %v2617_v56, %v2620_v16  ;;  %v2639_v12 = vsel %vm2635_vm1, %v2623_v53, %v2638_v54 }
 0x7f4   : > { %v2647_v28 = vsel %vm2635_vm1, %v2629_v37, %v2646_v43  ;;  %v2644_v60 = vsel %vm2634_vm3, %v2641_v15, %v2643_v27  ;;  %v2640_v63 = vsel %vm2634_vm3, %v2637_v59, %v2639_v12  ;;  %v3431_v43 = vld [vmem:[%s5046_s2] ss:$0 sm:$0xff]  ;;  %s5053_s2 = sld [smem:[#allocation44_spill]] }
 0x7f5   : > { %v2648_v61 = vsel %vm2634_vm3, %v2645_v55, %v2647_v28  ;;  %v4833_v10 = vmul.u32.u64.low %v2649_v19, %v2644_v60  ;;  %v4834_v62 = vmul.u32.u64.high %v2649_v19, %v2644_v60, %v4833_v10  ;;  %v2656_v36 = vmul.u32 %v2649_v19, %v2640_v63  ;;  %v3432_v59 = vld [vmem:[%s5047_s11] ss:$0 sm:$0xff]  ;;  %v3434_v60 = vld [vmem:[%s5047_s11 + $0x1] ss:$0 sm:$0xff] }
 0x7f6   : > { %v4830_v13 = vmul.u32.u64.low %v2649_v19, %v2648_v61  ;;  %v4831_v17 = vmul.u32.u64.high %v2649_v19, %v2648_v61, %v4830_v13  ;;  %v3433_v12 = vld [vmem:[%s5048_s7] ss:$0 sm:$0xff]  ;;  %s5054_s7 = sld [smem:[#allocation45_spill]] }
 0x7f7   : > { %v2659_v0 = vadd.s32 1, %v4834_v62 }
 0x7f8   : > { %vm2658_vm4 = vc.u32 %v4831_v17, %v4833_v10  ;;  %v2657_v26 = vadd.s32 %v4833_v10, %v4831_v17  ;;  %v3435_v10 = vld [vmem:[%s5047_s11 + $0x2] ss:$0 sm:$0xff] }
 0x7f9   : > { %v2660_v3 = vsel %vm2658_vm4, %v2659_v0, %v4834_v62 }
 0x7fa   : > { %v2661_v5 = vadd.s32 %v2660_v3, %v2656_v36 }
 0x7fc   : > { %v2662_v1 = vadd.s32 536870912, %v2661_v5 }
 0x7fe   : > { %v2663_v4 = vshrl.u32 %v2662_v1, 30  ;;  %v2989_v1 = vld [vmem:[%s5050_s1 + $0x8] sm:$0xff] }
 0x800   : > { %v2664_v6 = vshll.u32 %v2663_v4, 30  ;;  %v2687_v47 = vsub.s32 4, %v2663_v4 }
 0x802   : > { %v2665_v42 = vsub.s32 %v2661_v5, %v2664_v6  ;;  %v2688_v52 = vsel %vm2603_vm7, %v2687_v47, %v2663_v4  ;;  %v2988_v5 = vld [vmem:[%s5049_s26] sm:$0xff]  ;;  %v2990_v4 = vld [vmem:[%s5050_s1 + $0x10] sm:$0xff]  ;;  %s5055_s26 = sld [smem:[#allocation46_spill]] }
 0x803   : > { %v2690_v16 = vsel %vm2602_vm9, 0, %v2688_v52  ;;  %v3576_v6 = vpack.c.bf16 %v2989_v1, %v2988_v5 }
 0x804   : > { %v2667_v14 = vsub.s32 0, %v2665_v42  ;;  %v2694_v53 = vadd.s32 3, %v2690_v16 }
 0x805   : > { %3577 = vmatpush3.bf16.msra.mxu1 %v3576_v6 }
 0x806   : > { %v3428_v20 = vmin.u32 %v2667_v14, %v2665_v42  ;;  %v2695_v38 = vand.u32 3, %v2694_v53  ;;  %3578 = vmatprep.subr.bf16.mxu1 %v4129_v2 }
 0x808   : > { %v2669_v22 = vclz %v3428_v20  ;;  %vm2700_vm10 = vcmp.eq.s32.totalorder %v2695_v38, 2  ;;  %vm2697_vm11 = vcmp.eq.s32.totalorder %v2695_v38, 0  ;;  %vm2696_vm12 = vcmp.lt.s32.totalorder %v2695_v38, 2  ;;  %v3436_v20 = vld [vmem:[%s5051_s22] ss:$0 sm:$0xff]  ;;  %s1261_s22 = sand.u32 1, %s4072_s23  }
 0x809   : > { %s3164_s4 = scalar_lea.sflag [#allocation5], %s1261_s22 }
 0x80a   : > { %v3429_v23 = vadd.s32 4294967294, %v2669_v22 }
 0x80c   : > { %vm3430_vm5 = vcmp.lt.s32.totalorder %v3429_v23, 0 }
 0x80d   : > { %v2672_v32 = vsel %vm3430_vm5, 0, %v3429_v23  ;;  %v3438_v23 = vld [vmem:[%s5052_s16] ss:$0 sm:$0xff]  ;;  %s3362_s16 = sshll.u32 %s1261_s22, 3 }
 0x80e   : > { %v2673_v30 = vsub.s32 32, %v2672_v32  ;;  %v2677_v31 = vsub.s32 4294967266, %v2672_v32  ;;  %v2674_v33 = vshll.u32 %v2665_v42, %v2672_v32  ;;  %v2991_v42 = vld [vmem:[%s5050_s1 + $0x18] sm:$0xff] }
 0x80f   : > { %v3579_v14 = vpack.c.bf16 %v2991_v42, %v2990_v4 }
 0x810   : > { %v2675_v8 = vshrl.u32 %v2657_v26, %v2673_v30  ;;  %v2678_v24 = vadd.s32 127, %v2677_v31 }
 0x811   : > { %3580 = vmatpush3.bf16.msra.mxu1 %v3579_v14 }
 0x812   : > { %v2676_v11 = vor.u32 %v2675_v8, %v2674_v33  ;;  %v2679_v35 = vshll.u32 %v2678_v24, 23  ;;  %3581 = vmatprep.subr.bf16.mxu1 %v4129_v2 }
 0x814   : > { %v2680_v34 = vor.u32 4788187, %v2679_v35  ;;  %v2683_v41 = vcvt.s32.f32 %v2676_v11 }
 0x816   : > { %v2681_v39 = vand.u32 2147483647, %v2680_v34 }
 0x818   : > { %v2684_v45 = vmul.f32 %v2683_v41, %v2681_v39 }
 0x81a   : > { %v2685_v49 = vxor.u32 2147483648, %v2684_v45 }
 0x81c   : > { %v2686_v51 = vsel %vm2603_vm7, %v2685_v49, %v2684_v45 }
 0x81d   : > { %v2689_v18 = vsel %vm2602_vm9, %v4813_v9, %v2686_v51 }
 0x81e   : > { %3796 = vcosq.f32 %v2689_v18 }
 0x81f   : > { %3798 = vsinq.f32 %v2689_v18 }
 0x828   : > { %v3797_v37 = vpop.eup %3796 }
 0x829   : > { %v3799_v21 = vpop.eup %3798  ;;  %v2701_v54 = vxor.u32 2147483648, %v3797_v37 }
 0x82a   : > { %v2698_v15 = vxor.u32 2147483648, %v3799_v21 }
 0x82b   : > { %v2702_v29 = vsel %vm2700_vm10, %v2701_v54, %v3799_v21 }
 0x82c   : > { %v2699_v55 = vsel %vm2697_vm11, %v3797_v37, %v2698_v15 }
 0x82d   : > { %v2703_v56 = vsel %vm2696_vm12, %v2699_v55, %v2702_v29 }
 0x82e   : > { %v2704_v58 = vsel %vm2693_vm14, nan, %v2703_v56 }
 0x82f   : > { %v2706_v27 = vmul.f32 %v2704_v58, %v2704_v58 }
 0x831   : > { %v2713_v28 = vmul.f32 %v3431_v43, %v2706_v27 }
 0x833   : > { %v2714_v19 = vadd.f32 %v2713_v28, %v4810_v25 }
 0x835   : > { %2717 = vst.msk [vmem:[#allocation2 + $0x8] sm:$0xff] %vm2239_vm13, %v2714_v19 }
 0x83c   : > { %v2718_v61 = vld [vmem:[#allocation2 + $0x7] sm:$0xff] }
 0x83d   : > { %v2733_v13 = vld [vmem:[#allocation2 + $0x8] sm:$0xff]  ;;  %v2724_v17 = vmul.f32 %v3432_v59, %v2718_v61  ;;  %2954 = vst.msk [vmem:[#allocation2 + $0x7] sm:$0x1] %vm2953_vm8, %v4128_v7 }
 0x83e   : > { %v2741_v9 = vld [vmem:[#allocation2 + $0x9] sm:$0xff]  ;;  %v2739_v63 = vmul.f32 %v3434_v60, %v2733_v13 }
 0x83f   : > { %2955 = vst.msk [vmem:[#allocation2 + $0x10] sm:$0x1] %vm2953_vm8, %v4128_v7  ;;  %v2732_v62 = vadd.f32 %v3433_v12, %v2724_v17  ;;  %v2747_v36 = vmul.f32 %v3435_v10, %v2741_v9 }
 0x841   : > { %v2740_v0 = vadd.f32 %v2739_v63, %v2732_v62 }
 0x843   : > { %v2748_v3 = vadd.f32 %v2747_v36, %v2740_v0 }
 0x845   : > { %3534 = vmatmul.mubr.msk.f32.vlgmr.msra.gmra.mrb[6].mxu0 %vm2239_vm13, %v2748_v3 }
 0x918   : > { %v2827_v22 = vpop.f32.mrb[6].mxu0 }
 0x919   : > { %v4863_v32 = vadd.f32 %v3436_v20, %v2827_v22  ;;  %v3535_v26 = vpop.f32.mrb[7].mxu0 }
 0x91b   : > { %v4866_v30 = vmul.f32 %v3438_v23, %v4863_v32 }
 0x91d   : > { %v2842_v31 = vand.u32 2139095040, %v4866_v30  ;;  %v2839_v11 = vand.u32 2147483647, %v4866_v30  ;;  %vm2841_vm9 = vcmp.lt.s32.totalorder %v4866_v30, 0  ;;  %vm2931_vm8 = vweird.f32 %v4866_v30 }
 0x91f   : > { %v2843_v33 = vshrl.u32 %v2842_v31, 23  ;;  %v2846_v2 = vand.u32 8388607, %v2839_v11  ;;  %vm2840_vm10 = vcmp.le.f32.partialorder %v2839_v11, 0.7853982 }
 0x921   : > { %v3439_v8 = vadd.s32 4294967169, %v2843_v33  ;;  %v2847_v21 = vor.u32 8388608, %v2846_v2 }
 0x923   : > { %v2849_v24 = vadd.s32 1, %v3439_v8 }
 0x925   : > { %vm2850_vm15 = vcmp.gt.s32.totalorder %v2849_v24, 0 }
 0x926   : > { %v2851_v35 = vsel %vm2850_vm15, %v2849_v24, 0 }
 0x927   : > { %v2853_v34 = vand.u32 31, %v2851_v35  ;;  %v2852_v41 = vshrl.u32 %v2851_v35, 5 }
 0x929   : > { %v2854_v39 = vsub.s32 32, %v2853_v34  ;;  %v2856_v45 = vshll.u32 %v4131_v40, %v2853_v34  ;;  %v2859_v47 = vshll.u32 %v4132_v44, %v2853_v34  ;;  %v2862_v52 = vshll.u32 %v4133_v46, %v2853_v34 }
 0x92a   : > { %v2865_v16 = vshll.u32 %v4134_v48, %v2853_v34  ;;  %v2868_v38 = vshll.u32 %v4135_v50, %v2853_v34  ;;  %vm2871_vm0 = vcmp.lt.s32.totalorder %v2852_v41, 1  ;;  %vm2874_vm1 = vcmp.lt.s32.totalorder %v2852_v41, 4 }
 0x92b   : > { %v2857_v49 = vshrl.u32 %v4132_v44, %v2854_v39  ;;  %v2860_v51 = vshrl.u32 %v4133_v46, %v2854_v39  ;;  %v2863_v18 = vshrl.u32 %v4134_v48, %v2854_v39  ;;  %v2866_v53 = vshrl.u32 %v4135_v50, %v2854_v39 }
 0x92c   : > { %v2869_v37 = vshrl.u32 %v4136_v57, %v2854_v39  ;;  %v2855_v43 = vshrl.u32 %v4131_v40, %v2854_v39  ;;  %vm2873_vm3 = vcmp.lt.s32.totalorder %v2852_v41, 3  ;;  %vm2872_vm4 = vcmp.lt.s32.totalorder %v2852_v41, 2 }
 0x92d   : > { %v2858_v54 = vor.u32 %v2857_v49, %v2856_v45  ;;  %v2861_v15 = vor.u32 %v2860_v51, %v2859_v47  ;;  %v2864_v29 = vor.u32 %v2863_v18, %v2862_v52  ;;  %v2867_v55 = vor.u32 %v2866_v53, %v2865_v16 }
 0x92e   : > { %v2870_v44 = vor.u32 %v2869_v37, %v2868_v38  ;;  %v2887_v57 = vshll.u32 %v2847_v21, 8 }
 0x92f   : > { %v2876_v56 = vsel %vm2874_vm1, %v2864_v29, 2102212464  ;;  %v2879_v46 = vsel %vm2871_vm0, %v2858_v54, %v2861_v15  ;;  %v2883_v58 = vsel %vm2871_vm0, %v2861_v15, %v2864_v29  ;;  %v2880_v48 = vsel %vm2874_vm1, %v2867_v55, 920167782 }
 0x930   : > { %v2884_v27 = vsel %vm2874_vm1, %v2870_v44, 1326507024  ;;  %v2881_v50 = vsel %vm2873_vm3, %v2864_v29, %v2880_v48  ;;  %v2875_v19 = vsel %vm2871_vm0, %v2855_v43, %v2858_v54  ;;  %v2877_v59 = vsel %vm2873_vm3, %v2861_v15, %v2876_v56  ;;  %v3443_v44 = vld [vmem:[%s5053_s2] ss:$0 sm:$0xff]  ;;  %s3453_s2 = sshll.u32 %s4365_s0, 7  ;;  %s4138_s0 = smov [#allocation15]  }
 0x931   : > { %v2885_v28 = vsel %vm2873_vm3, %v2867_v55, %v2884_v27  ;;  %v2882_v12 = vsel %vm2872_vm4, %v2879_v46, %v2881_v50  ;;  %v2878_v10 = vsel %vm2872_vm4, %v2875_v19, %v2877_v59  ;;  %v3444_v43 = vld [vmem:[%s5054_s7] ss:$0 sm:$0xff]  ;;  %v3447_v19 = vld [vmem:[%s5054_s7 + $0x2] ss:$0 sm:$0xff]  ;;  %s4918_s3 = scalar_lea.hbm %s4342_s20, %s3453_s2 }
 0x932   : > { %v2886_v60 = vsel %vm2872_vm4, %v2883_v58, %v2885_v28  ;;  %v4886_v9 = vmul.u32.u64.low %v2887_v57, %v2882_v12  ;;  %v4887_v17 = vmul.u32.u64.high %v2887_v57, %v2882_v12, %v4886_v9  ;;  %v2894_v62 = vmul.u32 %v2887_v57, %v2878_v10  ;;  %v3445_v48 = vld [vmem:[%s5055_s26] ss:$0 sm:$0xff]  ;;  %v3446_v28 = vld [vmem:[%s5054_s7 + $0x1] ss:$0 sm:$0xff]  ;;  %s1263_s26 = scalar_lea.vmem [#allocation15], %s3362_s16  ;;  %s4006_s16 = sshll.u32 %s4138_s0, 4  ;;  %s4007_s16 = int_to_ptr.vmem [resolvable:$false] %s4006_s16 }
 0x933   : > { %v4883_v61 = vmul.u32.u64.low %v2887_v57, %v2886_v60  ;;  %v4884_v13 = vmul.u32.u64.high %v2887_v57, %v2886_v60, %v4883_v61  ;;  %v3072_v60 = vld [vmem:[%s5007_s6] sm:$0xff]  ;;  %s3177_s1 = sshll.u32 %s1263_s26, 4  ;;  %s4920_s1 = int_to_ptr.vmem [resolvable:$true] %s3177_s1 }
 0x934   : > { %v2897_v40 = vadd.s32 1, %v4887_v17  ;;  %v3073_v61 = vld [vmem:[%s5007_s6 + $0x8] sm:$0xff]  ;;  %v3448_v10 = vld [vmem:[%s4327_s27] ss:$0 sm:$0xff]  ;;  %s4002_s5 = scalar_lea.vmem %s4920_s1, 128  ;;  %s4008_s6 = scalar_lea.vmem %s4007_s16, 256 }
 0x935   : > { %vm2896_vm5 = vc.u32 %v4884_v13, %v4886_v9  ;;  %v2895_v22 = vadd.s32 %v4886_v9, %v4884_v13  ;;  %p4003_p10 = scmp.ne.s32.totalorder %s4920_s1, %s4002_s5  ;;  %p4009_p13 = scmp.lt.s32.totalorder %s4920_s1, %s4007_s16 }
 0x936   : > { %v2898_v63 = vsel %vm2896_vm5, %v2897_v40, %v4887_v17  ;;  %v3582_v17 = vpack.c.bf16 %v3073_v61, %v3072_v60  ;;  %v3450_v40 = vld [vmem:[%s4337_s12] ss:$0 sm:$0xff]  ;;  %p4010_p1 = scmp.lt.s32.totalorder %s4008_s6, %s4002_s5 }
 0x937   : > { %v2899_v0 = vadd.s32 %v2898_v63, %v2894_v62  ;;  %v3584_v62 = vadd.f32 %v3450_v40, %v3448_v10  ;;  %p4004_p8 = pnand %p4003_p10, %p5056_p7 }
 0x938   : > { %p4011_p2 = por %p4010_p1, %p4009_p13 }
 0x939   : > { %v2900_v36 = vadd.s32 536870912, %v2899_v0  ;;  %p4005_p11 = pneg %p4004_p8 }
 0x93b   : > { %v2901_v3 = vshrl.u32 %v2900_v36, 30  ;;  %p4012_p0 = pnand %p4011_p2, %p4005_p11 }
 0x93d   : > { %v2902_v5 = vshll.u32 %v2901_v3, 30  ;;  %v2925_v45 = vsub.s32 4, %v2901_v3 }
 0x93f   : > { %v2903_v1 = vsub.s32 %v2899_v0, %v2902_v5  ;;  %v2926_v51 = vsel %vm2841_vm9, %v2925_v45, %v2901_v3 }
 0x940   : > { %v2928_v18 = vsel %vm2840_vm10, 0, %v2926_v51 }
 0x941   : > { %v2905_v4 = vsub.s32 0, %v2903_v1  ;;  %v2932_v16 = vadd.s32 3, %v2928_v18 }
 0x943   : > { %v3440_v6 = vmin.u32 %v2905_v4, %v2903_v1  ;;  %v2933_v53 = vand.u32 3, %v2932_v16 }
 0x945   : > { %v2907_v42 = vclz %v3440_v6  ;;  %vm2938_vm11 = vcmp.eq.s32.totalorder %v2933_v53, 2  ;;  %vm2935_vm12 = vcmp.eq.s32.totalorder %v2933_v53, 0  ;;  %vm2934_vm14 = vcmp.lt.s32.totalorder %v2933_v53, 2 }
 0x947   : > { %v3441_v14 = vadd.s32 4294967294, %v2907_v42 }
 0x949   : > { %vm3442_vm7 = vcmp.lt.s32.totalorder %v3441_v14, 0 }
 0x94a   : > { %v2910_v20 = vsel %vm3442_vm7, 0, %v3441_v14 }
 0x94b   : > { %v2911_v23 = vsub.s32 32, %v2910_v20  ;;  %v2915_v26 = vsub.s32 4294967266, %v2910_v20  ;;  %v2912_v31 = vshll.u32 %v2903_v1, %v2910_v20 }
 0x94d   : > { %v2913_v33 = vshrl.u32 %v2895_v22, %v2911_v23  ;;  %v2916_v8 = vadd.s32 127, %v2915_v26 }
 0x94f   : > { %v2914_v24 = vor.u32 %v2913_v33, %v2912_v31  ;;  %v2917_v35 = vshll.u32 %v2916_v8, 23 }
 0x951   : > { %v2918_v34 = vor.u32 4788187, %v2917_v35  ;;  %v2921_v39 = vcvt.s32.f32 %v2914_v24 }
 0x953   : > { %v2919_v2 = vand.u32 2147483647, %v2918_v34 }
 0x955   : > { %v2922_v41 = vmul.f32 %v2921_v39, %v2919_v2 }
 0x957   : > { %v2923_v47 = vxor.u32 2147483648, %v2922_v41 }
 0x959   : > { %v2924_v49 = vsel %vm2841_vm9, %v2923_v47, %v2922_v41 }
 0x95a   : > { %v2927_v52 = vsel %vm2840_vm10, %v4866_v30, %v2924_v49 }
 0x95b   : > { %3800 = vcosq.f32 %v2927_v52 }
 0x95c   : > { %3802 = vsinq.f32 %v2927_v52 }
 0x965   : > { %v3801_v38 = vpop.eup %3800 }
 0x966   : > { %v3803_v37 = vpop.eup %3802  ;;  %v2939_v21 = vxor.u32 2147483648, %v3801_v38 }
 0x967   : > { %v2936_v54 = vxor.u32 2147483648, %v3803_v37 }
 0x968   : > { %v2940_v11 = vsel %vm2938_vm11, %v2939_v21, %v3803_v37 }
 0x969   : > { %v2937_v15 = vsel %vm2935_vm12, %v3801_v38, %v2936_v54 }
 0x96a   : > { %v2941_v29 = vsel %vm2934_vm14, %v2937_v15, %v2940_v11 }
 0x96b   : > { %v2942_v55 = vsel %vm2931_vm8, nan, %v2941_v29 }
 0x96c   : > { %v2944_v56 = vmul.f32 %v2942_v55, %v2942_v55 }
 0x96e   : > { %v2951_v46 = vmul.f32 %v3443_v44, %v2944_v56 }
 0x970   : > { %v2952_v58 = vadd.f32 %v2951_v46, %v4863_v32 }
 0x972   : > { %2956 = vst.msk [vmem:[#allocation2 + $0x8] sm:$0xff] %vm1371_vm2, %v2952_v58 }
 0x979   : > { %v2957_v27 = vld [vmem:[#allocation2 + $0x7] sm:$0xff] }
 0x97a   : > { %v2972_v50 = vld [vmem:[#allocation2 + $0x8] sm:$0xff]  ;;  %v2963_v57 = vmul.f32 %v3444_v43, %v2957_v27 }
 0x97b   : > { %v2980_v30 = vld [vmem:[#allocation2 + $0x9] sm:$0xff]  ;;  %v2978_v12 = vmul.f32 %v3446_v28, %v2972_v50 }
 0x97c   : > { %v2971_v59 = vadd.f32 %v3445_v48, %v2963_v57  ;;  %v2986_v9 = vmul.f32 %v3447_v19, %v2980_v30 }
 0x97e   : > { %v2979_v13 = vadd.f32 %v2978_v12, %v2971_v59 }
 0x980   : > { %v2987_v32 = vadd.f32 %v2986_v9, %v2979_v13 }
 0x982   : > { %3545 = vmatmul.mubr.msk.f32.vlgmr.msra.gmra.mrb[6].mxu1 %vm1371_vm2, %v2987_v32 }
 0x983   : > { %3583 = vmatpush3.bf16.msra.mxu1 %v3582_v17  ;;  %3551 = vmatprep.mubr.msk.f32.mxu1 %vm4130_vm6, %v4128_v7 }
 0x98a   : > { %3552 = vmatmul.mubr.msk.f32.vlgmr.msra.gmra.mrb[6].mxu1 %vm2239_vm13, %v4810_v25 }
 0xa5d   : > { %v3150_v63 = vpop.f32.mrb[6].mxu1 }
 0xa5e   : > { %v3585_v0 = vadd.f32 %v3584_v62, %v3150_v63  ;;  %v3553_v36 = vpop.f32.mrb[7].mxu1 }
 0xa60   : > { %v3155_v3 = vmul.f32 %v3585_v0, %v3585_v0 }
 0xa62   : > { %v3156_v5 = vsel %vm1371_vm2, %v3155_v3, 0.0 }
 0xa63   : > { %3157 = vadd.xlane.f32.xlu0 %v3156_v5 }
 0xaf0   : > { %v3158_v1 = vpop.xlane.xlu0 %3157 }
 0xaf1   : > { %v3159_v4 = vmax.f32 %v3158_v1, 1e-24 }
 0xaf3   : > { %3804 = vrsqrt.f32 %v3159_v4 }
 0xafd   : > { %v3805_v7 = vpop.eup %3804 }
 0xafe   : > { %v3161_v25 = vmul.f32 %v3805_v7, %v3585_v0 }
 0xb00   : > { %3162 = vst.msk [vmem:[%s1263_s26] sm:$0xff] %vm1371_vm2, %v3161_v25 }
 0xb01   : > { %4015 = shalt.err (!%p4012_p0)
}
 0xb02   : > { %s4016_s22 = scalar_lea.hbm %s4918_s3, 128  ;;  %s4020_s2 = scalar_lea.hbm %s4342_s20, 256 }
 0xb03   : > { %p4017_p3 = scmp.ne.s32.totalorder %s4918_s3, %s4016_s22  ;;  %p4021_p5 = scmp.lt.u32.totalorder %s4918_s3, %s4342_s20 }
 0xb04   : > { %p4022_p6 = scmp.lt.u32.totalorder %s4020_s2, %s4016_s22  ;;  %p4024_p10 = scmp.lt.u32.totalorder %s4016_s22, %s4918_s3 }
 0xb05   : > { %p4018_p4 = pnand %p4017_p3, %p5056_p7 }
 0xb06   : > { %p4023_p9 = por %p4022_p6, %p4021_p5 }
 0xb07   : > { %p4019_p12 = pneg %p4018_p4 }
 0xb08   : > { %p4025_p8 = por %p4024_p10, %p4023_p9 }
 0xb0a   : > { %p4026_p11 = pnand %p4025_p8, %p4019_p12 }
 0xb0c   : > { %4029 = shalt.err (!%p4026_p11)
}
 0xb0d   : > { %3645 = dma.vmem_to_hbm [thread:$0]  (%p5056_p7), %s4920_s1, 128, %s4918_s3, %s3164_s4  }
 0xb0e PF: > { %s5057_s5 = sld [smem:[#allocation49_spill]]  ;;  %s5058_s6 = sld [smem:[#allocation53_spill]] }
 0xb0f   : > { %p3687_p13 = scmp.ge.s32.totalorder %s4080_s28, 2 }
 0xb14   : > { %s3189_s26 = sand.u32 1, %s5057_s5   ;;  %p5059_p1 = scmp.ne.s32.totalorder %s5058_s6, 0 }
 0xb15   : > { %s3190_s0 = scalar_lea.sflag [#allocation5], %s3189_s26 }
 0xb16   : > { %p3670_p2 = pnand %p3687_p13, %p5059_p1 }
 0xb18   : > { %4063 = dma.done.wait (!%p3670_p2), %s3190_s0, 128  }
 0xb19   : > { %4065 = vsyncadd (!%p3670_p2), %s3190_s0, 4294967168  ;;  %s5060_s28 = sld [smem:[#allocation51_spill]]  ;;  %s5061_s16 = sld [smem:[#allocation50_spill]] }
 0xb1a   : > { %s5062_s26 = sld [smem:[#allocation52_spill]]  ;;  %s5063_s22 = smov %s4072_s23 }
 0xb1f   : > { %p93_p0 = scmp.ge.s32.totalorder %s5060_s28, 4   ;;  %s5064_s23 = smov %s5061_s16 }
 0xb21   :  { %95 = sbr.rel (!%p93_p0) target bundleno = 87 (0x57), region = 279 }
 0xb28   :  { %3195 = vsyncpa [#allocation4], 1 }
 0xb29   :  { %3197 = vsyncpa [#allocation4 + $0x1], 1 }
 0xb2a   :  { %3198 = vsyncpa [#allocation7], 1 }
 0xb2b   :  { %3199 = vsyncpa [#allocation10], 1 }
 0xb2c   :  { %3200 = vsyncpa [#allocation13], 1 }
 0xb2d   :  { %3201 = vsyncpa [#allocation5], 1 }
 0xb2e   :  { %3203 = vsyncpa [#allocation5 + $0x1], 1 }

</bundles_post_ra>
